<compile_context>
chip_gen: v7x
topology: tpu7x:2x2x1
jax: 0.10.0
libtpu: 0.0.40
codegen_flags: <defaults>
</compile_context>

<pallas_src>
import jax
import jax.numpy as jnp
from jax.experimental import pallas as pl
from jax.experimental.pallas import tpu as pltpu

# ---------------- small synthetic AST config ----------------
EMBED_DIM = 64          # "tiny" synthetic ViT width
NUM_HEADS = 4
HEAD_DIM = EMBED_DIM // NUM_HEADS
DEPTH = 2               # number of transformer blocks
MLP_HIDDEN = 4 * EMBED_DIM
PATCH = 16
FSTRIDE = 10
TSTRIDE = 10
INPUT_FDIM = 48         # frequency bins
INPUT_TDIM = 64         # time frames
LN_EPS = 1e-6
INV_SQRT2 = 0.7071067811865476


def get_shape(fdim, tdim):
    f_dim = (fdim - PATCH) // FSTRIDE + 1
    t_dim = (tdim - PATCH) // TSTRIDE + 1
    return f_dim, t_dim


F_DIM, T_DIM = get_shape(INPUT_FDIM, INPUT_TDIM)
NUM_PATCHES = F_DIM * T_DIM
N_TOKENS = NUM_PATCHES + 2          # cls + dist + patches


# ---------------- fused Pallas kernel ----------------
def _layernorm(x, w, b):
    mu = jnp.mean(x, axis=-1, keepdims=True)
    var = jnp.mean((x - mu) ** 2, axis=-1, keepdims=True)
    return (x - mu) * jax.lax.rsqrt(var + LN_EPS) * w + b


def _ast_fused_kernel(patches_ref, pembw_ref, tok_base_ref,
                      ln1w_ref, ln1b_ref,
                      qkvw_ref, qkvb_ref, aprojw_ref, aprojb_ref,
                      ln2w_ref, ln2b_ref,
                      fc1w_ref, fc1b_ref, fc2w_ref, fc2b_ref,
                      normw_ref, normb_ref,
                      o_ref):
    bf = jnp.bfloat16
    D, H, dh = EMBED_DIM, NUM_HEADS, HEAD_DIM

    # ---- patch embedding for all tokens (rows 0,1 of patches are zeros) ----
    # tok_base already holds: rows 0,1 -> cls/dist + pos; rows 2: -> pos + conv bias.
    x = jnp.dot(patches_ref[0], pembw_ref[...],
                preferred_element_type=jnp.float32) + tok_base_ref[...]   # (N, D) f32

    # ---- transformer blocks (weights stacked on a leading depth axis) ----
    for d in range(DEPTH):
        # --- attention branch ---
        xn = _layernorm(x, ln1w_ref[d], ln1b_ref[d])
        # one fused, lane-dense QKV matmul; 1/sqrt(dh) pre-folded into Q cols.
        qkv = jnp.dot(xn.astype(bf), qkvw_ref[d],
                      preferred_element_type=jnp.float32) + qkvb_ref[d]    # (N, 3D) f32
        ctxs = []
        for h in range(H):
            qh = qkv[:, h * dh:(h + 1) * dh].astype(bf)                    # (N, dh)
            kh = qkv[:, D + h * dh:D + (h + 1) * dh].astype(bf)            # (N, dh)
            vh = qkv[:, 2 * D + h * dh:2 * D + (h + 1) * dh].astype(bf)    # (N, dh)
            # scores = q @ k^T without an explicit transpose op
            s = jax.lax.dot_general(qh, kh, (((1,), (1,)), ((), ())),
                                    preferred_element_type=jnp.float32)    # (N, N)
            s = s - jnp.max(s, axis=-1, keepdims=True)
            p = jnp.exp(s)
            p = p * pl.reciprocal(jnp.sum(p, axis=-1, keepdims=True), approx=True)
            ctxs.append(jnp.dot(p.astype(bf), vh,
                                preferred_element_type=jnp.float32).astype(bf))
        ctx = jnp.concatenate(ctxs, axis=-1)                               # (N, D) bf16
        x = x + jnp.dot(ctx, aprojw_ref[d],
                        preferred_element_type=jnp.float32) + aprojb_ref[d]

        # --- MLP branch ---
        xn2 = _layernorm(x, ln2w_ref[d], ln2b_ref[d])
        h1 = jnp.dot(xn2.astype(bf), fc1w_ref[d],
                     preferred_element_type=jnp.float32) + fc1b_ref[d]
        h1 = 0.5 * h1 * (1.0 + jax.lax.erf(h1 * INV_SQRT2))   # exact GELU (torch default)
        x = x + jnp.dot(h1.astype(bf), fc2w_ref[d],
                        preferred_element_type=jnp.float32) + fc2b_ref[d]

    # ---- final LayerNorm on cls/dist tokens + (x0 + x1)/2 pool ----
    x2 = x[0:2, :]
    xn = _layernorm(x2, normw_ref[...], normb_ref[...])
    o_ref[0] = jnp.mean(xn, axis=0, keepdims=True)            # (1, D)


def _rep(shape):
    z = (0,) * len(shape)
    return pl.BlockSpec(shape, lambda b, _z=z: _z)


def ast_fused_pallas(patches, pk):
    """patches: (B, N_TOKENS, PATCH*PATCH) bf16 (rows 0,1 zero). Returns (B, D) f32."""
    B, N, KK = patches.shape
    D = EMBED_DIM
    weights = (
        pk["patch_w"], pk["tok_base"],
        pk["ln1_w"], pk["ln1_b"],
        pk["qkv_w"], pk["qkv_b"], pk["proj_w"], pk["proj_b"],
        pk["ln2_w"], pk["ln2_b"],
        pk["fc1_w"], pk["fc1_b"], pk["fc2_w"], pk["fc2_b"],
        pk["norm_w"], pk["norm_b"],
    )
    in_specs = [pl.BlockSpec((1, N, KK), lambda b: (b, 0, 0))]
    in_specs += [_rep(w.shape) for w in weights]
    out = pl.pallas_call(
        _ast_fused_kernel,
        out_shape=jax.ShapeDtypeStruct((B, 1, D), jnp.float32),
        grid=(B,),
        in_specs=in_specs,
        out_specs=pl.BlockSpec((1, 1, D), lambda b: (b, 0, 0)),
        compiler_params=pltpu.CompilerParams(
            dimension_semantics=("parallel",)),   # 2 TCs split the batch on v7x
    )(patches, *weights)
    return out[:, 0, :]


# ---------------- forward pass (AST inference path) ----------------
@jax.jit
def ast_forward(x, packed):
    """x: (B, 1, time, freq) float32 -> (B, EMBED_DIM) pooled (cls+dist)/2 features."""
    x = jnp.transpose(x, (0, 1, 3, 2))                  # (B, 1, F, T), like torch .transpose(2,3)
    B = x.shape[0]
    f_dim, t_dim = get_shape(x.shape[2], x.shape[3])
    P = f_dim * t_dim
    # im2col for Conv2d(1, D, kernel=(16,16), stride=(10,10)) in one XLA op.
    patches = jax.lax.conv_general_dilated_patches(
        x, filter_shape=(PATCH, PATCH),
        window_strides=(FSTRIDE, TSTRIDE), padding="VALID")   # (B, 256, f_dim, t_dim)
    patches = patches.reshape(B, PATCH * PATCH, P)
    patches = jnp.transpose(patches, (0, 2, 1))               # (B, P, 256), patch order (f, t)
    # prepend two zero rows standing in for the cls/dist token positions
    patches = jnp.pad(patches, ((0, 0), (2, 0), (0, 0))).astype(jnp.bfloat16)
    return ast_fused_pallas(patches, packed)


# ---------------- deterministic parameter init (torch-like layout) ----------------
def init_params(key):
    D, Hm = EMBED_DIM, MLP_HIDDEN
    n_tokens = N_TOKENS
    ks = iter(jax.random.split(key, 8 + DEPTH * 8))
    std = 0.02

    def nrm(shape):
        return std * jax.random.normal(next(ks), shape, dtype=jnp.float32)

    params = {
        "proj_w": nrm((PATCH * PATCH, D)),   # conv weight in im2col layout (K, D)
        "proj_b": jnp.zeros((1, D), jnp.float32),
        "cls_token": nrm((1, 1, D)),
        "dist_token": nrm((1, 1, D)),
        "pos_embed": nrm((1, n_tokens, D)),
        "norm_w": jnp.ones((1, D), jnp.float32),
        "norm_b": jnp.zeros((1, D), jnp.float32),
        "blocks": [],
    }
    for _ in range(DEPTH):
        params["blocks"].append(dict(
            n1w=jnp.ones((1, D), jnp.float32), n1b=jnp.zeros((1, D), jnp.float32),
            qkvw=nrm((D, 3 * D)), qkvb=jnp.zeros((1, 3 * D), jnp.float32),
            projw=nrm((D, D)), projb=jnp.zeros((1, D), jnp.float32),
            n2w=jnp.ones((1, D), jnp.float32), n2b=jnp.zeros((1, D), jnp.float32),
            fc1w=nrm((D, Hm)), fc1b=jnp.zeros((1, Hm), jnp.float32),
            fc2w=nrm((Hm, D)), fc2b=jnp.zeros((1, D), jnp.float32),
        ))
    return params


def pack_params(p):
    """One-time repack into kernel layout: depth-stacked, fused QKV, bf16 MXU weights."""
    D = EMBED_DIM
    scale = HEAD_DIM ** -0.5
    bf = jnp.bfloat16

    pos = p["pos_embed"][0]                                          # (N, D)
    prefix = jnp.concatenate([p["cls_token"][0], p["dist_token"][0]], axis=0) + pos[:2]
    rest = pos[2:] + p["proj_b"]                                     # conv bias folded in
    tok_base = jnp.concatenate([prefix, rest], axis=0)               # (N, D) f32

    def stack(k):
        return jnp.stack([b[k] for b in p["blocks"]], axis=0)

    # fold 1/sqrt(dh) into the Q columns of the fused qkv weight & bias.
    qscale = jnp.concatenate(
        [jnp.full((D,), scale, jnp.float32), jnp.ones((2 * D,), jnp.float32)], axis=0)
    qkvw = stack("qkvw") * qscale                                    # (dep, D, 3D)
    qkvb = stack("qkvb") * qscale                                    # (dep, 1, 3D)

    return dict(
        patch_w=p["proj_w"].astype(bf),
        tok_base=tok_base,
        ln1_w=stack("n1w"), ln1_b=stack("n1b"),
        qkv_w=qkvw.astype(bf), qkv_b=qkvb,
        proj_w=stack("projw").astype(bf), proj_b=stack("projb"),
        ln2_w=stack("n2w"), ln2_b=stack("n2b"),
        fc1_w=stack("fc1w").astype(bf), fc1_b=stack("fc1b"),
        fc2_w=stack("fc2w").astype(bf), fc2_b=stack("fc2b"),
        norm_w=p["norm_w"], norm_b=p["norm_b"],
    )


# TODO(synk): training-only stochastic branches (CrossDomainClassSpecificFrequencyMixStyle,
# patch_mix, ReverseLayerF/adversarial path) and the unused mlp_head/domain/device heads
# are not executed in the default forward and are not implemented here.

if __name__ == "__main__":
    key = jax.random.PRNGKey(0)
    kx, kp = jax.random.split(key)
    x = jax.random.normal(kx, (2, 1, INPUT_TDIM, INPUT_FDIM), dtype=jnp.float32)
    params = init_params(kp)
    packed = pack_params(params)
    out = ast_forward(x, packed)
    out = jax.block_until_ready(out)
    assert out.shape == (2, EMBED_DIM), out.shape
    assert bool(jnp.all(jnp.isfinite(out)))
    print("KERNEL_OK")
</pallas_src>

<mosaic_0001>
module attributes {stable_mosaic.version = 11 : i64} {
  func.func @_ast_fused_kernel(%arg0: i32, %arg1: memref<1x22x256xbf16, #tpu.memory_space<vmem>>, %arg2: memref<256x64xbf16, #tpu.memory_space<vmem>>, %arg3: memref<22x64xf32, #tpu.memory_space<vmem>>, %arg4: memref<2x1x64xf32, #tpu.memory_space<vmem>>, %arg5: memref<2x1x64xf32, #tpu.memory_space<vmem>>, %arg6: memref<2x64x192xbf16, #tpu.memory_space<vmem>>, %arg7: memref<2x1x192xf32, #tpu.memory_space<vmem>>, %arg8: memref<2x64x64xbf16, #tpu.memory_space<vmem>>, %arg9: memref<2x1x64xf32, #tpu.memory_space<vmem>>, %arg10: memref<2x1x64xf32, #tpu.memory_space<vmem>>, %arg11: memref<2x1x64xf32, #tpu.memory_space<vmem>>, %arg12: memref<2x64x256xbf16, #tpu.memory_space<vmem>>, %arg13: memref<2x1x256xf32, #tpu.memory_space<vmem>>, %arg14: memref<2x256x64xbf16, #tpu.memory_space<vmem>>, %arg15: memref<2x1x64xf32, #tpu.memory_space<vmem>>, %arg16: memref<1x64xf32, #tpu.memory_space<vmem>>, %arg17: memref<1x64xf32, #tpu.memory_space<vmem>>, %arg18: memref<1x1x64xf32, #tpu.memory_space<vmem>>) attributes {dimension_semantics = [#tpu.dimension_semantics<parallel>], iteration_bounds = array<i64: 2>, scalar_prefetch = 0 : i64, scratch_operands = 0 : i64, tpu.core_type = #tpu.core_type<tc>, window_params = [{transform_indices = @transform_0, window_bounds = array<i64: 1, 22, 256>}, {pipeline_mode = #tpu.pipeline_mode<synchronous>, transform_indices = @transform_1, window_bounds = array<i64: 256, 64>}, {pipeline_mode = #tpu.pipeline_mode<synchronous>, transform_indices = @transform_2, window_bounds = array<i64: 22, 64>}, {pipeline_mode = #tpu.pipeline_mode<synchronous>, transform_indices = @transform_3, window_bounds = array<i64: 2, 1, 64>}, {pipeline_mode = #tpu.pipeline_mode<synchronous>, transform_indices = @transform_4, window_bounds = array<i64: 2, 1, 64>}, {pipeline_mode = #tpu.pipeline_mode<synchronous>, transform_indices = @transform_5, window_bounds = array<i64: 2, 64, 192>}, {pipeline_mode = #tpu.pipeline_mode<synchronous>, transform_indices = @transform_6, window_bounds = array<i64: 2, 1, 192>}, {pipeline_mode = #tpu.pipeline_mode<synchronous>, transform_indices = @transform_7, window_bounds = array<i64: 2, 64, 64>}, {pipeline_mode = #tpu.pipeline_mode<synchronous>, transform_indices = @transform_8, window_bounds = array<i64: 2, 1, 64>}, {pipeline_mode = #tpu.pipeline_mode<synchronous>, transform_indices = @transform_9, window_bounds = array<i64: 2, 1, 64>}, {pipeline_mode = #tpu.pipeline_mode<synchronous>, transform_indices = @transform_10, window_bounds = array<i64: 2, 1, 64>}, {pipeline_mode = #tpu.pipeline_mode<synchronous>, transform_indices = @transform_11, window_bounds = array<i64: 2, 64, 256>}, {pipeline_mode = #tpu.pipeline_mode<synchronous>, transform_indices = @transform_12, window_bounds = array<i64: 2, 1, 256>}, {pipeline_mode = #tpu.pipeline_mode<synchronous>, transform_indices = @transform_13, window_bounds = array<i64: 2, 256, 64>}, {pipeline_mode = #tpu.pipeline_mode<synchronous>, transform_indices = @transform_14, window_bounds = array<i64: 2, 1, 64>}, {pipeline_mode = #tpu.pipeline_mode<synchronous>, transform_indices = @transform_15, window_bounds = array<i64: 1, 64>}, {pipeline_mode = #tpu.pipeline_mode<synchronous>, transform_indices = @transform_16, window_bounds = array<i64: 1, 64>}, {transform_indices = @transform_17, window_bounds = array<i64: 1, 1, 64>}]} {
    %c0 = arith.constant 0 : index
    %c0_0 = arith.constant 0 : index
    %c0_1 = arith.constant 0 : index
    %0 = vector.load %arg1[%c0, %c0_0, %c0_1] : memref<1x22x256xbf16, #tpu.memory_space<vmem>>, vector<1x22x256xbf16>
    %1 = vector.shape_cast %0 : vector<1x22x256xbf16> to vector<22x256xbf16>
    %c0_2 = arith.constant 0 : index
    %c0_3 = arith.constant 0 : index
    %2 = vector.load %arg2[%c0_2, %c0_3] : memref<256x64xbf16, #tpu.memory_space<vmem>>, vector<256x64xbf16>
    %cst = arith.constant dense<0.000000e+00> : vector<22x64xf32>
    %3 = tpu.matmul %1, %2, %cst {dimension_numbers = #tpu.dot_dimension_numbers<[1], [0], [0], [1], [0, 0, 1, 1], [], []>} : vector<22x256xbf16>, vector<256x64xbf16>, vector<22x64xf32> -> vector<22x64xf32>
    %c0_4 = arith.constant 0 : index
    %c0_5 = arith.constant 0 : index
    %4 = vector.load %arg3[%c0_4, %c0_5] : memref<22x64xf32, #tpu.memory_space<vmem>>, vector<22x64xf32>
    %5 = arith.addf %3, %4 : vector<22x64xf32>
    %c0_6 = arith.constant 0 : index
    %c0_7 = arith.constant 0 : index
    %c0_8 = arith.constant 0 : index
    %6 = vector.load %arg4[%c0_6, %c0_7, %c0_8] : memref<2x1x64xf32, #tpu.memory_space<vmem>>, vector<1x1x64xf32>
    %7 = vector.shape_cast %6 : vector<1x1x64xf32> to vector<1x64xf32>
    %c0_9 = arith.constant 0 : index
    %c0_10 = arith.constant 0 : index
    %c0_11 = arith.constant 0 : index
    %8 = vector.load %arg5[%c0_9, %c0_10, %c0_11] : memref<2x1x64xf32, #tpu.memory_space<vmem>>, vector<1x1x64xf32>
    %9 = vector.shape_cast %8 : vector<1x1x64xf32> to vector<1x64xf32>
    %cst_12 = arith.constant dense<0.000000e+00> : vector<22xf32>
    %10 = vector.multi_reduction <add>, %5, %cst_12 [1] : vector<22x64xf32> to vector<22xf32>
    %11 = vector.shape_cast %10 : vector<22xf32> to vector<22x1xf32>
    %cst_13 = arith.constant 6.400000e+01 : f32
    %12 = vector.broadcast %cst_13 : f32 to vector<22x1xf32>
    %13 = arith.divf %11, %12 : vector<22x1xf32>
    %14 = vector.broadcast %13 : vector<22x1xf32> to vector<22x64xf32>
    %15 = arith.subf %5, %14 : vector<22x64xf32>
    %16 = arith.mulf %15, %15 : vector<22x64xf32>
    %cst_14 = arith.constant dense<0.000000e+00> : vector<22xf32>
    %17 = vector.multi_reduction <add>, %16, %cst_14 [1] : vector<22x64xf32> to vector<22xf32>
    %18 = vector.shape_cast %17 : vector<22xf32> to vector<22x1xf32>
    %cst_15 = arith.constant 6.400000e+01 : f32
    %19 = vector.broadcast %cst_15 : f32 to vector<22x1xf32>
    %20 = arith.divf %18, %19 : vector<22x1xf32>
    %21 = vector.broadcast %13 : vector<22x1xf32> to vector<22x64xf32>
    %22 = arith.subf %5, %21 : vector<22x64xf32>
    %cst_16 = arith.constant 9.99999997E-7 : f32
    %23 = vector.broadcast %cst_16 : f32 to vector<22x1xf32>
    %24 = arith.addf %20, %23 : vector<22x1xf32>
    %25 = math.rsqrt %24 : vector<22x1xf32>
    %26 = vector.broadcast %25 : vector<22x1xf32> to vector<22x64xf32>
    %27 = arith.mulf %22, %26 : vector<22x64xf32>
    %28 = vector.broadcast %7 : vector<1x64xf32> to vector<22x64xf32>
    %29 = arith.mulf %27, %28 : vector<22x64xf32>
    %30 = vector.broadcast %9 : vector<1x64xf32> to vector<22x64xf32>
    %31 = arith.addf %29, %30 : vector<22x64xf32>
    %32 = arith.truncf %31 : vector<22x64xf32> to vector<22x64xbf16>
    %c0_17 = arith.constant 0 : index
    %c0_18 = arith.constant 0 : index
    %c0_19 = arith.constant 0 : index
    %33 = vector.load %arg6[%c0_17, %c0_18, %c0_19] : memref<2x64x192xbf16, #tpu.memory_space<vmem>>, vector<1x64x192xbf16>
    %34 = vector.shape_cast %33 : vector<1x64x192xbf16> to vector<64x192xbf16>
    %cst_20 = arith.constant dense<0.000000e+00> : vector<22x192xf32>
    %35 = tpu.matmul %32, %34, %cst_20 {dimension_numbers = #tpu.dot_dimension_numbers<[1], [0], [0], [1], [0, 0, 1, 1], [], []>} : vector<22x64xbf16>, vector<64x192xbf16>, vector<22x192xf32> -> vector<22x192xf32>
    %c0_21 = arith.constant 0 : index
    %c0_22 = arith.constant 0 : index
    %c0_23 = arith.constant 0 : index
    %36 = vector.load %arg7[%c0_21, %c0_22, %c0_23] : memref<2x1x192xf32, #tpu.memory_space<vmem>>, vector<1x1x192xf32>
    %37 = vector.shape_cast %36 : vector<1x1x192xf32> to vector<1x192xf32>
    %38 = vector.broadcast %37 : vector<1x192xf32> to vector<22x192xf32>
    %39 = arith.addf %35, %38 : vector<22x192xf32>
    %40 = vector.extract_strided_slice %39 {offsets = [0, 0], sizes = [22, 16], strides = [1, 1]} : vector<22x192xf32> to vector<22x16xf32>
    %41 = arith.truncf %40 : vector<22x16xf32> to vector<22x16xbf16>
    %42 = vector.extract_strided_slice %39 {offsets = [0, 64], sizes = [22, 16], strides = [1, 1]} : vector<22x192xf32> to vector<22x16xf32>
    %43 = arith.truncf %42 : vector<22x16xf32> to vector<22x16xbf16>
    %44 = vector.extract_strided_slice %39 {offsets = [0, 128], sizes = [22, 16], strides = [1, 1]} : vector<22x192xf32> to vector<22x16xf32>
    %45 = arith.truncf %44 : vector<22x16xf32> to vector<22x16xbf16>
    %cst_24 = arith.constant dense<0.000000e+00> : vector<22x22xf32>
    %46 = tpu.matmul %41, %43, %cst_24 {dimension_numbers = #tpu.dot_dimension_numbers<[1], [1], [0], [0], [0, 0, 1, 0], [], []>} : vector<22x16xbf16>, vector<22x16xbf16>, vector<22x22xf32> -> vector<22x22xf32>
    %cst_25 = arith.constant dense<0xFF800000> : vector<22xf32>
    %47 = vector.multi_reduction <maximumf>, %46, %cst_25 [1] : vector<22x22xf32> to vector<22xf32>
    %48 = vector.shape_cast %47 : vector<22xf32> to vector<22x1xf32>
    %49 = vector.broadcast %48 : vector<22x1xf32> to vector<22x22xf32>
    %50 = arith.subf %46, %49 : vector<22x22xf32>
    %51 = math.exp %50 : vector<22x22xf32>
    %cst_26 = arith.constant dense<0.000000e+00> : vector<22xf32>
    %52 = vector.multi_reduction <add>, %51, %cst_26 [1] : vector<22x22xf32> to vector<22xf32>
    %53 = vector.shape_cast %52 : vector<22xf32> to vector<22x1xf32>
    %54 = tpu.reciprocal %53 {approx = true} : vector<22x1xf32> -> vector<22x1xf32>
    %55 = vector.broadcast %54 : vector<22x1xf32> to vector<22x22xf32>
    %56 = arith.mulf %51, %55 : vector<22x22xf32>
    %57 = arith.truncf %56 : vector<22x22xf32> to vector<22x22xbf16>
    %cst_27 = arith.constant dense<0.000000e+00> : vector<22x16xf32>
    %58 = tpu.matmul %57, %45, %cst_27 {dimension_numbers = #tpu.dot_dimension_numbers<[1], [0], [0], [1], [0, 0, 1, 1], [], []>} : vector<22x22xbf16>, vector<22x16xbf16>, vector<22x16xf32> -> vector<22x16xf32>
    %59 = arith.truncf %58 : vector<22x16xf32> to vector<22x16xbf16>
    %60 = vector.extract_strided_slice %39 {offsets = [0, 16], sizes = [22, 16], strides = [1, 1]} : vector<22x192xf32> to vector<22x16xf32>
    %61 = arith.truncf %60 : vector<22x16xf32> to vector<22x16xbf16>
    %62 = vector.extract_strided_slice %39 {offsets = [0, 80], sizes = [22, 16], strides = [1, 1]} : vector<22x192xf32> to vector<22x16xf32>
    %63 = arith.truncf %62 : vector<22x16xf32> to vector<22x16xbf16>
    %64 = vector.extract_strided_slice %39 {offsets = [0, 144], sizes = [22, 16], strides = [1, 1]} : vector<22x192xf32> to vector<22x16xf32>
    %65 = arith.truncf %64 : vector<22x16xf32> to vector<22x16xbf16>
    %cst_28 = arith.constant dense<0.000000e+00> : vector<22x22xf32>
    %66 = tpu.matmul %61, %63, %cst_28 {dimension_numbers = #tpu.dot_dimension_numbers<[1], [1], [0], [0], [0, 0, 1, 0], [], []>} : vector<22x16xbf16>, vector<22x16xbf16>, vector<22x22xf32> -> vector<22x22xf32>
    %cst_29 = arith.constant dense<0xFF800000> : vector<22xf32>
    %67 = vector.multi_reduction <maximumf>, %66, %cst_29 [1] : vector<22x22xf32> to vector<22xf32>
    %68 = vector.shape_cast %67 : vector<22xf32> to vector<22x1xf32>
    %69 = vector.broadcast %68 : vector<22x1xf32> to vector<22x22xf32>
    %70 = arith.subf %66, %69 : vector<22x22xf32>
    %71 = math.exp %70 : vector<22x22xf32>
    %cst_30 = arith.constant dense<0.000000e+00> : vector<22xf32>
    %72 = vector.multi_reduction <add>, %71, %cst_30 [1] : vector<22x22xf32> to vector<22xf32>
    %73 = vector.shape_cast %72 : vector<22xf32> to vector<22x1xf32>
    %74 = tpu.reciprocal %73 {approx = true} : vector<22x1xf32> -> vector<22x1xf32>
    %75 = vector.broadcast %74 : vector<22x1xf32> to vector<22x22xf32>
    %76 = arith.mulf %71, %75 : vector<22x22xf32>
    %77 = arith.truncf %76 : vector<22x22xf32> to vector<22x22xbf16>
    %cst_31 = arith.constant dense<0.000000e+00> : vector<22x16xf32>
    %78 = tpu.matmul %77, %65, %cst_31 {dimension_numbers = #tpu.dot_dimension_numbers<[1], [0], [0], [1], [0, 0, 1, 1], [], []>} : vector<22x22xbf16>, vector<22x16xbf16>, vector<22x16xf32> -> vector<22x16xf32>
    %79 = arith.truncf %78 : vector<22x16xf32> to vector<22x16xbf16>
    %80 = vector.extract_strided_slice %39 {offsets = [0, 32], sizes = [22, 16], strides = [1, 1]} : vector<22x192xf32> to vector<22x16xf32>
    %81 = arith.truncf %80 : vector<22x16xf32> to vector<22x16xbf16>
    %82 = vector.extract_strided_slice %39 {offsets = [0, 96], sizes = [22, 16], strides = [1, 1]} : vector<22x192xf32> to vector<22x16xf32>
    %83 = arith.truncf %82 : vector<22x16xf32> to vector<22x16xbf16>
    %84 = vector.extract_strided_slice %39 {offsets = [0, 160], sizes = [22, 16], strides = [1, 1]} : vector<22x192xf32> to vector<22x16xf32>
    %85 = arith.truncf %84 : vector<22x16xf32> to vector<22x16xbf16>
    %cst_32 = arith.constant dense<0.000000e+00> : vector<22x22xf32>
    %86 = tpu.matmul %81, %83, %cst_32 {dimension_numbers = #tpu.dot_dimension_numbers<[1], [1], [0], [0], [0, 0, 1, 0], [], []>} : vector<22x16xbf16>, vector<22x16xbf16>, vector<22x22xf32> -> vector<22x22xf32>
    %cst_33 = arith.constant dense<0xFF800000> : vector<22xf32>
    %87 = vector.multi_reduction <maximumf>, %86, %cst_33 [1] : vector<22x22xf32> to vector<22xf32>
    %88 = vector.shape_cast %87 : vector<22xf32> to vector<22x1xf32>
    %89 = vector.broadcast %88 : vector<22x1xf32> to vector<22x22xf32>
    %90 = arith.subf %86, %89 : vector<22x22xf32>
    %91 = math.exp %90 : vector<22x22xf32>
    %cst_34 = arith.constant dense<0.000000e+00> : vector<22xf32>
    %92 = vector.multi_reduction <add>, %91, %cst_34 [1] : vector<22x22xf32> to vector<22xf32>
    %93 = vector.shape_cast %92 : vector<22xf32> to vector<22x1xf32>
    %94 = tpu.reciprocal %93 {approx = true} : vector<22x1xf32> -> vector<22x1xf32>
    %95 = vector.broadcast %94 : vector<22x1xf32> to vector<22x22xf32>
    %96 = arith.mulf %91, %95 : vector<22x22xf32>
    %97 = arith.truncf %96 : vector<22x22xf32> to vector<22x22xbf16>
    %cst_35 = arith.constant dense<0.000000e+00> : vector<22x16xf32>
    %98 = tpu.matmul %97, %85, %cst_35 {dimension_numbers = #tpu.dot_dimension_numbers<[1], [0], [0], [1], [0, 0, 1, 1], [], []>} : vector<22x22xbf16>, vector<22x16xbf16>, vector<22x16xf32> -> vector<22x16xf32>
    %99 = arith.truncf %98 : vector<22x16xf32> to vector<22x16xbf16>
    %100 = vector.extract_strided_slice %39 {offsets = [0, 48], sizes = [22, 16], strides = [1, 1]} : vector<22x192xf32> to vector<22x16xf32>
    %101 = arith.truncf %100 : vector<22x16xf32> to vector<22x16xbf16>
    %102 = vector.extract_strided_slice %39 {offsets = [0, 112], sizes = [22, 16], strides = [1, 1]} : vector<22x192xf32> to vector<22x16xf32>
    %103 = arith.truncf %102 : vector<22x16xf32> to vector<22x16xbf16>
    %104 = vector.extract_strided_slice %39 {offsets = [0, 176], sizes = [22, 16], strides = [1, 1]} : vector<22x192xf32> to vector<22x16xf32>
    %105 = arith.truncf %104 : vector<22x16xf32> to vector<22x16xbf16>
    %cst_36 = arith.constant dense<0.000000e+00> : vector<22x22xf32>
    %106 = tpu.matmul %101, %103, %cst_36 {dimension_numbers = #tpu.dot_dimension_numbers<[1], [1], [0], [0], [0, 0, 1, 0], [], []>} : vector<22x16xbf16>, vector<22x16xbf16>, vector<22x22xf32> -> vector<22x22xf32>
    %cst_37 = arith.constant dense<0xFF800000> : vector<22xf32>
    %107 = vector.multi_reduction <maximumf>, %106, %cst_37 [1] : vector<22x22xf32> to vector<22xf32>
    %108 = vector.shape_cast %107 : vector<22xf32> to vector<22x1xf32>
    %109 = vector.broadcast %108 : vector<22x1xf32> to vector<22x22xf32>
    %110 = arith.subf %106, %109 : vector<22x22xf32>
    %111 = math.exp %110 : vector<22x22xf32>
    %cst_38 = arith.constant dense<0.000000e+00> : vector<22xf32>
    %112 = vector.multi_reduction <add>, %111, %cst_38 [1] : vector<22x22xf32> to vector<22xf32>
    %113 = vector.shape_cast %112 : vector<22xf32> to vector<22x1xf32>
    %114 = tpu.reciprocal %113 {approx = true} : vector<22x1xf32> -> vector<22x1xf32>
    %115 = vector.broadcast %114 : vector<22x1xf32> to vector<22x22xf32>
    %116 = arith.mulf %111, %115 : vector<22x22xf32>
    %117 = arith.truncf %116 : vector<22x22xf32> to vector<22x22xbf16>
    %cst_39 = arith.constant dense<0.000000e+00> : vector<22x16xf32>
    %118 = tpu.matmul %117, %105, %cst_39 {dimension_numbers = #tpu.dot_dimension_numbers<[1], [0], [0], [1], [0, 0, 1, 1], [], []>} : vector<22x22xbf16>, vector<22x16xbf16>, vector<22x16xf32> -> vector<22x16xf32>
    %119 = arith.truncf %118 : vector<22x16xf32> to vector<22x16xbf16>
    %120 = tpu.concatenate %59, %79, %99, %119 in 1 : vector<22x16xbf16>, vector<22x16xbf16>, vector<22x16xbf16>, vector<22x16xbf16> -> vector<22x64xbf16>
    %c0_40 = arith.constant 0 : index
    %c0_41 = arith.constant 0 : index
    %c0_42 = arith.constant 0 : index
    %121 = vector.load %arg8[%c0_40, %c0_41, %c0_42] : memref<2x64x64xbf16, #tpu.memory_space<vmem>>, vector<1x64x64xbf16>
    %122 = vector.shape_cast %121 : vector<1x64x64xbf16> to vector<64x64xbf16>
    %cst_43 = arith.constant dense<0.000000e+00> : vector<22x64xf32>
    %123 = tpu.matmul %120, %122, %cst_43 {dimension_numbers = #tpu.dot_dimension_numbers<[1], [0], [0], [1], [0, 0, 1, 1], [], []>} : vector<22x64xbf16>, vector<64x64xbf16>, vector<22x64xf32> -> vector<22x64xf32>
    %124 = arith.addf %5, %123 : vector<22x64xf32>
    %c0_44 = arith.constant 0 : index
    %c0_45 = arith.constant 0 : index
    %c0_46 = arith.constant 0 : index
    %125 = vector.load %arg9[%c0_44, %c0_45, %c0_46] : memref<2x1x64xf32, #tpu.memory_space<vmem>>, vector<1x1x64xf32>
    %126 = vector.shape_cast %125 : vector<1x1x64xf32> to vector<1x64xf32>
    %127 = vector.broadcast %126 : vector<1x64xf32> to vector<22x64xf32>
    %128 = arith.addf %124, %127 : vector<22x64xf32>
    %c0_47 = arith.constant 0 : index
    %c0_48 = arith.constant 0 : index
    %c0_49 = arith.constant 0 : index
    %129 = vector.load %arg10[%c0_47, %c0_48, %c0_49] : memref<2x1x64xf32, #tpu.memory_space<vmem>>, vector<1x1x64xf32>
    %130 = vector.shape_cast %129 : vector<1x1x64xf32> to vector<1x64xf32>
    %c0_50 = arith.constant 0 : index
    %c0_51 = arith.constant 0 : index
    %c0_52 = arith.constant 0 : index
    %131 = vector.load %arg11[%c0_50, %c0_51, %c0_52] : memref<2x1x64xf32, #tpu.memory_space<vmem>>, vector<1x1x64xf32>
    %132 = vector.shape_cast %131 : vector<1x1x64xf32> to vector<1x64xf32>
    %cst_53 = arith.constant dense<0.000000e+00> : vector<22xf32>
    %133 = vector.multi_reduction <add>, %128, %cst_53 [1] : vector<22x64xf32> to vector<22xf32>
    %134 = vector.shape_cast %133 : vector<22xf32> to vector<22x1xf32>
    %cst_54 = arith.constant 6.400000e+01 : f32
    %135 = vector.broadcast %cst_54 : f32 to vector<22x1xf32>
    %136 = arith.divf %134, %135 : vector<22x1xf32>
    %137 = vector.broadcast %136 : vector<22x1xf32> to vector<22x64xf32>
    %138 = arith.subf %128, %137 : vector<22x64xf32>
    %139 = arith.mulf %138, %138 : vector<22x64xf32>
    %cst_55 = arith.constant dense<0.000000e+00> : vector<22xf32>
    %140 = vector.multi_reduction <add>, %139, %cst_55 [1] : vector<22x64xf32> to vector<22xf32>
    %141 = vector.shape_cast %140 : vector<22xf32> to vector<22x1xf32>
    %cst_56 = arith.constant 6.400000e+01 : f32
    %142 = vector.broadcast %cst_56 : f32 to vector<22x1xf32>
    %143 = arith.divf %141, %142 : vector<22x1xf32>
    %144 = vector.broadcast %136 : vector<22x1xf32> to vector<22x64xf32>
    %145 = arith.subf %128, %144 : vector<22x64xf32>
    %cst_57 = arith.constant 9.99999997E-7 : f32
    %146 = vector.broadcast %cst_57 : f32 to vector<22x1xf32>
    %147 = arith.addf %143, %146 : vector<22x1xf32>
    %148 = math.rsqrt %147 : vector<22x1xf32>
    %149 = vector.broadcast %148 : vector<22x1xf32> to vector<22x64xf32>
    %150 = arith.mulf %145, %149 : vector<22x64xf32>
    %151 = vector.broadcast %130 : vector<1x64xf32> to vector<22x64xf32>
    %152 = arith.mulf %150, %151 : vector<22x64xf32>
    %153 = vector.broadcast %132 : vector<1x64xf32> to vector<22x64xf32>
    %154 = arith.addf %152, %153 : vector<22x64xf32>
    %155 = arith.truncf %154 : vector<22x64xf32> to vector<22x64xbf16>
    %c0_58 = arith.constant 0 : index
    %c0_59 = arith.constant 0 : index
    %c0_60 = arith.constant 0 : index
    %156 = vector.load %arg12[%c0_58, %c0_59, %c0_60] : memref<2x64x256xbf16, #tpu.memory_space<vmem>>, vector<1x64x256xbf16>
    %157 = vector.shape_cast %156 : vector<1x64x256xbf16> to vector<64x256xbf16>
    %cst_61 = arith.constant dense<0.000000e+00> : vector<22x256xf32>
    %158 = tpu.matmul %155, %157, %cst_61 {dimension_numbers = #tpu.dot_dimension_numbers<[1], [0], [0], [1], [0, 0, 1, 1], [], []>} : vector<22x64xbf16>, vector<64x256xbf16>, vector<22x256xf32> -> vector<22x256xf32>
    %c0_62 = arith.constant 0 : index
    %c0_63 = arith.constant 0 : index
    %c0_64 = arith.constant 0 : index
    %159 = vector.load %arg13[%c0_62, %c0_63, %c0_64] : memref<2x1x256xf32, #tpu.memory_space<vmem>>, vector<1x1x256xf32>
    %160 = vector.shape_cast %159 : vector<1x1x256xf32> to vector<1x256xf32>
    %161 = vector.broadcast %160 : vector<1x256xf32> to vector<22x256xf32>
    %162 = arith.addf %158, %161 : vector<22x256xf32>
    %cst_65 = arith.constant 5.000000e-01 : f32
    %163 = vector.broadcast %cst_65 : f32 to vector<22x256xf32>
    %164 = arith.mulf %163, %162 : vector<22x256xf32>
    %cst_66 = arith.constant 0.707106769 : f32
    %165 = vector.broadcast %cst_66 : f32 to vector<22x256xf32>
    %166 = arith.mulf %162, %165 : vector<22x256xf32>
    %167 = math.erf %166 : vector<22x256xf32>
    %cst_67 = arith.constant 1.000000e+00 : f32
    %168 = vector.broadcast %cst_67 : f32 to vector<22x256xf32>
    %169 = arith.addf %168, %167 : vector<22x256xf32>
    %170 = arith.mulf %164, %169 : vector<22x256xf32>
    %171 = arith.truncf %170 : vector<22x256xf32> to vector<22x256xbf16>
    %c0_68 = arith.constant 0 : index
    %c0_69 = arith.constant 0 : index
    %c0_70 = arith.constant 0 : index
    %172 = vector.load %arg14[%c0_68, %c0_69, %c0_70] : memref<2x256x64xbf16, #tpu.memory_space<vmem>>, vector<1x256x64xbf16>
    %173 = vector.shape_cast %172 : vector<1x256x64xbf16> to vector<256x64xbf16>
    %cst_71 = arith.constant dense<0.000000e+00> : vector<22x64xf32>
    %174 = tpu.matmul %171, %173, %cst_71 {dimension_numbers = #tpu.dot_dimension_numbers<[1], [0], [0], [1], [0, 0, 1, 1], [], []>} : vector<22x256xbf16>, vector<256x64xbf16>, vector<22x64xf32> -> vector<22x64xf32>
    %175 = arith.addf %128, %174 : vector<22x64xf32>
    %c0_72 = arith.constant 0 : index
    %c0_73 = arith.constant 0 : index
    %c0_74 = arith.constant 0 : index
    %176 = vector.load %arg15[%c0_72, %c0_73, %c0_74] : memref<2x1x64xf32, #tpu.memory_space<vmem>>, vector<1x1x64xf32>
    %177 = vector.shape_cast %176 : vector<1x1x64xf32> to vector<1x64xf32>
    %178 = vector.broadcast %177 : vector<1x64xf32> to vector<22x64xf32>
    %179 = arith.addf %175, %178 : vector<22x64xf32>
    %c1 = arith.constant 1 : index
    %c0_75 = arith.constant 0 : index
    %c0_76 = arith.constant 0 : index
    %180 = vector.load %arg4[%c1, %c0_75, %c0_76] : memref<2x1x64xf32, #tpu.memory_space<vmem>>, vector<1x1x64xf32>
    %181 = vector.shape_cast %180 : vector<1x1x64xf32> to vector<1x64xf32>
    %c1_77 = arith.constant 1 : index
    %c0_78 = arith.constant 0 : index
    %c0_79 = arith.constant 0 : index
    %182 = vector.load %arg5[%c1_77, %c0_78, %c0_79] : memref<2x1x64xf32, #tpu.memory_space<vmem>>, vector<1x1x64xf32>
    %183 = vector.shape_cast %182 : vector<1x1x64xf32> to vector<1x64xf32>
    %cst_80 = arith.constant dense<0.000000e+00> : vector<22xf32>
    %184 = vector.multi_reduction <add>, %179, %cst_80 [1] : vector<22x64xf32> to vector<22xf32>
    %185 = vector.shape_cast %184 : vector<22xf32> to vector<22x1xf32>
    %cst_81 = arith.constant 6.400000e+01 : f32
    %186 = vector.broadcast %cst_81 : f32 to vector<22x1xf32>
    %187 = arith.divf %185, %186 : vector<22x1xf32>
    %188 = vector.broadcast %187 : vector<22x1xf32> to vector<22x64xf32>
    %189 = arith.subf %179, %188 : vector<22x64xf32>
    %190 = arith.mulf %189, %189 : vector<22x64xf32>
    %cst_82 = arith.constant dense<0.000000e+00> : vector<22xf32>
    %191 = vector.multi_reduction <add>, %190, %cst_82 [1] : vector<22x64xf32> to vector<22xf32>
    %192 = vector.shape_cast %191 : vector<22xf32> to vector<22x1xf32>
    %cst_83 = arith.constant 6.400000e+01 : f32
    %193 = vector.broadcast %cst_83 : f32 to vector<22x1xf32>
    %194 = arith.divf %192, %193 : vector<22x1xf32>
    %195 = vector.broadcast %187 : vector<22x1xf32> to vector<22x64xf32>
    %196 = arith.subf %179, %195 : vector<22x64xf32>
    %cst_84 = arith.constant 9.99999997E-7 : f32
    %197 = vector.broadcast %cst_84 : f32 to vector<22x1xf32>
    %198 = arith.addf %194, %197 : vector<22x1xf32>
    %199 = math.rsqrt %198 : vector<22x1xf32>
    %200 = vector.broadcast %199 : vector<22x1xf32> to vector<22x64xf32>
    %201 = arith.mulf %196, %200 : vector<22x64xf32>
    %202 = vector.broadcast %181 : vector<1x64xf32> to vector<22x64xf32>
    %203 = arith.mulf %201, %202 : vector<22x64xf32>
    %204 = vector.broadcast %183 : vector<1x64xf32> to vector<22x64xf32>
    %205 = arith.addf %203, %204 : vector<22x64xf32>
    %206 = arith.truncf %205 : vector<22x64xf32> to vector<22x64xbf16>
    %c1_85 = arith.constant 1 : index
    %c0_86 = arith.constant 0 : index
    %c0_87 = arith.constant 0 : index
    %207 = vector.load %arg6[%c1_85, %c0_86, %c0_87] : memref<2x64x192xbf16, #tpu.memory_space<vmem>>, vector<1x64x192xbf16>
    %208 = vector.shape_cast %207 : vector<1x64x192xbf16> to vector<64x192xbf16>
    %cst_88 = arith.constant dense<0.000000e+00> : vector<22x192xf32>
    %209 = tpu.matmul %206, %208, %cst_88 {dimension_numbers = #tpu.dot_dimension_numbers<[1], [0], [0], [1], [0, 0, 1, 1], [], []>} : vector<22x64xbf16>, vector<64x192xbf16>, vector<22x192xf32> -> vector<22x192xf32>
    %c1_89 = arith.constant 1 : index
    %c0_90 = arith.constant 0 : index
    %c0_91 = arith.constant 0 : index
    %210 = vector.load %arg7[%c1_89, %c0_90, %c0_91] : memref<2x1x192xf32, #tpu.memory_space<vmem>>, vector<1x1x192xf32>
    %211 = vector.shape_cast %210 : vector<1x1x192xf32> to vector<1x192xf32>
    %212 = vector.broadcast %211 : vector<1x192xf32> to vector<22x192xf32>
    %213 = arith.addf %209, %212 : vector<22x192xf32>
    %214 = vector.extract_strided_slice %213 {offsets = [0, 0], sizes = [22, 16], strides = [1, 1]} : vector<22x192xf32> to vector<22x16xf32>
    %215 = arith.truncf %214 : vector<22x16xf32> to vector<22x16xbf16>
    %216 = vector.extract_strided_slice %213 {offsets = [0, 64], sizes = [22, 16], strides = [1, 1]} : vector<22x192xf32> to vector<22x16xf32>
    %217 = arith.truncf %216 : vector<22x16xf32> to vector<22x16xbf16>
    %218 = vector.extract_strided_slice %213 {offsets = [0, 128], sizes = [22, 16], strides = [1, 1]} : vector<22x192xf32> to vector<22x16xf32>
    %219 = arith.truncf %218 : vector<22x16xf32> to vector<22x16xbf16>
    %cst_92 = arith.constant dense<0.000000e+00> : vector<22x22xf32>
    %220 = tpu.matmul %215, %217, %cst_92 {dimension_numbers = #tpu.dot_dimension_numbers<[1], [1], [0], [0], [0, 0, 1, 0], [], []>} : vector<22x16xbf16>, vector<22x16xbf16>, vector<22x22xf32> -> vector<22x22xf32>
    %cst_93 = arith.constant dense<0xFF800000> : vector<22xf32>
    %221 = vector.multi_reduction <maximumf>, %220, %cst_93 [1] : vector<22x22xf32> to vector<22xf32>
    %222 = vector.shape_cast %221 : vector<22xf32> to vector<22x1xf32>
    %223 = vector.broadcast %222 : vector<22x1xf32> to vector<22x22xf32>
    %224 = arith.subf %220, %223 : vector<22x22xf32>
    %225 = math.exp %224 : vector<22x22xf32>
    %cst_94 = arith.constant dense<0.000000e+00> : vector<22xf32>
    %226 = vector.multi_reduction <add>, %225, %cst_94 [1] : vector<22x22xf32> to vector<22xf32>
    %227 = vector.shape_cast %226 : vector<22xf32> to vector<22x1xf32>
    %228 = tpu.reciprocal %227 {approx = true} : vector<22x1xf32> -> vector<22x1xf32>
    %229 = vector.broadcast %228 : vector<22x1xf32> to vector<22x22xf32>
    %230 = arith.mulf %225, %229 : vector<22x22xf32>
    %231 = arith.truncf %230 : vector<22x22xf32> to vector<22x22xbf16>
    %cst_95 = arith.constant dense<0.000000e+00> : vector<22x16xf32>
    %232 = tpu.matmul %231, %219, %cst_95 {dimension_numbers = #tpu.dot_dimension_numbers<[1], [0], [0], [1], [0, 0, 1, 1], [], []>} : vector<22x22xbf16>, vector<22x16xbf16>, vector<22x16xf32> -> vector<22x16xf32>
    %233 = arith.truncf %232 : vector<22x16xf32> to vector<22x16xbf16>
    %234 = vector.extract_strided_slice %213 {offsets = [0, 16], sizes = [22, 16], strides = [1, 1]} : vector<22x192xf32> to vector<22x16xf32>
    %235 = arith.truncf %234 : vector<22x16xf32> to vector<22x16xbf16>
    %236 = vector.extract_strided_slice %213 {offsets = [0, 80], sizes = [22, 16], strides = [1, 1]} : vector<22x192xf32> to vector<22x16xf32>
    %237 = arith.truncf %236 : vector<22x16xf32> to vector<22x16xbf16>
    %238 = vector.extract_strided_slice %213 {offsets = [0, 144], sizes = [22, 16], strides = [1, 1]} : vector<22x192xf32> to vector<22x16xf32>
    %239 = arith.truncf %238 : vector<22x16xf32> to vector<22x16xbf16>
    %cst_96 = arith.constant dense<0.000000e+00> : vector<22x22xf32>
    %240 = tpu.matmul %235, %237, %cst_96 {dimension_numbers = #tpu.dot_dimension_numbers<[1], [1], [0], [0], [0, 0, 1, 0], [], []>} : vector<22x16xbf16>, vector<22x16xbf16>, vector<22x22xf32> -> vector<22x22xf32>
    %cst_97 = arith.constant dense<0xFF800000> : vector<22xf32>
    %241 = vector.multi_reduction <maximumf>, %240, %cst_97 [1] : vector<22x22xf32> to vector<22xf32>
    %242 = vector.shape_cast %241 : vector<22xf32> to vector<22x1xf32>
    %243 = vector.broadcast %242 : vector<22x1xf32> to vector<22x22xf32>
    %244 = arith.subf %240, %243 : vector<22x22xf32>
    %245 = math.exp %244 : vector<22x22xf32>
    %cst_98 = arith.constant dense<0.000000e+00> : vector<22xf32>
    %246 = vector.multi_reduction <add>, %245, %cst_98 [1] : vector<22x22xf32> to vector<22xf32>
    %247 = vector.shape_cast %246 : vector<22xf32> to vector<22x1xf32>
    %248 = tpu.reciprocal %247 {approx = true} : vector<22x1xf32> -> vector<22x1xf32>
    %249 = vector.broadcast %248 : vector<22x1xf32> to vector<22x22xf32>
    %250 = arith.mulf %245, %249 : vector<22x22xf32>
    %251 = arith.truncf %250 : vector<22x22xf32> to vector<22x22xbf16>
    %cst_99 = arith.constant dense<0.000000e+00> : vector<22x16xf32>
    %252 = tpu.matmul %251, %239, %cst_99 {dimension_numbers = #tpu.dot_dimension_numbers<[1], [0], [0], [1], [0, 0, 1, 1], [], []>} : vector<22x22xbf16>, vector<22x16xbf16>, vector<22x16xf32> -> vector<22x16xf32>
    %253 = arith.truncf %252 : vector<22x16xf32> to vector<22x16xbf16>
    %254 = vector.extract_strided_slice %213 {offsets = [0, 32], sizes = [22, 16], strides = [1, 1]} : vector<22x192xf32> to vector<22x16xf32>
    %255 = arith.truncf %254 : vector<22x16xf32> to vector<22x16xbf16>
    %256 = vector.extract_strided_slice %213 {offsets = [0, 96], sizes = [22, 16], strides = [1, 1]} : vector<22x192xf32> to vector<22x16xf32>
    %257 = arith.truncf %256 : vector<22x16xf32> to vector<22x16xbf16>
    %258 = vector.extract_strided_slice %213 {offsets = [0, 160], sizes = [22, 16], strides = [1, 1]} : vector<22x192xf32> to vector<22x16xf32>
    %259 = arith.truncf %258 : vector<22x16xf32> to vector<22x16xbf16>
    %cst_100 = arith.constant dense<0.000000e+00> : vector<22x22xf32>
    %260 = tpu.matmul %255, %257, %cst_100 {dimension_numbers = #tpu.dot_dimension_numbers<[1], [1], [0], [0], [0, 0, 1, 0], [], []>} : vector<22x16xbf16>, vector<22x16xbf16>, vector<22x22xf32> -> vector<22x22xf32>
    %cst_101 = arith.constant dense<0xFF800000> : vector<22xf32>
    %261 = vector.multi_reduction <maximumf>, %260, %cst_101 [1] : vector<22x22xf32> to vector<22xf32>
    %262 = vector.shape_cast %261 : vector<22xf32> to vector<22x1xf32>
    %263 = vector.broadcast %262 : vector<22x1xf32> to vector<22x22xf32>
    %264 = arith.subf %260, %263 : vector<22x22xf32>
    %265 = math.exp %264 : vector<22x22xf32>
    %cst_102 = arith.constant dense<0.000000e+00> : vector<22xf32>
    %266 = vector.multi_reduction <add>, %265, %cst_102 [1] : vector<22x22xf32> to vector<22xf32>
    %267 = vector.shape_cast %266 : vector<22xf32> to vector<22x1xf32>
    %268 = tpu.reciprocal %267 {approx = true} : vector<22x1xf32> -> vector<22x1xf32>
    %269 = vector.broadcast %268 : vector<22x1xf32> to vector<22x22xf32>
    %270 = arith.mulf %265, %269 : vector<22x22xf32>
    %271 = arith.truncf %270 : vector<22x22xf32> to vector<22x22xbf16>
    %cst_103 = arith.constant dense<0.000000e+00> : vector<22x16xf32>
    %272 = tpu.matmul %271, %259, %cst_103 {dimension_numbers = #tpu.dot_dimension_numbers<[1], [0], [0], [1], [0, 0, 1, 1], [], []>} : vector<22x22xbf16>, vector<22x16xbf16>, vector<22x16xf32> -> vector<22x16xf32>
    %273 = arith.truncf %272 : vector<22x16xf32> to vector<22x16xbf16>
    %274 = vector.extract_strided_slice %213 {offsets = [0, 48], sizes = [22, 16], strides = [1, 1]} : vector<22x192xf32> to vector<22x16xf32>
    %275 = arith.truncf %274 : vector<22x16xf32> to vector<22x16xbf16>
    %276 = vector.extract_strided_slice %213 {offsets = [0, 112], sizes = [22, 16], strides = [1, 1]} : vector<22x192xf32> to vector<22x16xf32>
    %277 = arith.truncf %276 : vector<22x16xf32> to vector<22x16xbf16>
    %278 = vector.extract_strided_slice %213 {offsets = [0, 176], sizes = [22, 16], strides = [1, 1]} : vector<22x192xf32> to vector<22x16xf32>
    %279 = arith.truncf %278 : vector<22x16xf32> to vector<22x16xbf16>
    %cst_104 = arith.constant dense<0.000000e+00> : vector<22x22xf32>
    %280 = tpu.matmul %275, %277, %cst_104 {dimension_numbers = #tpu.dot_dimension_numbers<[1], [1], [0], [0], [0, 0, 1, 0], [], []>} : vector<22x16xbf16>, vector<22x16xbf16>, vector<22x22xf32> -> vector<22x22xf32>
    %cst_105 = arith.constant dense<0xFF800000> : vector<22xf32>
    %281 = vector.multi_reduction <maximumf>, %280, %cst_105 [1] : vector<22x22xf32> to vector<22xf32>
    %282 = vector.shape_cast %281 : vector<22xf32> to vector<22x1xf32>
    %283 = vector.broadcast %282 : vector<22x1xf32> to vector<22x22xf32>
    %284 = arith.subf %280, %283 : vector<22x22xf32>
    %285 = math.exp %284 : vector<22x22xf32>
    %cst_106 = arith.constant dense<0.000000e+00> : vector<22xf32>
    %286 = vector.multi_reduction <add>, %285, %cst_106 [1] : vector<22x22xf32> to vector<22xf32>
    %287 = vector.shape_cast %286 : vector<22xf32> to vector<22x1xf32>
    %288 = tpu.reciprocal %287 {approx = true} : vector<22x1xf32> -> vector<22x1xf32>
    %289 = vector.broadcast %288 : vector<22x1xf32> to vector<22x22xf32>
    %290 = arith.mulf %285, %289 : vector<22x22xf32>
    %291 = arith.truncf %290 : vector<22x22xf32> to vector<22x22xbf16>
    %cst_107 = arith.constant dense<0.000000e+00> : vector<22x16xf32>
    %292 = tpu.matmul %291, %279, %cst_107 {dimension_numbers = #tpu.dot_dimension_numbers<[1], [0], [0], [1], [0, 0, 1, 1], [], []>} : vector<22x22xbf16>, vector<22x16xbf16>, vector<22x16xf32> -> vector<22x16xf32>
    %293 = arith.truncf %292 : vector<22x16xf32> to vector<22x16xbf16>
    %294 = tpu.concatenate %233, %253, %273, %293 in 1 : vector<22x16xbf16>, vector<22x16xbf16>, vector<22x16xbf16>, vector<22x16xbf16> -> vector<22x64xbf16>
    %c1_108 = arith.constant 1 : index
    %c0_109 = arith.constant 0 : index
    %c0_110 = arith.constant 0 : index
    %295 = vector.load %arg8[%c1_108, %c0_109, %c0_110] : memref<2x64x64xbf16, #tpu.memory_space<vmem>>, vector<1x64x64xbf16>
    %296 = vector.shape_cast %295 : vector<1x64x64xbf16> to vector<64x64xbf16>
    %cst_111 = arith.constant dense<0.000000e+00> : vector<22x64xf32>
    %297 = tpu.matmul %294, %296, %cst_111 {dimension_numbers = #tpu.dot_dimension_numbers<[1], [0], [0], [1], [0, 0, 1, 1], [], []>} : vector<22x64xbf16>, vector<64x64xbf16>, vector<22x64xf32> -> vector<22x64xf32>
    %298 = arith.addf %179, %297 : vector<22x64xf32>
    %c1_112 = arith.constant 1 : index
    %c0_113 = arith.constant 0 : index
    %c0_114 = arith.constant 0 : index
    %299 = vector.load %arg9[%c1_112, %c0_113, %c0_114] : memref<2x1x64xf32, #tpu.memory_space<vmem>>, vector<1x1x64xf32>
    %300 = vector.shape_cast %299 : vector<1x1x64xf32> to vector<1x64xf32>
    %301 = vector.broadcast %300 : vector<1x64xf32> to vector<22x64xf32>
    %302 = arith.addf %298, %301 : vector<22x64xf32>
    %c1_115 = arith.constant 1 : index
    %c0_116 = arith.constant 0 : index
    %c0_117 = arith.constant 0 : index
    %303 = vector.load %arg10[%c1_115, %c0_116, %c0_117] : memref<2x1x64xf32, #tpu.memory_space<vmem>>, vector<1x1x64xf32>
    %304 = vector.shape_cast %303 : vector<1x1x64xf32> to vector<1x64xf32>
    %c1_118 = arith.constant 1 : index
    %c0_119 = arith.constant 0 : index
    %c0_120 = arith.constant 0 : index
    %305 = vector.load %arg11[%c1_118, %c0_119, %c0_120] : memref<2x1x64xf32, #tpu.memory_space<vmem>>, vector<1x1x64xf32>
    %306 = vector.shape_cast %305 : vector<1x1x64xf32> to vector<1x64xf32>
    %cst_121 = arith.constant dense<0.000000e+00> : vector<22xf32>
    %307 = vector.multi_reduction <add>, %302, %cst_121 [1] : vector<22x64xf32> to vector<22xf32>
    %308 = vector.shape_cast %307 : vector<22xf32> to vector<22x1xf32>
    %cst_122 = arith.constant 6.400000e+01 : f32
    %309 = vector.broadcast %cst_122 : f32 to vector<22x1xf32>
    %310 = arith.divf %308, %309 : vector<22x1xf32>
    %311 = vector.broadcast %310 : vector<22x1xf32> to vector<22x64xf32>
    %312 = arith.subf %302, %311 : vector<22x64xf32>
    %313 = arith.mulf %312, %312 : vector<22x64xf32>
    %cst_123 = arith.constant dense<0.000000e+00> : vector<22xf32>
    %314 = vector.multi_reduction <add>, %313, %cst_123 [1] : vector<22x64xf32> to vector<22xf32>
    %315 = vector.shape_cast %314 : vector<22xf32> to vector<22x1xf32>
    %cst_124 = arith.constant 6.400000e+01 : f32
    %316 = vector.broadcast %cst_124 : f32 to vector<22x1xf32>
    %317 = arith.divf %315, %316 : vector<22x1xf32>
    %318 = vector.broadcast %310 : vector<22x1xf32> to vector<22x64xf32>
    %319 = arith.subf %302, %318 : vector<22x64xf32>
    %cst_125 = arith.constant 9.99999997E-7 : f32
    %320 = vector.broadcast %cst_125 : f32 to vector<22x1xf32>
    %321 = arith.addf %317, %320 : vector<22x1xf32>
    %322 = math.rsqrt %321 : vector<22x1xf32>
    %323 = vector.broadcast %322 : vector<22x1xf32> to vector<22x64xf32>
    %324 = arith.mulf %319, %323 : vector<22x64xf32>
    %325 = vector.broadcast %304 : vector<1x64xf32> to vector<22x64xf32>
    %326 = arith.mulf %324, %325 : vector<22x64xf32>
    %327 = vector.broadcast %306 : vector<1x64xf32> to vector<22x64xf32>
    %328 = arith.addf %326, %327 : vector<22x64xf32>
    %329 = arith.truncf %328 : vector<22x64xf32> to vector<22x64xbf16>
    %c1_126 = arith.constant 1 : index
    %c0_127 = arith.constant 0 : index
    %c0_128 = arith.constant 0 : index
    %330 = vector.load %arg12[%c1_126, %c0_127, %c0_128] : memref<2x64x256xbf16, #tpu.memory_space<vmem>>, vector<1x64x256xbf16>
    %331 = vector.shape_cast %330 : vector<1x64x256xbf16> to vector<64x256xbf16>
    %cst_129 = arith.constant dense<0.000000e+00> : vector<22x256xf32>
    %332 = tpu.matmul %329, %331, %cst_129 {dimension_numbers = #tpu.dot_dimension_numbers<[1], [0], [0], [1], [0, 0, 1, 1], [], []>} : vector<22x64xbf16>, vector<64x256xbf16>, vector<22x256xf32> -> vector<22x256xf32>
    %c1_130 = arith.constant 1 : index
    %c0_131 = arith.constant 0 : index
    %c0_132 = arith.constant 0 : index
    %333 = vector.load %arg13[%c1_130, %c0_131, %c0_132] : memref<2x1x256xf32, #tpu.memory_space<vmem>>, vector<1x1x256xf32>
    %334 = vector.shape_cast %333 : vector<1x1x256xf32> to vector<1x256xf32>
    %335 = vector.broadcast %334 : vector<1x256xf32> to vector<22x256xf32>
    %336 = arith.addf %332, %335 : vector<22x256xf32>
    %cst_133 = arith.constant 5.000000e-01 : f32
    %337 = vector.broadcast %cst_133 : f32 to vector<22x256xf32>
    %338 = arith.mulf %337, %336 : vector<22x256xf32>
    %cst_134 = arith.constant 0.707106769 : f32
    %339 = vector.broadcast %cst_134 : f32 to vector<22x256xf32>
    %340 = arith.mulf %336, %339 : vector<22x256xf32>
    %341 = math.erf %340 : vector<22x256xf32>
    %cst_135 = arith.constant 1.000000e+00 : f32
    %342 = vector.broadcast %cst_135 : f32 to vector<22x256xf32>
    %343 = arith.addf %342, %341 : vector<22x256xf32>
    %344 = arith.mulf %338, %343 : vector<22x256xf32>
    %345 = arith.truncf %344 : vector<22x256xf32> to vector<22x256xbf16>
    %c1_136 = arith.constant 1 : index
    %c0_137 = arith.constant 0 : index
    %c0_138 = arith.constant 0 : index
    %346 = vector.load %arg14[%c1_136, %c0_137, %c0_138] : memref<2x256x64xbf16, #tpu.memory_space<vmem>>, vector<1x256x64xbf16>
    %347 = vector.shape_cast %346 : vector<1x256x64xbf16> to vector<256x64xbf16>
    %cst_139 = arith.constant dense<0.000000e+00> : vector<22x64xf32>
    %348 = tpu.matmul %345, %347, %cst_139 {dimension_numbers = #tpu.dot_dimension_numbers<[1], [0], [0], [1], [0, 0, 1, 1], [], []>} : vector<22x256xbf16>, vector<256x64xbf16>, vector<22x64xf32> -> vector<22x64xf32>
    %349 = arith.addf %302, %348 : vector<22x64xf32>
    %c1_140 = arith.constant 1 : index
    %c0_141 = arith.constant 0 : index
    %c0_142 = arith.constant 0 : index
    %350 = vector.load %arg15[%c1_140, %c0_141, %c0_142] : memref<2x1x64xf32, #tpu.memory_space<vmem>>, vector<1x1x64xf32>
    %351 = vector.shape_cast %350 : vector<1x1x64xf32> to vector<1x64xf32>
    %352 = vector.broadcast %351 : vector<1x64xf32> to vector<22x64xf32>
    %353 = arith.addf %349, %352 : vector<22x64xf32>
    %354 = vector.extract_strided_slice %353 {offsets = [0, 0], sizes = [2, 64], strides = [1, 1]} : vector<22x64xf32> to vector<2x64xf32>
    %c0_143 = arith.constant 0 : index
    %c0_144 = arith.constant 0 : index
    %355 = vector.load %arg16[%c0_143, %c0_144] : memref<1x64xf32, #tpu.memory_space<vmem>>, vector<1x64xf32>
    %c0_145 = arith.constant 0 : index
    %c0_146 = arith.constant 0 : index
    %356 = vector.load %arg17[%c0_145, %c0_146] : memref<1x64xf32, #tpu.memory_space<vmem>>, vector<1x64xf32>
    %cst_147 = arith.constant dense<0.000000e+00> : vector<2xf32>
    %357 = vector.multi_reduction <add>, %354, %cst_147 [1] : vector<2x64xf32> to vector<2xf32>
    %358 = vector.shape_cast %357 : vector<2xf32> to vector<2x1xf32>
    %cst_148 = arith.constant 6.400000e+01 : f32
    %359 = vector.broadcast %cst_148 : f32 to vector<2x1xf32>
    %360 = arith.divf %358, %359 : vector<2x1xf32>
    %361 = vector.broadcast %360 : vector<2x1xf32> to vector<2x64xf32>
    %362 = arith.subf %354, %361 : vector<2x64xf32>
    %363 = arith.mulf %362, %362 : vector<2x64xf32>
    %cst_149 = arith.constant dense<0.000000e+00> : vector<2xf32>
    %364 = vector.multi_reduction <add>, %363, %cst_149 [1] : vector<2x64xf32> to vector<2xf32>
    %365 = vector.shape_cast %364 : vector<2xf32> to vector<2x1xf32>
    %cst_150 = arith.constant 6.400000e+01 : f32
    %366 = vector.broadcast %cst_150 : f32 to vector<2x1xf32>
    %367 = arith.divf %365, %366 : vector<2x1xf32>
    %368 = vector.broadcast %360 : vector<2x1xf32> to vector<2x64xf32>
    %369 = arith.subf %354, %368 : vector<2x64xf32>
    %cst_151 = arith.constant 9.99999997E-7 : f32
    %370 = vector.broadcast %cst_151 : f32 to vector<2x1xf32>
    %371 = arith.addf %367, %370 : vector<2x1xf32>
    %372 = math.rsqrt %371 : vector<2x1xf32>
    %373 = vector.broadcast %372 : vector<2x1xf32> to vector<2x64xf32>
    %374 = arith.mulf %369, %373 : vector<2x64xf32>
    %375 = vector.broadcast %355 : vector<1x64xf32> to vector<2x64xf32>
    %376 = arith.mulf %374, %375 : vector<2x64xf32>
    %377 = vector.broadcast %356 : vector<1x64xf32> to vector<2x64xf32>
    %378 = arith.addf %376, %377 : vector<2x64xf32>
    %cst_152 = arith.constant dense<0.000000e+00> : vector<64xf32>
    %379 = vector.multi_reduction <add>, %378, %cst_152 [0] : vector<2x64xf32> to vector<64xf32>
    %380 = vector.shape_cast %379 : vector<64xf32> to vector<1x64xf32>
    %cst_153 = arith.constant 2.000000e+00 : f32
    %381 = vector.broadcast %cst_153 : f32 to vector<1x64xf32>
    %382 = arith.divf %380, %381 : vector<1x64xf32>
    %c0_154 = arith.constant 0 : index
    %c0_155 = arith.constant 0 : index
    %c0_156 = arith.constant 0 : index
    %383 = vector.load %arg18[%c0_154, %c0_155, %c0_156] : memref<1x1x64xf32, #tpu.memory_space<vmem>>, vector<1x1x64xf32>
    %384 = vector.shape_cast %383 : vector<1x1x64xf32> to vector<1x64xf32>
    %385 = vector.shape_cast %382 : vector<1x64xf32> to vector<1x1x64xf32>
    tpu.vector_store %arg18[%c0_154, %c0_155, %c0_156], %385 {strides = array<i32>} : memref<1x1x64xf32, #tpu.memory_space<vmem>>, vector<1x1x64xf32>,
    return
  }
  func.func @transform_0(%arg0: i32) -> (i32, i32, i32) {
    %c0_i32 = arith.constant 0 : i32
    %c0_i32_0 = arith.constant 0 : i32
    %c0_i32_1 = arith.constant 0 : i32
    return %arg0, %c0_i32, %c0_i32_0 : i32, i32, i32
  }
  func.func @transform_1(%arg0: i32) -> (i32, i32) {
    %c0_i32 = arith.constant 0 : i32
    %c0_i32_0 = arith.constant 0 : i32
    %c0_i32_1 = arith.constant 0 : i32
    return %c0_i32, %c0_i32_0 : i32, i32
  }
  func.func @transform_2(%arg0: i32) -> (i32, i32) {
    %c0_i32 = arith.constant 0 : i32
    %c0_i32_0 = arith.constant 0 : i32
    %c0_i32_1 = arith.constant 0 : i32
    return %c0_i32, %c0_i32_0 : i32, i32
  }
  func.func @transform_3(%arg0: i32) -> (i32, i32, i32) {
    %c0_i32 = arith.constant 0 : i32
    %c0_i32_0 = arith.constant 0 : i32
    %c0_i32_1 = arith.constant 0 : i32
    %c0_i32_2 = arith.constant 0 : i32
    return %c0_i32, %c0_i32_0, %c0_i32_1 : i32, i32, i32
  }
  func.func @transform_4(%arg0: i32) -> (i32, i32, i32) {
    %c0_i32 = arith.constant 0 : i32
    %c0_i32_0 = arith.constant 0 : i32
    %c0_i32_1 = arith.constant 0 : i32
    %c0_i32_2 = arith.constant 0 : i32
    return %c0_i32, %c0_i32_0, %c0_i32_1 : i32, i32, i32
  }
  func.func @transform_5(%arg0: i32) -> (i32, i32, i32) {
    %c0_i32 = arith.constant 0 : i32
    %c0_i32_0 = arith.constant 0 : i32
    %c0_i32_1 = arith.constant 0 : i32
    %c0_i32_2 = arith.constant 0 : i32
    return %c0_i32, %c0_i32_0, %c0_i32_1 : i32, i32, i32
  }
  func.func @transform_6(%arg0: i32) -> (i32, i32, i32) {
    %c0_i32 = arith.constant 0 : i32
    %c0_i32_0 = arith.constant 0 : i32
    %c0_i32_1 = arith.constant 0 : i32
    %c0_i32_2 = arith.constant 0 : i32
    return %c0_i32, %c0_i32_0, %c0_i32_1 : i32, i32, i32
  }
  func.func @transform_7(%arg0: i32) -> (i32, i32, i32) {
    %c0_i32 = arith.constant 0 : i32
    %c0_i32_0 = arith.constant 0 : i32
    %c0_i32_1 = arith.constant 0 : i32
    %c0_i32_2 = arith.constant 0 : i32
    return %c0_i32, %c0_i32_0, %c0_i32_1 : i32, i32, i32
  }
  func.func @transform_8(%arg0: i32) -> (i32, i32, i32) {
    %c0_i32 = arith.constant 0 : i32
    %c0_i32_0 = arith.constant 0 : i32
    %c0_i32_1 = arith.constant 0 : i32
    %c0_i32_2 = arith.constant 0 : i32
    return %c0_i32, %c0_i32_0, %c0_i32_1 : i32, i32, i32
  }
  func.func @transform_9(%arg0: i32) -> (i32, i32, i32) {
    %c0_i32 = arith.constant 0 : i32
    %c0_i32_0 = arith.constant 0 : i32
    %c0_i32_1 = arith.constant 0 : i32
    %c0_i32_2 = arith.constant 0 : i32
    return %c0_i32, %c0_i32_0, %c0_i32_1 : i32, i32, i32
  }
  func.func @transform_10(%arg0: i32) -> (i32, i32, i32) {
    %c0_i32 = arith.constant 0 : i32
    %c0_i32_0 = arith.constant 0 : i32
    %c0_i32_1 = arith.constant 0 : i32
    %c0_i32_2 = arith.constant 0 : i32
    return %c0_i32, %c0_i32_0, %c0_i32_1 : i32, i32, i32
  }
  func.func @transform_11(%arg0: i32) -> (i32, i32, i32) {
    %c0_i32 = arith.constant 0 : i32
    %c0_i32_0 = arith.constant 0 : i32
    %c0_i32_1 = arith.constant 0 : i32
    %c0_i32_2 = arith.constant 0 : i32
    return %c0_i32, %c0_i32_0, %c0_i32_1 : i32, i32, i32
  }
  func.func @transform_12(%arg0: i32) -> (i32, i32, i32) {
    %c0_i32 = arith.constant 0 : i32
    %c0_i32_0 = arith.constant 0 : i32
    %c0_i32_1 = arith.constant 0 : i32
    %c0_i32_2 = arith.constant 0 : i32
    return %c0_i32, %c0_i32_0, %c0_i32_1 : i32, i32, i32
  }
  func.func @transform_13(%arg0: i32) -> (i32, i32, i32) {
    %c0_i32 = arith.constant 0 : i32
    %c0_i32_0 = arith.constant 0 : i32
    %c0_i32_1 = arith.constant 0 : i32
    %c0_i32_2 = arith.constant 0 : i32
    return %c0_i32, %c0_i32_0, %c0_i32_1 : i32, i32, i32
  }
  func.func @transform_14(%arg0: i32) -> (i32, i32, i32) {
    %c0_i32 = arith.constant 0 : i32
    %c0_i32_0 = arith.constant 0 : i32
    %c0_i32_1 = arith.constant 0 : i32
    %c0_i32_2 = arith.constant 0 : i32
    return %c0_i32, %c0_i32_0, %c0_i32_1 : i32, i32, i32
  }
  func.func @transform_15(%arg0: i32) -> (i32, i32) {
    %c0_i32 = arith.constant 0 : i32
    %c0_i32_0 = arith.constant 0 : i32
    %c0_i32_1 = arith.constant 0 : i32
    return %c0_i32, %c0_i32_0 : i32, i32
  }
  func.func @transform_16(%arg0: i32) -> (i32, i32) {
    %c0_i32 = arith.constant 0 : i32
    %c0_i32_0 = arith.constant 0 : i32
    %c0_i32_1 = arith.constant 0 : i32
    return %c0_i32, %c0_i32_0 : i32, i32
  }
  func.func @transform_17(%arg0: i32) -> (i32, i32, i32) {
    %c0_i32 = arith.constant 0 : i32
    %c0_i32_0 = arith.constant 0 : i32
    %c0_i32_1 = arith.constant 0 : i32
    return %arg0, %c0_i32, %c0_i32_0 : i32, i32, i32
  }
}

</mosaic_0001>

<bundles_post_ra>
// kernel: ast_forward.1
= control target key start
LH: loop header
LB: loop body
LE: loop exit
PB: predicated region body
PF: predicated region fallthrough
CT: control target
= control target key end

     0   :  { %s5506_s0 = inlined_call_operand.vmem [shape: bf16[2,22,256], index: 0, kind: input, shape index: {}]   ;;  %s5507_s1 = inlined_call_operand.vmem [shape: bf16[256,64], index: 1, kind: input, shape index: {}]   ;;  %s5508_s2 = inlined_call_operand.vmem [shape: f32[22,64], index: 2, kind: input, shape index: {}]   ;;  %s5509_s3 = inlined_call_operand.vmem [shape: f32[2,1,64], index: 3, kind: input, shape index: {}]   ;;  %s5510_s4 = inlined_call_operand.vmem [shape: f32[2,1,64], index: 4, kind: input, shape index: {}]   ;;  %s5511_s5 = inlined_call_operand.vmem [shape: bf16[2,64,192], index: 5, kind: input, shape index: {}]   ;;  %s5512_s6 = inlined_call_operand.vmem [shape: f32[2,1,192], index: 6, kind: input, shape index: {}]   ;;  %s5513_s7 = inlined_call_operand.vmem [shape: bf16[2,64,64], index: 7, kind: input, shape index: {}]   ;;  %s5514_s8 = inlined_call_operand.vmem [shape: f32[2,1,64], index: 8, kind: input, shape index: {}]   ;;  %s5515_s9 = inlined_call_operand.vmem [shape: f32[2,1,64], index: 9, kind: input, shape index: {}]   ;;  %s5516_s10 = inlined_call_operand.vmem [shape: f32[2,1,64], index: 10, kind: input, shape index: {}]   ;;  %s5517_s11 = inlined_call_operand.vmem [shape: bf16[2,64,256], index: 11, kind: input, shape index: {}]   ;;  %s5518_s12 = inlined_call_operand.vmem [shape: f32[2,1,256], index: 12, kind: input, shape index: {}]   ;;  %s5519_s13 = inlined_call_operand.vmem [shape: bf16[2,256,64], index: 13, kind: input, shape index: {}]   ;;  %s5520_s14 = inlined_call_operand.vmem [shape: f32[2,1,64], index: 14, kind: input, shape index: {}]   ;;  %s5521_s15 = inlined_call_operand.vmem [shape: f32[1,64], index: 15, kind: input, shape index: {}]   ;;  %s5522_s16 = inlined_call_operand.vmem [shape: f32[1,64], index: 16, kind: input, shape index: {}]   ;;  %s5523_s17 = inlined_call_operand.hbm [shape: f32[2,1,64], index: 17, kind: output, shape index: {}]  }
   0x1   :  { %5540 = sst [smem:[#allocation12_spill]] %s5506_s0 }
   0x2   :  { %5541 = sst [smem:[#allocation13_spill]] %s5507_s1 }
   0x3   :  { %5542 = sst [smem:[#allocation14_spill]] %s5522_s16 }
   0x4   :  { %5543 = sst [smem:[#allocation15_spill]] %s5523_s17 }
   0x5   :  { %22 = vsyncpa [#allocation3], 0 }
   0x6   :  { %24 = vsyncpa [#allocation3 + $0x1], 0  ;;  %s4644_s24 = smov 0   ;;  %s4646_s25 = smov 0  }
   0x7   :  { %s4648_s26 = smov 0   ;;  %s4650_s27 = smov 0  }
   0x8 LB: > { %5544 = sst [smem:[#allocation5_spill]] %s4531_s24  ;;  %s4665_s28 = sadd.s32 4294967295, %s4543_s27   ;;  %s4543_s27 = sphi %s4650_s27, %s5564_s27   ;;  %s4539_s26 = sphi %s4648_s26, %s5566_s26   ;;  %s4535_s25 = sphi %s4646_s25, %s5568_s25   ;;  %s4531_s24 = sphi %s4644_s24, %s5567_s24  }
   0x9   : > { %5545 = sst [smem:[#allocation6_spill]] %s4539_s26  ;;  %s3620_s29 = sadd.s32 4294967294, %s4543_s27  }
   0xa   : > { %5546 = sst [smem:[#allocation7_spill]] %s4543_s27  ;;  %s4669_s0 = sadd.s32 1, %s4543_s27  }
   0xb   : > { %5547 = sst [smem:[#allocation8_spill]] %s4669_s0  ;;  %s399_s30 = sadd.s32 1, %s4539_s26 }
   0xc   : > { %s396_s18 = ssub.s32 %s4543_s27, %s4669_s0  ;;  %p409_p0 = scmp.ne.s32.totalorder %s4539_s26, %s4535_s25 }
   0xd   : > { %p397_p1 = scmp.eq.s32.totalorder %s396_s18, 0  ;;  %p410_p2 = scmp.eq.s32.totalorder %s4665_s28, 1 }
   0xe   : > { %p415_p3 = scmp.ne.s32.totalorder %s4535_s25, %s4531_s24  ;;  %p416_p4 = scmp.eq.s32.totalorder %s3620_s29, 1 }
   0xf   : > { %s4680_s19 = scalar_select %p397_p1, %s4539_s26, %s399_s30  }
  0x10   : > { %p4682_p5 = por %p410_p2, %p409_p0  ;;  %p4686_p6 = por %p416_p4, %p415_p3 }
  0x11   : > { %5548 = sst [smem:[#allocation9_spill]] %s4680_s19  ;;  %p3623_p7 = scmp.ge.s32.totalorder %s4543_s27, 1 }
  0x12   : > { %s5549_s1 = scalar_select %p4682_p5, 1, 0 }
  0x13   : > { %s5551_s20 = scalar_select %p4686_p6, 1, 0 }
  0x14   : > { %5550 = sst [smem:[#allocation10_spill]] %s5549_s1  ;;  %p490_p8 = scmp.lt.s32.totalorder %s4543_s27, 3 }
  0x15   : > { %5552 = sst [smem:[#allocation11_spill]] %s5551_s20 }
  0x16   : > { %p491_p9 = pnand %p3623_p7, %p490_p8 }
  0x17   : > { %s5553_s23 = sld [smem:[#allocation13_spill]] (!%p491_p9)  ;;  %p541_p10 = scmp.lt.s32.totalorder (!%p491_p9), %s4665_s28, 1  ;;  %v582_v22 = vld [vmem:[%s5508_s2] sm:$0xff] (!%p491_p9)  ;;  %v583_v26 = vld [vmem:[%s5508_s2 + $0x8] sm:$0xff] (!%p491_p9)  ;;  %vm748_vm0 = vcmask (!%p491_p9), 523264   ;;  %vm755_vm1 = vcmask (!%p491_p9), 521216  }
  0x18   : > { %494 = sbr.rel (%p491_p9) target bundleno = 7483 (0x1d3b), region = 88  ;;  %s5554_s29 = sld [smem:[#allocation12_spill]] (!%p491_p9)  ;;  %v584_v33 = vld [vmem:[%s5508_s2 + $0x10] sm:$0x3f] (!%p491_p9)  ;;  %v4247_v56 = vld [vmem:[%s5511_s5 + $0x4] ss:$8 sps:$4 sm:$0xff] (!%p491_p9)  }
  0x19   : > { %v4249_v57 = vld [vmem:[%s5511_s5] ss:$8 sps:$4 sm:$0xff] (!%p491_p9)   ;;  %876 = vmatprep.subr.bf16.mxu1 (!%p491_p9), %v4247_v56  ;;  %v4250_v58 = vld [vmem:[%s5511_s5 + $0x14] ss:$8 sps:$4 sm:$0xff] (!%p491_p9)   ;;  %v4252_v59 = vld [vmem:[%s5511_s5 + $0x10] ss:$8 sps:$4 sm:$0xff] (!%p491_p9)  }
  0x1a   : > { %877 = vmatpush1.bf16.msra.mxu1 (!%p491_p9), %v4249_v57  ;;  %v4253_v60 = vld [vmem:[%s5511_s5 + $0x24] ss:$8 sps:$4 sm:$0xff] (!%p491_p9)   ;;  %v4545_v61 = vmov (!%p491_p9), 0   ;;  %v4255_v62 = vld [vmem:[%s5511_s5 + $0x20] ss:$8 sps:$4 sm:$0xff] (!%p491_p9)   ;;  %vm937_vm2 = vcmask (!%p491_p9), 130048  }
  0x1b   : > { %878 = vmatprep.subr.bf16.mxu1 (!%p491_p9), %v4250_v58  ;;  %908 = vmatprep.mubr.bf16.mxu1 (!%p491_p9), %v4545_v61  ;;  %v4256_v63 = vld [vmem:[%s5511_s5 + $0x34] ss:$8 sps:$4 sm:$0xff] (!%p491_p9)   ;;  %vm1041_vm3 = vcmask (!%p491_p9), 1042432   ;;  %vm998_vm4 = vcmask (!%p491_p9), 179200   ;;  %vm1005_vm5 = vcmask (!%p491_p9), 177152   ;;  %s4548_s19 = smov (!%p491_p9), 112  }
  0x1c   : > { %s5538_s18 = smov (!%p491_p9), 32   ;;  %s5536_s26 = smov (!%p491_p9), 16   ;;  %vm1622_vm6 = vcmask (!%p491_p9), 261120   ;;  %vm1627_vm7 = vcmask (!%p491_p9), 392192   ;;  %vm3513_vm8 = vcmask (!%p491_p9), 517120   ;;  %vm3550_vm9 = vcmask (!%p491_p9), 516096  }
  0x1d   : > { %v4226_v0 = vld [vmem:[%s5553_s23 + $0x40] sm:$0xff] (!%p491_p9)   ;;  %v4228_v2 = vld [vmem:[%s5553_s23 + $0x48] sm:$0xff] (!%p491_p9)   ;;  %v4230_v4 = vld [vmem:[%s5553_s23 + $0x50] sm:$0xff] (!%p491_p9)   ;;  %s5534_s0 = smov (!%p491_p9), 80   ;;  %s3839_s16 = sshll.u32 (!%p491_p9), %s4665_s28, 4 }
  0x1e   : > { %v4227_v1 = vld [vmem:[%s5553_s23] sm:$0xff] (!%p491_p9)   ;;  %3842 = vmatprep.subr.bf16.mxu0 (!%p491_p9), %v4226_v0  ;;  %v4229_v3 = vld [vmem:[%s5553_s23 + $0x8] sm:$0xff] (!%p491_p9)   ;;  %v4231_v5 = vld [vmem:[%s5553_s23 + $0x10] sm:$0xff] (!%p491_p9)   ;;  %879 = vmatpush1.bf16.msra.mxu1 (!%p491_p9), %v4252_v59 }
  0x1f   : > { %3843 = vmatpush3.bf16.msra.mxu0 %v4227_v1  ;;  %s542_s20 = scalar_select %p541_p10, %s4665_s28, 1  ;;  %v4232_v6 = vld [vmem:[%s5553_s23 + $0x58] sm:$0xff]   ;;  %v4234_v8 = vld [vmem:[%s5553_s23 + $0x60] sm:$0xff]   ;;  %v4236_v10 = vld [vmem:[%s5553_s23 + $0x68] sm:$0xff]   ;;  %880 = vmatprep.subr.bf16.mxu1 %v4253_v60 }
  0x20   : > { %3844 = vmatprep.subr.bf16.mxu0 %v4228_v2  ;;  %v4233_v7 = vld [vmem:[%s5553_s23 + $0x18] sm:$0xff]   ;;  %v4235_v9 = vld [vmem:[%s5553_s23 + $0x20] sm:$0xff]   ;;  %v4237_v11 = vld [vmem:[%s5553_s23 + $0x28] sm:$0xff]   ;;  %s4553_s28 = smov [#allocation2]  }
  0x21   : > { %s4178_s24 = smul.u32 24, %s542_s20  ;;  %v4238_v13 = vld [vmem:[%s5553_s23 + $0x70] sm:$0xff]   ;;  %v4240_v15 = vld [vmem:[%s5553_s23 + $0x78] sm:$0xff]   ;;  %s4547_s20 = smov 48  }
  0x22   : > { %v4239_v14 = vld [vmem:[%s5553_s23 + $0x30] sm:$0xff]   ;;  %v4241_v16 = vld [vmem:[%s5553_s23 + $0x38] sm:$0xff]   ;;  %881 = vmatpush1.bf16.msra.mxu1 %v4255_v62 }
  0x23   : > { %3845 = vmatpush3.bf16.msra.mxu0 %v4229_v3  ;;  %s545_s30 = scalar_lea.vmem %s5554_s29, %s4178_s24  ;;  %v4258_v0 = vld [vmem:[%s5511_s5 + $0x30] ss:$8 sps:$4 sm:$0xff]   ;;  %882 = vmatprep.subr.bf16.mxu1 %v4256_v63  ;;  %s4546_s29 = smov 64  }
  0x24   : > { %3846 = vmatprep.subr.bf16.mxu0 %v4230_v4  ;;  %v4244_v12 = vld [vmem:[%s545_s30 + $0x4] ss:$8 sps:$4 sm:$0xff]   ;;  %v549_v17 = vld [vmem:[%s545_s30 + $0x10] sm:$0x77]  ;;  %v4242_v18 = vld [vmem:[%s545_s30] ss:$8 sps:$4 sm:$0xff]  }
  0x25   : > { %730 = vmatprep.mubr.bf16.mxu0 %v4244_v12  ;;  %v3628_v19 = vcombine.high %v549_v17, %v549_v17  ;;  %v3627_v20 = vcombine.low %v549_v17, %v549_v17  ;;  %v3645_v12 = vld [vmem:[%s5509_s3] ss:$0 sm:$0xff]  ;;  %s4550_s30 = smov 96  }
  0x26   : > { %883 = vmatpush1.bf16.msra.mxu1 %v4258_v0 }
  0x27   : > { %3847 = vmatpush3.bf16.msra.mxu0 %v4231_v5 }
  0x28   : > { %3848 = vmatprep.subr.bf16.mxu0 %v4232_v6 }
  0x2b   : > { %3849 = vmatpush3.bf16.msra.mxu0 %v4233_v7 }
  0x2c   : > { %3850 = vmatprep.subr.bf16.mxu0 %v4234_v8 }
  0x2f   : > { %3851 = vmatpush3.bf16.msra.mxu0 %v4235_v9 }
  0x30   : > { %3852 = vmatprep.subr.bf16.mxu0 %v4236_v10 }
  0x33   : > { %3853 = vmatpush3.bf16.msra.mxu0 %v4237_v11 }
  0x34   : > { %3854 = vmatprep.subr.bf16.mxu0 %v4238_v13 }
  0x37   : > { %3855 = vmatpush3.bf16.msra.mxu0 %v4239_v14 }
  0x38   : > { %3856 = vmatprep.subr.bf16.mxu0 %v4240_v15 }
  0x3b   : > { %3857 = vmatpush3.bf16.msra.mxu0 %v4241_v16  ;;  %v3646_v16 = vld [vmem:[%s5510_s4] ss:$0 sm:$0xff] }
  0x3e   : > { %731 = vmatmul.mubr.bf16.vlgmr.msra.gmra.mrb[0].mxu0 %v4242_v18 }
  0x3f   : > { %738 = vmatprep.mubr.bf16.mxu0 %v3628_v19 }
  0x46   : > { %739 = vmatmul.mubr.bf16.gmra.mrb[4].mxu0 %v3627_v20 }
 0x111   : > { %v3858_v21 = vpop.f32.mrb[0].mxu0 }
 0x112   : > { %v3859_v23 = vpop.f32.mrb[1].mxu0 }
 0x113   : > { %v3860_v24 = vadd.f32 %v3859_v23, %v3858_v21  ;;  %v3861_v25 = vpop.f32.mrb[2].mxu0 }
 0x114   : > { %v3862_v27 = vpop.f32.mrb[3].mxu0 }
 0x115   : > { %v4751_v28 = vadd.f32 %v3860_v24, %v582_v22  ;;  %v3863_v29 = vadd.f32 %v3862_v27, %v3861_v25 }
 0x117   : > { %v4753_v30 = vadd.f32 %v3863_v29, %v583_v26  ;;  %v749_v31 = vsel %vm748_vm0, %v4751_v28, 0.0  ;;  %v820_v26 = vlaneseq }
 0x118   : > { %750 = vadd.xlane.f32.xlu0 %v749_v31  ;;  %v818_v31 = vld [vmem:[%s5512_s6] sm:$0x3] }
 0x119   : > { %v3864_v32 = vpop.f32.mrb[4].mxu0  ;;  %v752_v36 = vsel %vm748_vm0, %v4753_v30, 0.0  ;;  %v821_v27 = vshrl.u32 %v820_v26, 7 }
 0x11a   : > { %v3865_v34 = vpop.f32.mrb[5].mxu0 }
 0x11b   : > { %v3866_v35 = vadd.f32 %v3865_v34, %v3864_v32  ;;  %v3867_v37 = vpop.f32.mrb[6].mxu0  ;;  %v4806_v29 = vsub.s32 0, %v821_v27  ;;  %v4811_v32 = vsub.s32 1, %v821_v27 }
 0x11c   : > { %753 = vadd.xlane.f32.xlu0 %v752_v36  ;;  %v3868_v38 = vpop.f32.mrb[7].mxu0 }
 0x11d   : > { %v4762_v39 = vadd.f32 %v3866_v35, %v584_v33  ;;  %v823_v33 = vrot.slane %v818_v31, %v4806_v29  ;;  %v827_v35 = vrot.slane %v818_v31, %v4811_v32 }
 0x11f   : > { %v756_v40 = vsel %vm755_vm1, %v4762_v39, 0.0 }
 0x120   : > { %757 = vadd.xlane.f32.xlu1 %v756_v40 }
 0x1a5   : > { %v751_v41 = vpop.xlane.xlu0 %750 }
 0x1a6   : > { %v760_v42 = vmul.f32 0.015625, %v751_v41 }
 0x1a8   : > { %v763_v43 = vsub.f32 %v4751_v28, %v760_v42 }
 0x1a9   : > { %v754_v44 = vpop.xlane.xlu0 %753 }
 0x1aa   : > { %v761_v45 = vmul.f32 0.015625, %v754_v44  ;;  %v766_v46 = vmul.f32 %v763_v43, %v763_v43 }
 0x1ac   : > { %v764_v47 = vsub.f32 %v4753_v30, %v761_v45  ;;  %v769_v48 = vsel %vm748_vm0, %v766_v46, 0.0 }
 0x1ad   : > { %v758_v49 = vpop.xlane.xlu1 %757  ;;  %770 = vadd.xlane.f32.xlu1 %v769_v48 }
 0x1ae   : > { %v762_v50 = vmul.f32 0.015625, %v758_v49  ;;  %v767_v51 = vmul.f32 %v764_v47, %v764_v47 }
 0x1b0   : > { %v765_v52 = vsub.f32 %v4762_v39, %v762_v50  ;;  %v772_v53 = vsel %vm748_vm0, %v767_v51, 0.0 }
 0x1b1   : > { %773 = vadd.xlane.f32.xlu0 %v772_v53 }
 0x1b2   : > { %v768_v54 = vmul.f32 %v765_v52, %v765_v52 }
 0x1b4   : > { %v775_v55 = vsel %vm755_vm1, %v768_v54, 0.0 }
 0x1b5   : > { %776 = vadd.xlane.f32.xlu1 %v775_v55 }
 0x23a   : > { %v771_v1 = vpop.xlane.xlu1 %770 }
 0x23b   : > { %v778_v2 = vmul.f32 0.015625, %v771_v1 }
 0x23d   : > { %v781_v3 = vadd.f32 1e-06, %v778_v2 }
 0x23e   : > { %v774_v4 = vpop.xlane.xlu0 %773 }
 0x23f   : > { %4335 = vrsqrt.f32 %v781_v3  ;;  %v779_v5 = vmul.f32 0.015625, %v774_v4 }
 0x241   : > { %v782_v6 = vadd.f32 1e-06, %v779_v5 }
 0x242   : > { %v777_v7 = vpop.xlane.xlu1 %776 }
 0x243   : > { %4337 = vrsqrt.f32 %v782_v6  ;;  %v780_v8 = vmul.f32 0.015625, %v777_v7 }
 0x245   : > { %v783_v9 = vadd.f32 1e-06, %v780_v8 }
 0x247   : > { %4339 = vrsqrt.f32 %v783_v9 }
 0x249   : > { %v4336_v10 = vpop.eup %4335 }
 0x24a   : > { %v787_v11 = vmul.f32 %v4336_v10, %v763_v43 }
 0x24c   : > { %v796_v15 = vmul.f32 %v3645_v12, %v787_v11 }
 0x24d   : > { %v4338_v13 = vpop.eup %4337 }
 0x24e   : > { %v788_v14 = vmul.f32 %v4338_v13, %v764_v47  ;;  %v805_v19 = vadd.f32 %v3646_v16, %v796_v15 }
 0x250   : > { %v797_v17 = vmul.f32 %v3645_v12, %v788_v14 }
 0x251   : > { %v4340_v18 = vpop.eup %4339 }
 0x252   : > { %v806_v20 = vadd.f32 %v3646_v16, %v797_v17  ;;  %v789_v21 = vmul.f32 %v4340_v18, %v765_v52 }
 0x254   : > { %v808_v22 = vpack.c.bf16 %v806_v20, %v805_v19  ;;  %v798_v23 = vmul.f32 %v3645_v12, %v789_v21 }
 0x256   : > { %3655 = vmatmul.mubr.msk.bf16.vlgmr.msra.gmra.mrb[0].mxu1 %vm748_vm0, %v808_v22  ;;  %v807_v24 = vadd.f32 %v3646_v16, %v798_v23 }
 0x257   : > { %918 = vmatprep.mubr.bf16.mxu1 %v4545_v61 }
 0x258   : > { %v809_v25 = vpack.c.bf16 %v807_v24, %v807_v24 }
 0x25e   : > { %3656 = vmatmul.mubr.msk.bf16.gmra.mrb[4].mxu1 %vm748_vm0, %v809_v25 }
 0x329   : > { %v910_v34 = vpop.f32.mrb[0].mxu1 }
 0x32a   : > { %v912_v36 = vpop.f32.mrb[1].mxu1  ;;  %v911_v38 = vadd.f32 %v910_v34, %v823_v33 }
 0x32b   : > { %v914_v37 = vpop.f32.mrb[2].mxu1  ;;  %v913_v42 = vadd.f32 %v912_v36, %v827_v35 }
 0x32c   : > { %v915_v40 = vadd.f32 %v914_v37, %v823_v33  ;;  %v916_v41 = vpop.f32.mrb[3].mxu1 }
 0x32d   : > { %v917_v43 = vadd.f32 %v916_v41, %v827_v35 }
 0x32e   : > { %v4815_v44 = vpack.c.bf16 %v915_v40, %v911_v38 }
 0x32f   : > { %v4817_v45 = vpack.c.bf16 %v917_v43, %v913_v42 }
 0x330   : > { %933 = vrot.lane.b32.xlu0 %v4815_v44, %s4546_s29  ;;  %4006 = vmatprep.mubr.msk.bf16.mxu1 %vm937_vm2, %v4815_v44 }
 0x331   : > { %v920_v46 = vpop.f32.mrb[4].mxu1 }
 0x332   : > { %v921_v47 = vadd.f32 %v920_v46, %v823_v33  ;;  %v922_v48 = vpop.f32.mrb[5].mxu1 }
 0x333   : > { %v924_v49 = vpop.f32.mrb[6].mxu1  ;;  %v923_v56 = vadd.f32 %v922_v48, %v827_v35 }
 0x334   : > { %v4823_v50 = vpack.c.bf16 %v921_v47, %v921_v47  ;;  %v925_v51 = vpop.f32.mrb[7].mxu1 }
 0x335   : > { %v4832_v57 = vpack.c.bf16 %v923_v56, %v923_v56 }
 0x336   : > { %935 = vrot.lane.b32.xlu1 %v4823_v50, %s4546_s29 }
 0x337   : > { %v1043_v58 = vsel %vm1041_vm3, %v4832_v57, 0 }
 0x3a2   : > { %v934_v52 = vpop.permute.xlu0 %933 }
 0x3a3   : > { %4154 = vmatprep.subr.msk.bf16.mxu1 %vm937_vm2, %v934_v52  ;;  %v945_v53 = vsel %vm937_vm2, %v934_v52, 0 }
 0x3a4   : > { %4003 = vmatpush3.bf16.xpose.msra.mxu1 %v945_v53 }
 0x3a8   : > { %v936_v54 = vpop.permute.xlu1 %935 }
 0x3a9   : > { %4155 = vmatprep.subr.msk.bf16.mxu1 %vm937_vm2, %v936_v54  ;;  %v948_v55 = vsel %vm937_vm2, %v936_v54, 0 }
 0x3ac   : > { %4005 = vmatpush3.bf16.xpose.msra.mxu1 %v948_v55 }
 0x3ad   : > { %4010 = vmatprep.subr.bf16.mxu1 %v4817_v45 }
 0x3b3   : > { %4007 = vmatmul.mubr.msk.bf16.vlgmr.msra.gmra.mrb[8].mxu1 %vm937_vm2, %v4823_v50 }
 0x3b4   : > { %4011 = vmatpush3.bf16.msra.mxu1 %v4817_v45 }
 0x3b5   : > { %4156 = vmatprep.subr.msk.bf16.mxu1 %vm1041_vm3, %v4832_v57 }
 0x3b8   : > { %4013 = vmatpush3.bf16.msra.mxu1 %v1043_v58 }
 0x486   : > { %v4008_v59 = vpop.f32.mrb[8].mxu1 }
 0x487   : > { %v984_v60 = vpop.f32.mrb[9].mxu1  ;;  %v1006_v2 = vsel %vm1005_vm5, %v4008_v59, -inf }
 0x488   : > { %v4009_v62 = vpop.f32.mrb[10].mxu1  ;;  %v999_v63 = vsel %vm998_vm4, %v984_v60, -inf }
 0x489   : > { %1000 = vmax.xlane.f32.xlu1 %v999_v63  ;;  %v987_v0 = vpop.f32.mrb[11].mxu1 }
 0x48a   : > { %v1002_v1 = vsel %vm998_vm4, %v987_v0, -inf }
 0x48b   : > { %1003 = vmax.xlane.f32.xlu0 %v1002_v1 }
 0x48f   : > { %1007 = vmax.xlane.f32.xlu0 %v1006_v2 }
 0x516   : > { %v1001_v3 = vpop.xlane.xlu1 %1000 }
 0x517   : > { %v1009_v6 = vsub.f32 %v984_v60, %v1001_v3 }
 0x518   : > { %v1004_v4 = vpop.xlane.xlu0 %1003 }
 0x519   : > { %v1010_v5 = vsub.f32 %v987_v0, %v1004_v4  ;;  %v1012_v10 = vmul.f32 1.442695, %v1009_v6 }
 0x51b   : > { %v1014_v7 = vmul.f32 1.442695, %v1010_v5 }
 0x51c   : > { %v1008_v8 = vpop.xlane.xlu0 %1007 }
 0x51d   : > { %4341 = vpow2.f32 %v1014_v7  ;;  %v1011_v9 = vsub.f32 %v4008_v59, %v1008_v8 }
 0x51f   : > { %v1016_v11 = vmul.f32 1.442695, %v1011_v9 }
 0x521   : > { %4343 = vpow2.f32 %v1016_v11 }
 0x522   : > { %4345 = vpow2.f32 %v1012_v10 }
 0x527   : > { %v4342_v12 = vpop.eup %4341 }
 0x528   : > { %v1021_v13 = vsel %vm998_vm4, %v4342_v12, 0.0 }
 0x529   : > { %1022 = vadd.xlane.f32.xlu0 %v1021_v13 }
 0x52b   : > { %v4344_v14 = vpop.eup %4343 }
 0x52c   : > { %v1024_v15 = vsel %vm1005_vm5, %v4344_v14, 0.0  ;;  %v4346_v16 = vpop.eup %4345 }
 0x52d   : > { %1025 = vadd.xlane.f32.xlu1 %v1024_v15  ;;  %v1018_v17 = vsel %vm998_vm4, %v4346_v16, 0.0 }
 0x531   : > { %1019 = vadd.xlane.f32.xlu1 %v1018_v17 }
 0x53f   : > { %1099 = vrot.lane.b32.xlu0 %v4815_v44, %s4547_s20 }
 0x542   : > { %1101 = vrot.lane.b32.xlu1 %v4823_v50, %s4547_s20 }
 0x543   : > { %1097 = vrot.lane.b32.xlu0 %v4823_v50, %s4548_s19 }
 0x546   : > { %1268 = vrot.lane.b32.xlu1 %v4815_v44, %s5538_s18 }
 0x547   : > { %1264 = vrot.lane.b32.xlu0 %v4815_v44, %s4550_s30 }
 0x54a   : > { %1095 = vrot.lane.b32.xlu1 %v4815_v44, %s4548_s19 }
 0x54e   : > { %1270 = vrot.lane.b32.xlu1 %v4823_v50, %s5538_s18 }
 0x552   : > { %1266 = vrot.lane.b32.xlu1 %v4823_v50, %s4550_s30 }
 0x5b6   : > { %v1023_v18 = vpop.xlane.xlu0 %1022 }
 0x5ba   : > { %v1026_v19 = vpop.xlane.xlu1 %1025  ;;  %v1100_v20 = vpop.permute.xlu0 %1099 }
 0x5bb   : > { %4157 = vmatprep.subr.msk.bf16.mxu1 %vm937_vm2, %v1100_v20  ;;  %4347 = vrcp.f32 %v1026_v19  ;;  %v1110_v42 = vsel %vm937_vm2, %v1100_v20, 0 }
 0x5bc   : > { %4349 = vrcp.f32 %v1023_v18 }
 0x5be   : > { %v1020_v21 = vpop.xlane.xlu1 %1019  ;;  %v1098_v22 = vpop.permute.xlu0 %1097 }
 0x5bf   : > { %4351 = vrcp.f32 %v1020_v21 }
 0x5c2   : > { %v1102_v23 = vpop.permute.xlu1 %1101  ;;  %v1265_v24 = vpop.permute.xlu0 %1264 }
 0x5c3   : > { %4038 = vmatprep.mubr.msk.bf16.mxu0 %vm937_vm2, %v1265_v24  ;;  %v1113_v47 = vsel %vm937_vm2, %v1102_v23, 0 }
 0x5c5   : > { %v4348_v25 = vpop.eup %4347 }
 0x5c6   : > { %v1269_v26 = vpop.permute.xlu1 %1268  ;;  %v4350_v27 = vpop.eup %4349  ;;  %v1032_v34 = vmul.f32 %v4348_v25, %v4344_v14 }
 0x5c7   : > { %4160 = vmatprep.subr.msk.bf16.mxu0 %vm937_vm2, %v1269_v26  ;;  %v1279_v31 = vsel %vm937_vm2, %v1269_v26, 0  ;;  %v1031_v37 = vmul.f32 %v4350_v27, %v4342_v12 }
 0x5c8   : > { %4035 = vmatpush3.bf16.xpose.msra.mxu0 %v1279_v31  ;;  %v1034_v40 = vpack.c.bf16 %v1032_v34, %v1032_v34 }
 0x5c9   : > { %v4352_v33 = vpop.eup %4351 }
 0x5ca   : > { %v1096_v35 = vpop.permute.xlu1 %1095  ;;  %v1030_v36 = vmul.f32 %v4352_v33, %v4346_v16 }
 0x5cc   : > { %v1033_v38 = vpack.c.bf16 %v1031_v37, %v1030_v36 }
 0x5ce   : > { %v1271_v41 = vpop.permute.xlu1 %1270  ;;  %4014 = vmatprep.mubr.msk.bf16.mxu1 %vm998_vm4, %v1033_v38 }
 0x5cf   : > { %4015 = vmatmul.mubr.msk.bf16.vlgmr.msra.gmra.mrb[12].mxu1 %vm998_vm4, %v1034_v40  ;;  %4161 = vmatprep.subr.msk.bf16.mxu0 %vm937_vm2, %v1271_v41  ;;  %v1282_v43 = vsel %vm937_vm2, %v1271_v41, 0 }
 0x5d0   : > { %4019 = vmatpush3.bf16.xpose.msra.mxu1 %v1110_v42  ;;  %4022 = vmatprep.mubr.msk.bf16.mxu1 %vm937_vm2, %v1096_v35 }
 0x5d1   : > { %4158 = vmatprep.subr.msk.bf16.mxu1 %vm937_vm2, %v1102_v23  ;;  %4037 = vmatpush3.bf16.xpose.msra.mxu0 %v1282_v43 }
 0x5d2   : > { %v1267_v46 = vpop.permute.xlu1 %1266 }
 0x5d8   : > { %4021 = vmatpush3.bf16.xpose.msra.mxu1 %v1113_v47  ;;  %4039 = vmatmul.mubr.msk.bf16.vlgmr.msra.gmra.mrb[8].mxu0 %vm937_vm2, %v1267_v46 }
 0x5df   : > { %4023 = vmatmul.mubr.msk.bf16.vlgmr.msra.gmra.mrb[16].mxu1 %vm937_vm2, %v1098_v22 }
 0x6a2   : > { %v4877_v48 = vpop.f32.mrb[12].mxu1 }
 0x6a3   : > { %v4879_v49 = vpop.f32.mrb[13].mxu1 }
 0x6a4   : > { %v4017_v51 = vpop.f32.mrb[14].mxu1 }
 0x6a5   : > { %v4881_v52 = vpop.f32.mrb[15].mxu1 }
 0x6a6   : > { %v1093_v53 = vpack.c.bf16 %v4881_v52, %v4879_v49 }
 0x6ab   : > { %v4040_v54 = vpop.f32.mrb[8].mxu0 }
 0x6ac   : > { %v1318_v55 = vpop.f32.mrb[9].mxu0  ;;  %v1338_v3 = vsel %vm1005_vm5, %v4040_v54, -inf }
 0x6ad   : > { %v4041_v56 = vpop.f32.mrb[10].mxu0  ;;  %v1332_v4 = vsel %vm998_vm4, %v1318_v55, -inf }
 0x6ae   : > { %v1321_v58 = vpop.f32.mrb[11].mxu0 }
 0x6af   : > { %v1335_v5 = vsel %vm998_vm4, %v1321_v58, -inf }
 0x6b2   : > { %v4024_v59 = vpop.f32.mrb[16].mxu1 }
 0x6b3   : > { %v1149_v60 = vpop.f32.mrb[17].mxu1  ;;  %v1169_v2 = vsel %vm1005_vm5, %v4024_v59, -inf }
 0x6b4   : > { %v4025_v62 = vpop.f32.mrb[18].mxu1  ;;  %v1163_v63 = vsel %vm998_vm4, %v1149_v60, -inf }
 0x6b5   : > { %1164 = vmax.xlane.f32.xlu0 %v1163_v63  ;;  %v1152_v0 = vpop.f32.mrb[19].mxu1 }
 0x6b6   : > { %v1166_v1 = vsel %vm998_vm4, %v1152_v0, -inf }
 0x6b7   : > { %1167 = vmax.xlane.f32.xlu1 %v1166_v1 }
 0x6b9   : > { %1170 = vmax.xlane.f32.xlu0 %v1169_v2 }
 0x6bb   : > { %1339 = vmax.xlane.f32.xlu1 %v1338_v3 }
 0x6bd   : > { %1333 = vmax.xlane.f32.xlu0 %v1332_v4 }
 0x6c1   : > { %1336 = vmax.xlane.f32.xlu0 %v1335_v5 }
 0x742   : > { %v1165_v6 = vpop.xlane.xlu0 %1164 }
 0x743   : > { %v1172_v18 = vsub.f32 %v1149_v60, %v1165_v6 }
 0x744   : > { %v1168_v7 = vpop.xlane.xlu1 %1167 }
 0x745   : > { %v1175_v21 = vmul.f32 1.442695, %v1172_v18  ;;  %v1173_v36 = vsub.f32 %v1152_v0, %v1168_v7 }
 0x746   : > { %v1171_v8 = vpop.xlane.xlu0 %1170 }
 0x747   : > { %v1174_v13 = vsub.f32 %v4024_v59, %v1171_v8  ;;  %v1177_v37 = vmul.f32 1.442695, %v1173_v36 }
 0x748   : > { %v1340_v9 = vpop.xlane.xlu1 %1339 }
 0x749   : > { %v1343_v10 = vsub.f32 %v4040_v54, %v1340_v9  ;;  %v1179_v19 = vmul.f32 1.442695, %v1174_v13 }
 0x74a   : > { %v1334_v11 = vpop.xlane.xlu0 %1333 }
 0x74b   : > { %v1341_v12 = vsub.f32 %v1318_v55, %v1334_v11  ;;  %v1348_v14 = vmul.f32 1.442695, %v1343_v10 }
 0x74d   : > { %v1344_v15 = vmul.f32 1.442695, %v1341_v12 }
 0x74e   : > { %v1337_v16 = vpop.xlane.xlu0 %1336 }
 0x74f   : > { %4353 = vpow2.f32 %v1344_v15  ;;  %v1342_v17 = vsub.f32 %v1321_v58, %v1337_v16 }
 0x750   : > { %4355 = vpow2.f32 %v1348_v14 }
 0x751   : > { %v1346_v20 = vmul.f32 1.442695, %v1342_v17 }
 0x753   : > { %4357 = vpow2.f32 %v1346_v20 }
 0x754   : > { %4359 = vpow2.f32 %v1179_v19 }
 0x755   : > { %4361 = vpow2.f32 %v1175_v21 }
 0x756   : > { %4363 = vpow2.f32 %v1177_v37 }
 0x759   : > { %v4891_v22 = vpop.eup %4353 }
 0x75a   : > { %v1350_v23 = vsel %vm998_vm4, %v4891_v22, 0.0  ;;  %v4895_v24 = vpop.eup %4355 }
 0x75b   : > { %1351 = vadd.xlane.f32.xlu1 %v1350_v23  ;;  %v1356_v26 = vsel %vm1005_vm5, %v4895_v24, 0.0 }
 0x75d   : > { %v4358_v25 = vpop.eup %4357 }
 0x75e   : > { %v1353_v27 = vsel %vm998_vm4, %v4358_v25, 0.0  ;;  %v4360_v31 = vpop.eup %4359 }
 0x75f   : > { %1357 = vadd.xlane.f32.xlu1 %v1356_v26  ;;  %1354 = vadd.xlane.f32.xlu0 %v1353_v27  ;;  %v1187_v33 = vsel %vm1005_vm5, %v4360_v31, 0.0  ;;  %v4362_v34 = vpop.eup %4361 }
 0x760   : > { %v1181_v35 = vsel %vm998_vm4, %v4362_v34, 0.0  ;;  %v4364_v38 = vpop.eup %4363 }
 0x761   : > { %v1184_v40 = vsel %vm998_vm4, %v4364_v38, 0.0 }
 0x763   : > { %1188 = vadd.xlane.f32.xlu0 %v1187_v33 }
 0x767   : > { %1182 = vadd.xlane.f32.xlu0 %v1181_v35 }
 0x770   : > { %1202 = vrot.lane.b32.xlu1 %v4832_v57, %s4548_s19 }
 0x774   : > { %1367 = vrot.lane.b32.xlu1 %v4817_v45, %s4550_s30 }
 0x77d   : > { %1200 = vrot.lane.b32.xlu0 %v4817_v45, %s4548_s19 }
 0x781   : > { %1435 = vrot.lane.b32.xlu0 %v4815_v44, %s5536_s26 }
 0x785   : > { %1431 = vrot.lane.b32.xlu0 %v4815_v44, %s5534_s0 }
 0x798   : > { %1185 = vadd.xlane.f32.xlu1 %v1184_v40 }
 0x7a9   : > { %1369 = vrot.lane.b32.xlu1 %v4832_v57, %s4550_s30 }
 0x7ad   : > { %1437 = vrot.lane.b32.xlu1 %v4823_v50, %s5536_s26 }
 0x7b1   : > { %1433 = vrot.lane.b32.xlu1 %v4823_v50, %s5534_s0 }
 0x7e8   : > { %v1352_v41 = vpop.xlane.xlu1 %1351 }
 0x7ec   : > { %v1355_v42 = vpop.xlane.xlu0 %1354  ;;  %v1358_v46 = vpop.xlane.xlu1 %1357 }
 0x7ed   : > { %4365 = vrcp.f32 %v1355_v42 }
 0x7f0   : > { %v1189_v43 = vpop.xlane.xlu0 %1188  ;;  %v1203_v47 = vpop.permute.xlu1 %1202 }
 0x7f1   : > { %v1212_v54 = vsel %vm1041_vm3, %v1203_v47, 0  ;;  %4367 = vrcp.f32 %v1189_v43 }
 0x7f4   : > { %v1183_v44 = vpop.xlane.xlu0 %1182  ;;  %v1368_v55 = vpop.permute.xlu1 %1367 }
 0x7f5   : > { %4369 = vrcp.f32 %v1183_v44 }
 0x7f6   : > { %4371 = vrcp.f32 %v1352_v41 }
 0x7f7   : > { %v4366_v56 = vpop.eup %4365 }
 0x7f8   : > { %v1201_v51 = vpop.permute.xlu0 %1200  ;;  %v1363_v2 = vmul.f32 %v4366_v56, %v4358_v25 }
 0x7f9   : > { %4026 = vmatprep.subr.bf16.mxu1 %v1201_v51 }
 0x7fa   : > { %4027 = vmatpush3.bf16.msra.mxu1 %v1201_v51 }
 0x7fb   : > { %4159 = vmatprep.subr.msk.bf16.mxu1 %vm1041_vm3, %v1203_v47  ;;  %v4368_v58 = vpop.eup %4367 }
 0x7fc   : > { %v1195_v63 = vmul.f32 %v4368_v58, %v4360_v31  ;;  %v1436_v10 = vpop.permute.xlu0 %1435 }
 0x7fd   : > { %v1446_v14 = vsel %vm937_vm2, %v1436_v10, 0 }
 0x7fe   : > { %4029 = vmatpush3.bf16.msra.mxu1 %v1212_v54  ;;  %v1197_v5 = vpack.c.bf16 %v1195_v63, %v1195_v63 }
 0x7ff   : > { %4042 = vmatprep.subr.bf16.mxu1 %v1368_v55  ;;  %v4370_v59 = vpop.eup %4369 }
 0x800   : > { %v4372_v60 = vpop.eup %4371  ;;  %v1193_v0 = vmul.f32 %v4370_v59, %v4362_v34  ;;  %v1432_v13 = vpop.permute.xlu0 %1431 }
 0x801   : > { %v1362_v4 = vmul.f32 %v4372_v60, %v4891_v22 }
 0x803   : > { %v1365_v7 = vpack.c.bf16 %v1363_v2, %v1362_v4 }
 0x825   : > { %v1186_v50 = vpop.xlane.xlu1 %1185 }
 0x826   : > { %4373 = vrcp.f32 %v1186_v50 }
 0x827   : > { %4375 = vrcp.f32 %v1358_v46 }
 0x829   : > { %v1370_v8 = vpop.permute.xlu1 %1369 }
 0x82a   : > { %v1379_v11 = vsel %vm1041_vm3, %v1370_v8, 0 }
 0x82d   : > { %v1438_v15 = vpop.permute.xlu1 %1437 }
 0x82e   : > { %v1449_v16 = vsel %vm937_vm2, %v1438_v15, 0 }
 0x830   : > { %v4374_v62 = vpop.eup %4373 }
 0x831   : > { %v1194_v1 = vmul.f32 %v4374_v62, %v4364_v38  ;;  %v4376_v6 = vpop.eup %4375  ;;  %v1434_v17 = vpop.permute.xlu1 %1433 }
 0x832   : > { %v1364_v9 = vmul.f32 %v4376_v6, %v4895_v24 }
 0x833   : > { %v1196_v3 = vpack.c.bf16 %v1194_v1, %v1193_v0 }
 0x834   : > { %v1366_v12 = vpack.c.bf16 %v1364_v9, %v1364_v9 }
 0x835   : > { %4030 = vmatprep.mubr.msk.bf16.mxu1 %vm998_vm4, %v1196_v3 }
 0x836   : > { %4031 = vmatmul.mubr.msk.bf16.vlgmr.msra.gmra.mrb[20].mxu1 %vm998_vm4, %v1197_v5 }
 0x837   : > { %4043 = vmatpush3.bf16.msra.mxu1 %v1368_v55  ;;  %4046 = vmatprep.mubr.msk.bf16.mxu1 %vm998_vm4, %v1365_v7 }
 0x838   : > { %4162 = vmatprep.subr.msk.bf16.mxu1 %vm1041_vm3, %v1370_v8 }
 0x83b   : > { %4045 = vmatpush3.bf16.msra.mxu1 %v1379_v11 }
 0x83c   : > { %4163 = vmatprep.subr.msk.bf16.mxu1 %vm937_vm2, %v1436_v10 }
 0x83e   : > { %4047 = vmatmul.mubr.msk.bf16.vlgmr.msra.gmra.mrb[24].mxu1 %vm998_vm4, %v1366_v12  ;;  %v4259_v12 = vld [vmem:[%s5513_s7] sm:$0xff]  }
 0x83f   : > { %4054 = vmatprep.mubr.msk.bf16.mxu1 %vm937_vm2, %v1432_v13  ;;  %v4260_v13 = vld [vmem:[%s5513_s7 + $0x8] sm:$0xff]  }
 0x844   : > { %4051 = vmatpush3.bf16.xpose.msra.mxu1 %v1446_v14  ;;  %v4261_v14 = vld [vmem:[%s5513_s7 + $0x10] sm:$0xff]  }
 0x845   : > { %4164 = vmatprep.subr.msk.bf16.mxu1 %vm937_vm2, %v1438_v15  ;;  %v4262_v15 = vld [vmem:[%s5513_s7 + $0x18] sm:$0xff]  }
 0x84c   : > { %4053 = vmatpush3.bf16.xpose.msra.mxu1 %v1449_v16 }
 0x853   : > { %4055 = vmatmul.mubr.msk.bf16.vlgmr.msra.gmra.mrb[28].mxu1 %vm937_vm2, %v1434_v17 }
 0x854   : > { %1888 = vmatprep.mubr.bf16.mxu1 %v4545_v61 }
 0x909   : > { %v4032_v18 = vpop.f32.mrb[20].mxu1 }
 0x90a   : > { %v1248_v19 = vpop.f32.mrb[21].mxu1  ;;  %v1263_v62 = vpack.c.bf16 %v4032_v18, %v4032_v18 }
 0x90b   : > { %v4033_v20 = vpop.f32.mrb[22].mxu1 }
 0x90c   : > { %v1251_v21 = vpop.f32.mrb[23].mxu1 }
 0x90d   : > { %v1262_v22 = vpack.c.bf16 %v1251_v21, %v1248_v19 }
 0x911   : > { %v4048_v23 = vpop.f32.mrb[24].mxu1 }
 0x912   : > { %v1415_v24 = vpop.f32.mrb[25].mxu1  ;;  %v1430_v63 = vpack.c.bf16 %v4048_v23, %v4048_v23 }
 0x913   : > { %v4049_v25 = vpop.f32.mrb[26].mxu1 }
 0x914   : > { %v1418_v26 = vpop.f32.mrb[27].mxu1 }
 0x915   : > { %v1429_v27 = vpack.c.bf16 %v1418_v26, %v1415_v24 }
 0x926   : > { %v4056_v31 = vpop.f32.mrb[28].mxu1 }
 0x927   : > { %v1485_v33 = vpop.f32.mrb[29].mxu1  ;;  %v1505_v38 = vsel %vm1005_vm5, %v4056_v31, -inf }
 0x928   : > { %v4057_v34 = vpop.f32.mrb[30].mxu1  ;;  %v1499_v35 = vsel %vm998_vm4, %v1485_v33, -inf }
 0x929   : > { %1500 = vmax.xlane.f32.xlu0 %v1499_v35  ;;  %v1488_v36 = vpop.f32.mrb[31].mxu1 }
 0x92a   : > { %v1502_v37 = vsel %vm998_vm4, %v1488_v36, -inf }
 0x92b   : > { %1503 = vmax.xlane.f32.xlu1 %v1502_v37 }
 0x92d   : > { %1506 = vmax.xlane.f32.xlu0 %v1505_v38 }
 0x9b6   : > { %v1501_v40 = vpop.xlane.xlu0 %1500 }
 0x9b7   : > { %v1508_v41 = vsub.f32 %v1485_v33, %v1501_v40 }
 0x9b8   : > { %v1504_v42 = vpop.xlane.xlu1 %1503 }
 0x9b9   : > { %v1511_v43 = vmul.f32 1.442695, %v1508_v41  ;;  %v1509_v46 = vsub.f32 %v1488_v36, %v1504_v42 }
 0x9ba   : > { %v1507_v44 = vpop.xlane.xlu0 %1506 }
 0x9bb   : > { %4377 = vpow2.f32 %v1511_v43  ;;  %v1513_v47 = vmul.f32 1.442695, %v1509_v46  ;;  %v1510_v51 = vsub.f32 %v4056_v31, %v1507_v44 }
 0x9bd   : > { %4379 = vpow2.f32 %v1513_v47  ;;  %v1515_v54 = vmul.f32 1.442695, %v1510_v51 }
 0x9bf   : > { %4381 = vpow2.f32 %v1515_v54 }
 0x9c5   : > { %v4378_v55 = vpop.eup %4377 }
 0x9c6   : > { %v1517_v50 = vsel %vm998_vm4, %v4378_v55, 0.0 }
 0x9c7   : > { %v4380_v56 = vpop.eup %4379  ;;  %1518 = vadd.xlane.f32.xlu0 %v1517_v50 }
 0x9c8   : > { %v1520_v60 = vsel %vm998_vm4, %v4380_v56, 0.0 }
 0x9c9   : > { %v4382_v58 = vpop.eup %4381 }
 0x9ca   : > { %v1523_v59 = vsel %vm1005_vm5, %v4382_v58, 0.0 }
 0x9cb   : > { %1524 = vadd.xlane.f32.xlu1 %v1523_v59  ;;  %1521 = vadd.xlane.f32.xlu0 %v1520_v60 }
 0x9dc   : > { %1536 = vrot.lane.b32.xlu1 %v4832_v57, %s5534_s0 }
 0x9e0   : > { %1600 = vrot.lane.b32.xlu1 %v1262_v22, %s5536_s26 }
 0x9e1   : > { %1534 = vrot.lane.b32.xlu0 %v4817_v45, %s5534_s0 }
 0x9e4   : > { %1602 = vrot.lane.b32.xlu1 %v1263_v62, %s5536_s26  ;;  %s539_s26 = sand.u32 1, %s4535_s25  }
 0x9e5   : > { %1606 = vrot.lane.b32.xlu0 %v1429_v27, %s5538_s18  ;;  %v1094_v27 = vpack.c.bf16 %v4877_v48, %v4877_v48  ;;  %v3679_v48 = vld [vmem:[%s5514_s8] ss:$0 sm:$0xff]  ;;  %s540_s24 = scalar_lea.vmem [#allocation2], %s539_s26  ;;  %s3553_s21 = scalar_lea.sflag [#allocation3], %s539_s26 }
 0x9e6   : > { %s3565_s27 = sshll.u32 %s540_s24, 4  ;;  %s5466_s27 = int_to_ptr.vmem [resolvable:$true] %s3565_s27 }
 0x9e8   : > { %1608 = vrot.lane.b32.xlu1 %v1430_v63, %s5538_s18  ;;  %s5555_s18 = smov 32  }
 0xa54   : > { %v1519_v0 = vpop.xlane.xlu0 %1518 }
 0xa55   : > { %4383 = vrcp.f32 %v1519_v0 }
 0xa58   : > { %v1522_v1 = vpop.xlane.xlu0 %1521  ;;  %v1525_v2 = vpop.xlane.xlu1 %1524 }
 0xa59   : > { %4385 = vrcp.f32 %v1522_v1 }
 0xa5a   : > { %4387 = vrcp.f32 %v1525_v2 }
 0xa5c   : > { %v1535_v57 = vpop.permute.xlu0 %1534  ;;  %v1537_v3 = vpop.permute.xlu1 %1536 }
 0xa5d   : > { %4058 = vmatprep.subr.bf16.mxu0 %v1535_v57  ;;  %v1546_v4 = vsel %vm1041_vm3, %v1537_v3, 0 }
 0xa5e   : > { %4059 = vmatpush3.bf16.msra.mxu0 %v1535_v57 }
 0xa5f   : > { %4165 = vmatprep.subr.msk.bf16.mxu0 %vm1041_vm3, %v1537_v3  ;;  %v4384_v45 = vpop.eup %4383 }
 0xa60   : > { %v1529_v7 = vmul.f32 %v4384_v45, %v4378_v55  ;;  %v1601_v22 = vpop.permute.xlu1 %1600  ;;  %v1607_v25 = vpop.permute.xlu0 %1606  ;;  %v4265_v45 = vld [vmem:[%s5517_s11 + $0x4] ss:$8 sps:$4 sm:$0xff]  }
 0xa61   : > { %v1618_v26 = vsel %vm937_vm2, %v1093_v53, %v1601_v22  ;;  %1856 = vmatprep.subr.bf16.mxu1 %v4265_v45 }
 0xa62   : > { %4061 = vmatpush3.bf16.msra.mxu0 %v1546_v4  ;;  %v1624_v35 = vsel %vm1622_vm6, %v1618_v26, %v1607_v25  ;;  %v4263_v4 = vld [vmem:[%s5517_s11] ss:$8 sps:$4 sm:$0xff]  }
 0xa63   : > { %v4386_v5 = vpop.eup %4385  ;;  %4066 = vmatprep.subr.bf16.mxu0 %v4259_v12  ;;  %1857 = vmatpush1.bf16.msra.mxu1 %v4263_v4  ;;  %v3680_v26 = vld [vmem:[%s5515_s9] ss:$0 sm:$0xff] }
 0xa64   : > { %v4388_v6 = vpop.eup %4387  ;;  %v1530_v8 = vmul.f32 %v4386_v5, %v4380_v56  ;;  %v1603_v23 = vpop.permute.xlu1 %1602  ;;  %v4268_v5 = vld [vmem:[%s5517_s11 + $0x14] ss:$8 sps:$4 sm:$0xff]  }
 0xa65   : > { %v1531_v9 = vmul.f32 %v4388_v6, %v4382_v58  ;;  %v1621_v33 = vsel %vm937_vm2, %v1094_v27, %v1603_v23  ;;  %v4266_v6 = vld [vmem:[%s5517_s11 + $0x10] ss:$8 sps:$4 sm:$0xff]   ;;  %1858 = vmatprep.subr.bf16.mxu1 %v4268_v5 }
 0xa66   : > { %v1532_v10 = vpack.c.bf16 %v1530_v8, %v1529_v7  ;;  %v4271_v7 = vld [vmem:[%s5517_s11 + $0x24] ss:$8 sps:$4 sm:$0xff]   ;;  %v4269_v8 = vld [vmem:[%s5517_s11 + $0x20] ss:$8 sps:$4 sm:$0xff]  }
 0xa67   : > { %v1533_v11 = vpack.c.bf16 %v1531_v9, %v1531_v9  ;;  %1859 = vmatpush1.bf16.msra.mxu1 %v4266_v6  ;;  %v4272_v9 = vld [vmem:[%s5517_s11 + $0x30] ss:$8 sps:$4 sm:$0xff]  }
 0xa68   : > { %4062 = vmatprep.mubr.msk.bf16.mxu0 %vm998_vm4, %v1532_v10  ;;  %v1609_v24 = vpop.permute.xlu1 %1608  ;;  %1860 = vmatprep.subr.bf16.mxu1 %v4271_v7  ;;  %v4274_v10 = vld [vmem:[%s5517_s11 + $0x34] ss:$8 sps:$4 sm:$0xff]  }
 0xa69   : > { %4063 = vmatmul.mubr.msk.bf16.vlgmr.msra.gmra.mrb[12].mxu0 %vm998_vm4, %v1533_v11  ;;  %v1626_v36 = vsel %vm1622_vm6, %v1621_v33, %v1609_v24  ;;  %v4275_v11 = vld [vmem:[%s5519_s13 + $0x40] sm:$0xff]  }
 0xa6a   : > { %4067 = vmatpush3.bf16.msra.mxu0 %v4259_v12  ;;  %v4276_v12 = vld [vmem:[%s5519_s13] sm:$0xff]  }
 0xa6b   : > { %4068 = vmatprep.subr.bf16.mxu0 %v4260_v13  ;;  %1861 = vmatpush1.bf16.msra.mxu1 %v4269_v8 }
 0xa6c   : > { %1862 = vmatprep.subr.bf16.mxu1 %v4274_v10 }
 0xa6e   : > { %4069 = vmatpush3.bf16.msra.mxu0 %v4260_v13  ;;  %v4277_v13 = vld [vmem:[%s5519_s13 + $0x48] sm:$0xff]  }
 0xa6f   : > { %4070 = vmatprep.subr.bf16.mxu0 %v4261_v14  ;;  %1863 = vmatpush1.bf16.msra.mxu1 %v4272_v9 }
 0xa72   : > { %4071 = vmatpush3.bf16.msra.mxu0 %v4261_v14  ;;  %v4278_v14 = vld [vmem:[%s5519_s13 + $0x8] sm:$0xff]  }
 0xa73   : > { %4072 = vmatprep.subr.bf16.mxu0 %v4262_v15 }
 0xa76   : > { %4073 = vmatpush3.bf16.msra.mxu0 %v4262_v15 }
 0xa77   : > { %3908 = vmatprep.subr.bf16.mxu0 %v4275_v11 }
 0xb3c   : > { %v4064_v16 = vpop.f32.mrb[12].mxu0 }
 0xb3d   : > { %v1597_v17 = vpack.c.bf16 %v4064_v16, %v4064_v16  ;;  %v1582_v18 = vpop.f32.mrb[13].mxu0 }
 0xb3e   : > { %v4065_v19 = vpop.f32.mrb[14].mxu0 }
 0xb3f   : > { %1614 = vrot.lane.b32.xlu1 %v1597_v17, %s4547_s20  ;;  %v1585_v20 = vpop.f32.mrb[15].mxu0 }
 0xb40   : > { %v1596_v21 = vpack.c.bf16 %v1585_v20, %v1582_v18 }
 0xb42   : > { %1612 = vrot.lane.b32.xlu0 %v1596_v21, %s4547_s20 }
 0xbb1   : > { %v1615_v31 = vpop.permute.xlu1 %1614 }
 0xbb2   : > { %v1631_v38 = vsel %vm1627_vm7, %v1626_v36, %v1615_v31 }
 0xbb4   : > { %v1613_v34 = vpop.permute.xlu0 %1612 }
 0xbb5   : > { %v1629_v37 = vsel %vm1627_vm7, %v1624_v35, %v1613_v34  ;;  %v3681_v35 = vld [vmem:[%s5516_s10] ss:$0 sm:$0xff] }
 0xbb6   : > { %4074 = vmatprep.mubr.msk.bf16.mxu0 %vm748_vm0, %v1629_v37 }
 0xbb7   : > { %4075 = vmatmul.mubr.msk.bf16.vlgmr.msra.gmra.mrb[16].mxu0 %vm748_vm0, %v1631_v38 }
 0xbb8   : > { %3909 = vmatpush3.bf16.msra.mxu0 %v4276_v12 }
 0xbb9   : > { %3910 = vmatprep.subr.bf16.mxu0 %v4277_v13 }
 0xbbc   : > { %3911 = vmatpush3.bf16.msra.mxu0 %v4278_v14 }
 0xc8a   : > { %v4076_v49 = vpop.f32.mrb[16].mxu0 }
 0xc8b   : > { %v1702_v52 = vpop.f32.mrb[17].mxu0  ;;  %v1718_v53 = vadd.f32 %v4076_v49, %v4762_v39 }
 0xc8c   : > { %v1716_v40 = vadd.f32 %v1702_v52, %v4751_v28  ;;  %v4077_v41 = vpop.f32.mrb[18].mxu0 }
 0xc8d   : > { %v1705_v42 = vpop.f32.mrb[19].mxu0  ;;  %v4989_v44 = vadd.f32 %v3679_v48, %v1718_v53  ;;  %v4279_v41 = vld [vmem:[%s5519_s13 + $0x50] sm:$0xff]  }
 0xc8e   : > { %v4986_v43 = vadd.f32 %v3679_v48, %v1716_v40  ;;  %v1717_v46 = vadd.f32 %v1705_v42, %v4753_v30  ;;  %v4280_v42 = vld [vmem:[%s5519_s13 + $0x10] sm:$0xff]   ;;  %3912 = vmatprep.subr.bf16.mxu0 %v4279_v41 }
 0xc8f   : > { %v1737_v28 = vsel %vm755_vm1, %v4989_v44, 0.0  ;;  %3913 = vmatpush3.bf16.msra.mxu0 %v4280_v42 }
 0xc90   : > { %v4991_v47 = vadd.f32 %v3679_v48, %v1717_v46  ;;  %v1731_v51 = vsel %vm748_vm0, %v4986_v43, 0.0  ;;  %v4281_v46 = vld [vmem:[%s5519_s13 + $0x58] sm:$0xff]  }
 0xc91   : > { %1732 = vadd.xlane.f32.xlu0 %v1731_v51  ;;  %v4282_v51 = vld [vmem:[%s5519_s13 + $0x18] sm:$0xff]   ;;  %3914 = vmatprep.subr.bf16.mxu0 %v4281_v46 }
 0xc92   : > { %v1734_v54 = vsel %vm748_vm0, %v4991_v47, 0.0 }
 0xc93   : > { %1735 = vadd.xlane.f32.xlu1 %v1734_v54  ;;  %3915 = vmatpush3.bf16.msra.mxu0 %v4282_v51  ;;  %v4283_v54 = vld [vmem:[%s5519_s13 + $0x60] sm:$0xff]  }
 0xc94   : > { %3916 = vmatprep.subr.bf16.mxu0 %v4283_v54 }
 0xc95   : > { %1738 = vadd.xlane.f32.xlu0 %v1737_v28  ;;  %v4284_v28 = vld [vmem:[%s5519_s13 + $0x20] sm:$0xff]  }
 0xc97   : > { %3917 = vmatpush3.bf16.msra.mxu0 %v4284_v28 }
 0xd1e   : > { %v1733_v39 = vpop.xlane.xlu0 %1732 }
 0xd1f   : > { %v1740_v55 = vmul.f32 0.015625, %v1733_v39  ;;  %v4285_v39 = vld [vmem:[%s5519_s13 + $0x68] sm:$0xff]  }
 0xd20   : > { %v1736_v50 = vpop.xlane.xlu1 %1735  ;;  %3918 = vmatprep.subr.bf16.mxu0 %v4285_v39 }
 0xd21   : > { %v1743_v30 = vsub.f32 %v4986_v43, %v1740_v55  ;;  %v1741_v56 = vmul.f32 0.015625, %v1736_v50  ;;  %v4286_v55 = vld [vmem:[%s5519_s13 + $0x28] sm:$0xff]   ;;  %v4287_v50 = vld [vmem:[%s5519_s13 + $0x70] sm:$0xff]  }
 0xd22   : > { %v1739_v58 = vpop.xlane.xlu0 %1738  ;;  %3919 = vmatpush3.bf16.msra.mxu0 %v4286_v55 }
 0xd23   : > { %v1744_v59 = vsub.f32 %v4991_v47, %v1741_v56  ;;  %v1742_v60 = vmul.f32 0.015625, %v1739_v58  ;;  %v1746_v62 = vmul.f32 %v1743_v30, %v1743_v30  ;;  %3920 = vmatprep.subr.bf16.mxu0 %v4287_v50  ;;  %v4289_v56 = vld [vmem:[%s5519_s13 + $0x78] sm:$0xff]  }
 0xd24   : > { %v4290_v58 = vld [vmem:[%s5519_s13 + $0x38] sm:$0xff]  }
 0xd25   : > { %v1745_v63 = vsub.f32 %v4989_v44, %v1742_v60  ;;  %v1749_v0 = vsel %vm748_vm0, %v1746_v62, 0.0  ;;  %v1747_v1 = vmul.f32 %v1744_v59, %v1744_v59 }
 0xd26   : > { %1750 = vadd.xlane.f32.xlu0 %v1749_v0 }
 0xd27   : > { %v1748_v2 = vmul.f32 %v1745_v63, %v1745_v63  ;;  %v1752_v3 = vsel %vm748_vm0, %v1747_v1, 0.0 }
 0xd29   : > { %v1755_v57 = vsel %vm755_vm1, %v1748_v2, 0.0 }
 0xd2a   : > { %1756 = vadd.xlane.f32.xlu1 %v1755_v57  ;;  %1753 = vadd.xlane.f32.xlu0 %v1752_v3 }
 0xdb3   : > { %v1751_v15 = vpop.xlane.xlu0 %1750 }
 0xdb4   : > { %v1758_v16 = vmul.f32 0.015625, %v1751_v15 }
 0xdb6   : > { %v1761_v17 = vadd.f32 1e-06, %v1758_v16 }
 0xdb7   : > { %v1754_v18 = vpop.xlane.xlu0 %1753  ;;  %v1757_v19 = vpop.xlane.xlu1 %1756 }
 0xdb8   : > { %4389 = vrsqrt.f32 %v1761_v17  ;;  %v1759_v20 = vmul.f32 0.015625, %v1754_v18  ;;  %v1760_v21 = vmul.f32 0.015625, %v1757_v19 }
 0xdba   : > { %v1762_v22 = vadd.f32 1e-06, %v1759_v20  ;;  %v1763_v23 = vadd.f32 1e-06, %v1760_v21 }
 0xdbc   : > { %4391 = vrsqrt.f32 %v1762_v22 }
 0xdbd   : > { %4393 = vrsqrt.f32 %v1763_v23 }
 0xdc2   : > { %v4390_v24 = vpop.eup %4389 }
 0xdc3   : > { %v1767_v25 = vmul.f32 %v4390_v24, %v1743_v30  ;;  %v4288_v30 = vld [vmem:[%s5519_s13 + $0x30] sm:$0xff]  }
 0xdc4   : > { %3921 = vmatpush3.bf16.msra.mxu0 %v4288_v30  ;;  %v3708_v30 = vld [vmem:[%s5520_s14] ss:$0 sm:$0xff] }
 0xdc5   : > { %v1776_v33 = vmul.f32 %v3680_v26, %v1767_v25  ;;  %3922 = vmatprep.subr.bf16.mxu0 %v4289_v56 }
 0xdc6   : > { %v4392_v27 = vpop.eup %4391 }
 0xdc7   : > { %v4394_v31 = vpop.eup %4393  ;;  %v1768_v34 = vmul.f32 %v4392_v27, %v1744_v59  ;;  %v1785_v38 = vadd.f32 %v3681_v35, %v1776_v33  ;;  %v1798_v59 = vld [vmem:[%s5518_s12] sm:$0x3] }
 0xdc8   : > { %v1769_v37 = vmul.f32 %v4394_v31, %v1745_v63  ;;  %3923 = vmatpush3.bf16.msra.mxu0 %v4290_v58  ;;  %v1803_v60 = vrot.slane %v1798_v59, %v4806_v29  ;;  %v1807_v62 = vrot.slane %v1798_v59, %v4811_v32 }
 0xdc9   : > { %v1777_v36 = vmul.f32 %v3680_v26, %v1768_v34 }
 0xdca   : > { %v1778_v52 = vmul.f32 %v3680_v26, %v1769_v37 }
 0xdcb   : > { %v1786_v49 = vadd.f32 %v3681_v35, %v1777_v36 }
 0xdcc   : > { %v1787_v53 = vadd.f32 %v3681_v35, %v1778_v52 }
 0xdcd   : > { %v1788_v48 = vpack.c.bf16 %v1786_v49, %v1785_v38 }
 0xdce   : > { %v1789_v40 = vpack.c.bf16 %v1787_v53, %v1787_v53 }
 0xdcf   : > { %3690 = vmatmul.mubr.msk.bf16.vlgmr.msra.gmra.mrb[32].mxu1 %vm748_vm0, %v1788_v48 }
 0xdd0   : > { %1898 = vmatprep.mubr.bf16.mxu1 %v4545_v61 }
 0xdd7   : > { %3691 = vmatmul.mubr.msk.bf16.gmra.mrb[36].mxu1 %vm748_vm0, %v1789_v40 }
 0xdd8   : > { %2293 = vmatprep.mubr.bf16.mxu1 %v4545_v61 }
 0xea2   : > { %v1890_v63 = vpop.f32.mrb[32].mxu1 }
 0xea3   : > { %v1891_v0 = vadd.f32 %v1890_v63, %v1803_v60  ;;  %v1892_v1 = vpop.f32.mrb[33].mxu1 }
 0xea4   : > { %v1893_v2 = vadd.f32 %v1892_v1, %v1807_v62  ;;  %v1894_v57 = vpop.f32.mrb[34].mxu1 }
 0xea5   : > { %v1913_v3 = vmul.f32 0.70710677, %v1891_v0  ;;  %v1895_v45 = vadd.f32 %v1894_v57, %v1803_v60  ;;  %v1896_v4 = vpop.f32.mrb[35].mxu1  ;;  %v1907_v23 = vmul.f32 0.5, %v1891_v0 }
 0xea6   : > { %v1914_v5 = vmul.f32 0.70710677, %v1893_v2  ;;  %v1897_v6 = vadd.f32 %v1896_v4, %v1807_v62  ;;  %v1908_v26 = vmul.f32 0.5, %v1893_v2 }
 0xea7   : > { %4395 = verf.f32 %v1913_v3  ;;  %v1915_v7 = vmul.f32 0.70710677, %v1895_v45  ;;  %v1909_v24 = vmul.f32 0.5, %v1895_v45 }
 0xea8   : > { %4397 = verf.f32 %v1914_v5  ;;  %v1916_v8 = vmul.f32 0.70710677, %v1897_v6  ;;  %v1910_v27 = vmul.f32 0.5, %v1897_v6 }
 0xea9   : > { %4399 = verf.f32 %v1915_v7 }
 0xeaa   : > { %4401 = verf.f32 %v1916_v8  ;;  %v1900_v9 = vpop.f32.mrb[36].mxu1 }
 0xeab   : > { %v1901_v10 = vadd.f32 %v1900_v9, %v1803_v60  ;;  %v1902_v11 = vpop.f32.mrb[37].mxu1 }
 0xeac   : > { %v1903_v12 = vadd.f32 %v1902_v11, %v1807_v62  ;;  %v1904_v13 = vpop.f32.mrb[38].mxu1 }
 0xead   : > { %v1917_v14 = vmul.f32 0.70710677, %v1901_v10  ;;  %v1905_v15 = vpop.f32.mrb[39].mxu1  ;;  %v1911_v41 = vmul.f32 0.5, %v1901_v10 }
 0xeae   : > { %v1918_v16 = vmul.f32 0.70710677, %v1903_v12  ;;  %v1912_v53 = vmul.f32 0.5, %v1903_v12 }
 0xeaf   : > { %4403 = verf.f32 %v1917_v14 }
 0xeb0   : > { %4405 = verf.f32 %v1918_v16 }
 0xeb1   : > { %v4396_v17 = vpop.eup %4395 }
 0xeb2   : > { %v4398_v18 = vpop.eup %4397  ;;  %v1925_v19 = vadd.f32 1.0, %v4396_v17 }
 0xeb3   : > { %v4400_v20 = vpop.eup %4399  ;;  %v1926_v21 = vadd.f32 1.0, %v4398_v18 }
 0xeb4   : > { %v4402_v22 = vpop.eup %4401  ;;  %v1927_v25 = vadd.f32 1.0, %v4400_v20  ;;  %v1931_v33 = vmul.f32 %v1925_v19, %v1907_v23  ;;  %v4293_v20 = vld [vmem:[%s5511_s5 + $0x44] ss:$8 sps:$4 sm:$0xff]   ;;  %v4294_v23 = vld [vmem:[%s5511_s5 + $0x50] ss:$8 sps:$4 sm:$0xff]  }
 0xeb5   : > { %v1928_v31 = vadd.f32 1.0, %v4402_v22  ;;  %v1932_v35 = vmul.f32 %v1926_v21, %v1908_v26  ;;  %v4291_v21 = vld [vmem:[%s5511_s5 + $0x40] ss:$8 sps:$4 sm:$0xff]   ;;  %2261 = vmatprep.subr.bf16.mxu1 %v4293_v20  ;;  %v4296_v22 = vld [vmem:[%s5511_s5 + $0x54] ss:$8 sps:$4 sm:$0xff]  }
 0xeb6   : > { %v1933_v34 = vmul.f32 %v1927_v25, %v1909_v24  ;;  %2262 = vmatpush1.bf16.msra.mxu1 %v4291_v21  ;;  %v4299_v24 = vld [vmem:[%s5511_s5 + $0x64] ss:$8 sps:$4 sm:$0xff]   ;;  %v4297_v25 = vld [vmem:[%s5511_s5 + $0x60] ss:$8 sps:$4 sm:$0xff]   ;;  %v4302_v26 = vld [vmem:[%s5511_s5 + $0x74] ss:$8 sps:$4 sm:$0xff]  }
 0xeb7   : > { %v1934_v36 = vmul.f32 %v1928_v31, %v1910_v27  ;;  %2263 = vmatprep.subr.bf16.mxu1 %v4296_v22  ;;  %v4300_v27 = vld [vmem:[%s5511_s5 + $0x70] ss:$8 sps:$4 sm:$0xff]  }
 0xeb8   : > { %v1937_v37 = vpack.c.bf16 %v1933_v34, %v1931_v33 }
 0xeb9   : > { %v4404_v38 = vpop.eup %4403  ;;  %v1938_v49 = vpack.c.bf16 %v1934_v36, %v1932_v35 }
 0xeba   : > { %v4406_v48 = vpop.eup %4405  ;;  %v1929_v52 = vadd.f32 1.0, %v4404_v38  ;;  %2264 = vmatpush1.bf16.msra.mxu1 %v4294_v23 }
 0xebb   : > { %v1930_v40 = vadd.f32 1.0, %v4406_v48  ;;  %2101 = vmatprep.mubr.bf16.mxu0 %v1938_v49  ;;  %2265 = vmatprep.subr.bf16.mxu1 %v4299_v24 }
 0xebc   : > { %2102 = vmatmul.mubr.bf16.vlgmr.msra.gmra.mrb[20].mxu0 %v1937_v37  ;;  %v1935_v46 = vmul.f32 %v1929_v52, %v1911_v41 }
 0xebd   : > { %v1936_v42 = vmul.f32 %v1930_v40, %v1912_v53  ;;  %v3711_v53 = vld [vmem:[%s5509_s3 + $0x1] ss:$0 sm:$0xff] }
 0xebe   : > { %v1939_v54 = vpack.c.bf16 %v1935_v46, %v1935_v46  ;;  %2266 = vmatpush1.bf16.msra.mxu1 %v4297_v25 }
 0xebf   : > { %v1940_v51 = vpack.c.bf16 %v1936_v42, %v1936_v42  ;;  %2267 = vmatprep.subr.bf16.mxu1 %v4302_v26 }
 0xec1   : > { %2109 = vmatprep.mubr.bf16.mxu0 %v1940_v51  ;;  %v3712_v51 = vld [vmem:[%s5510_s4 + $0x1] ss:$0 sm:$0xff] }
 0xec2   : > { %2268 = vmatpush1.bf16.msra.mxu1 %v4300_v27 }
 0xec4   : > { %2110 = vmatmul.mubr.bf16.gmra.mrb[24].mxu0 %v1939_v54 }
 0xf8f   : > { %v3924_v28 = vpop.f32.mrb[20].mxu0 }
 0xf90   : > { %v3925_v39 = vpop.f32.mrb[21].mxu0 }
 0xf91   : > { %v3926_v55 = vadd.f32 %v3925_v39, %v3924_v28  ;;  %v3927_v50 = vpop.f32.mrb[22].mxu0 }
 0xf92   : > { %v3928_v56 = vpop.f32.mrb[23].mxu0 }
 0xf93   : > { %v2117_v58 = vadd.f32 %v3926_v55, %v4986_v43  ;;  %v3929_v59 = vadd.f32 %v3928_v56, %v3927_v50 }
 0xf95   : > { %v5096_v60 = vadd.f32 %v3708_v30, %v2117_v58  ;;  %v2118_v62 = vadd.f32 %v3929_v59, %v4991_v47 }
 0xf97   : > { %v5099_v63 = vadd.f32 %v3708_v30, %v2118_v62  ;;  %v3930_v0 = vpop.f32.mrb[24].mxu0  ;;  %v2134_v1 = vsel %vm748_vm0, %v5096_v60, 0.0  ;;  %v3721_v62 = vld [vmem:[%s5512_s6 + $0x2] sm:$0x3] }
 0xf98   : > { %2135 = vadd.xlane.f32.xlu0 %v2134_v1  ;;  %v3931_v2 = vpop.f32.mrb[25].mxu0 }
 0xf99   : > { %v3932_v57 = vadd.f32 %v3931_v2, %v3930_v0  ;;  %v3933_v3 = vpop.f32.mrb[26].mxu0  ;;  %v2137_v45 = vsel %vm748_vm0, %v5099_v63, 0.0  ;;  %v2208_v0 = vrot.slane %v3721_v62, %v4806_v29  ;;  %v2212_v2 = vrot.slane %v3721_v62, %v4811_v32 }
 0xf9a   : > { %2138 = vadd.xlane.f32.xlu1 %v2137_v45  ;;  %v3934_v43 = vpop.f32.mrb[27].mxu0 }
 0xf9b   : > { %v2119_v4 = vadd.f32 %v3932_v57, %v4989_v44 }
 0xf9d   : > { %v5106_v5 = vadd.f32 %v3708_v30, %v2119_v4 }
 0xf9f   : > { %v2140_v47 = vsel %vm755_vm1, %v5106_v5, 0.0 }
 0xfa0   : > { %2141 = vadd.xlane.f32.xlu0 %v2140_v47 }
0x1025   : > { %v2136_v6 = vpop.xlane.xlu0 %2135 }
0x1026   : > { %v2143_v7 = vmul.f32 0.015625, %v2136_v6 }
0x1027   : > { %v2139_v8 = vpop.xlane.xlu1 %2138 }
0x1028   : > { %v2146_v9 = vsub.f32 %v5096_v60, %v2143_v7  ;;  %v2144_v10 = vmul.f32 0.015625, %v2139_v8 }
0x102a   : > { %v2147_v11 = vsub.f32 %v5099_v63, %v2144_v10  ;;  %v2149_v12 = vmul.f32 %v2146_v9, %v2146_v9 }
0x102c   : > { %v2152_v13 = vsel %vm748_vm0, %v2149_v12, 0.0  ;;  %v2150_v14 = vmul.f32 %v2147_v11, %v2147_v11 }
0x102d   : > { %2153 = vadd.xlane.f32.xlu1 %v2152_v13  ;;  %v2142_v44 = vpop.xlane.xlu0 %2141 }
0x102e   : > { %v2145_v15 = vmul.f32 0.015625, %v2142_v44  ;;  %v2155_v16 = vsel %vm748_vm0, %v2150_v14, 0.0 }
0x102f   : > { %2156 = vadd.xlane.f32.xlu0 %v2155_v16 }
0x1030   : > { %v2148_v17 = vsub.f32 %v5106_v5, %v2145_v15 }
0x1032   : > { %v2151_v18 = vmul.f32 %v2148_v17, %v2148_v17 }
0x1034   : > { %v2158_v19 = vsel %vm755_vm1, %v2151_v18, 0.0 }
0x1035   : > { %2159 = vadd.xlane.f32.xlu1 %v2158_v19 }
0x10ba   : > { %v2154_v31 = vpop.xlane.xlu1 %2153 }
0x10bb   : > { %v2161_v33 = vmul.f32 0.015625, %v2154_v31 }
0x10bc   : > { %v2157_v34 = vpop.xlane.xlu0 %2156 }
0x10bd   : > { %v2164_v35 = vadd.f32 1e-06, %v2161_v33  ;;  %v2162_v36 = vmul.f32 0.015625, %v2157_v34 }
0x10bf   : > { %4407 = vrsqrt.f32 %v2164_v35  ;;  %v2165_v37 = vadd.f32 1e-06, %v2162_v36 }
0x10c1   : > { %4409 = vrsqrt.f32 %v2165_v37 }
0x10c2   : > { %v2160_v38 = vpop.xlane.xlu1 %2159 }
0x10c3   : > { %v2163_v49 = vmul.f32 0.015625, %v2160_v38 }
0x10c5   : > { %v2166_v48 = vadd.f32 1e-06, %v2163_v49 }
0x10c7   : > { %4411 = vrsqrt.f32 %v2166_v48 }
0x10c9   : > { %v4408_v52 = vpop.eup %4407 }
0x10ca   : > { %v2170_v40 = vmul.f32 %v4408_v52, %v2146_v9 }
0x10cb   : > { %v4410_v41 = vpop.eup %4409 }
0x10cc   : > { %v2179_v42 = vmul.f32 %v3711_v53, %v2170_v40  ;;  %v2171_v46 = vmul.f32 %v4410_v41, %v2147_v11 }
0x10ce   : > { %v2180_v54 = vmul.f32 %v3711_v53, %v2171_v46  ;;  %v2188_v28 = vadd.f32 %v3712_v51, %v2179_v42 }
0x10d0   : > { %v2189_v39 = vadd.f32 %v3712_v51, %v2180_v54 }
0x10d1   : > { %v4412_v55 = vpop.eup %4411 }
0x10d2   : > { %v2191_v50 = vpack.c.bf16 %v2189_v39, %v2188_v28  ;;  %v2172_v30 = vmul.f32 %v4412_v55, %v2148_v17 }
0x10d4   : > { %3730 = vmatmul.mubr.msk.bf16.vlgmr.msra.gmra.mrb[40].mxu1 %vm748_vm0, %v2191_v50  ;;  %v2181_v56 = vmul.f32 %v3711_v53, %v2172_v30 }
0x10d5   : > { %2303 = vmatprep.mubr.bf16.mxu1 %v4545_v61 }
0x10d6   : > { %v2190_v58 = vadd.f32 %v3712_v51, %v2181_v56 }
0x10d8   : > { %v2192_v59 = vpack.c.bf16 %v2190_v58, %v2190_v58 }
0x10dc   : > { %3731 = vmatmul.mubr.msk.bf16.gmra.mrb[44].mxu1 %vm748_vm0, %v2192_v59 }
0x11a7   : > { %v2295_v1 = vpop.f32.mrb[40].mxu1 }
0x11a8   : > { %v2297_v57 = vpop.f32.mrb[41].mxu1  ;;  %v2296_v45 = vadd.f32 %v2295_v1, %v2208_v0 }
0x11a9   : > { %v2299_v3 = vpop.f32.mrb[42].mxu1  ;;  %v2298_v47 = vadd.f32 %v2297_v57, %v2212_v2 }
0x11aa   : > { %v2300_v43 = vadd.f32 %v2299_v3, %v2208_v0  ;;  %v2301_v4 = vpop.f32.mrb[43].mxu1 }
0x11ab   : > { %v2302_v6 = vadd.f32 %v2301_v4, %v2212_v2 }
0x11ac   : > { %v5154_v7 = vpack.c.bf16 %v2300_v43, %v2296_v45 }
0x11ad   : > { %v5156_v8 = vpack.c.bf16 %v2302_v6, %v2298_v47 }
0x11ae   : > { %2480 = vrot.lane.b32.xlu1 %v5154_v7, %s4547_s20  ;;  %2318 = vrot.lane.b32.xlu0 %v5154_v7, %s4546_s29 }
0x11af   : > { %4082 = vmatprep.mubr.msk.bf16.mxu1 %vm937_vm2, %v5154_v7  ;;  %v2305_v9 = vpop.f32.mrb[44].mxu1 }
0x11b0   : > { %v2306_v10 = vadd.f32 %v2305_v9, %v2208_v0  ;;  %v2307_v11 = vpop.f32.mrb[45].mxu1 }
0x11b1   : > { %v2309_v12 = vpop.f32.mrb[46].mxu1  ;;  %v2308_v23 = vadd.f32 %v2307_v11, %v2212_v2 }
0x11b2   : > { %v5164_v13 = vpack.c.bf16 %v2306_v10, %v2306_v10  ;;  %2476 = vrot.lane.b32.xlu0 %v5154_v7, %s4548_s19  ;;  %v2310_v14 = vpop.f32.mrb[47].mxu1 }
0x11b3   : > { %v5193_v26 = vpack.c.bf16 %v2308_v23, %v2308_v23 }
0x11b4   : > { %2320 = vrot.lane.b32.xlu1 %v5164_v13, %s4546_s29  ;;  %s5556_s29 = smov 16  }
0x11b5   : > { %v2424_v34 = vsel %vm1041_vm3, %v5193_v26, 0 }
0x11b6   : > { %2478 = vrot.lane.b32.xlu0 %v5164_v13, %s4548_s19 }
0x11b8   : > { %2482 = vrot.lane.b32.xlu1 %v5164_v13, %s4547_s20 }
0x11ba   : > { %2645 = vrot.lane.b32.xlu0 %v5154_v7, %s4550_s30 }
0x11bc   : > { %2649 = vrot.lane.b32.xlu1 %v5154_v7, %s5555_s18 }
0x11c0   : > { %2651 = vrot.lane.b32.xlu1 %v5164_v13, %s5555_s18 }
0x11c4   : > { %2647 = vrot.lane.b32.xlu1 %v5164_v13, %s4550_s30 }
0x1220   : > { %v2319_v44 = vpop.permute.xlu0 %2318  ;;  %v2481_v15 = vpop.permute.xlu1 %2480 }
0x1221   : > { %v2329_v16 = vsel %vm937_vm2, %v2319_v44, 0  ;;  %v2491_v17 = vsel %vm937_vm2, %v2481_v15, 0  ;;  %4166 = vmatprep.subr.msk.bf16.mxu1 %vm937_vm2, %v2319_v44  ;;  %4169 = vmatprep.subr.msk.bf16.mxu0 %vm937_vm2, %v2481_v15 }
0x1222   : > { %4079 = vmatpush3.bf16.xpose.msra.mxu1 %v2329_v16  ;;  %4095 = vmatpush3.bf16.xpose.msra.mxu0 %v2491_v17 }
0x1224   : > { %v2477_v18 = vpop.permute.xlu0 %2476 }
0x1225   : > { %4098 = vmatprep.mubr.msk.bf16.mxu0 %vm937_vm2, %v2477_v18 }
0x1226   : > { %v2321_v19 = vpop.permute.xlu1 %2320 }
0x1227   : > { %4167 = vmatprep.subr.msk.bf16.mxu1 %vm937_vm2, %v2321_v19  ;;  %v2332_v20 = vsel %vm937_vm2, %v2321_v19, 0 }
0x1228   : > { %v2479_v24 = vpop.permute.xlu0 %2478 }
0x122a   : > { %4081 = vmatpush3.bf16.xpose.msra.mxu1 %v2332_v20  ;;  %v2483_v21 = vpop.permute.xlu1 %2482 }
0x122b   : > { %v2494_v22 = vsel %vm937_vm2, %v2483_v21, 0  ;;  %4086 = vmatprep.subr.bf16.mxu1 %v5156_v8  ;;  %4170 = vmatprep.subr.msk.bf16.mxu0 %vm937_vm2, %v2483_v21 }
0x122c   : > { %4097 = vmatpush3.bf16.xpose.msra.mxu0 %v2494_v22  ;;  %v2646_v27 = vpop.permute.xlu0 %2645 }
0x122e   : > { %v2650_v25 = vpop.permute.xlu1 %2649 }
0x122f   : > { %4172 = vmatprep.subr.msk.bf16.mxu0 %vm937_vm2, %v2650_v25  ;;  %v2660_v31 = vsel %vm937_vm2, %v2650_v25, 0 }
0x1231   : > { %4083 = vmatmul.mubr.msk.bf16.vlgmr.msra.gmra.mrb[48].mxu1 %vm937_vm2, %v5164_v13 }
0x1232   : > { %4087 = vmatpush3.bf16.msra.mxu1 %v5156_v8  ;;  %v2652_v33 = vpop.permute.xlu1 %2651 }
0x1233   : > { %4168 = vmatprep.subr.msk.bf16.mxu1 %vm1041_vm3, %v5193_v26  ;;  %4099 = vmatmul.mubr.msk.bf16.vlgmr.msra.gmra.mrb[28].mxu0 %vm937_vm2, %v2479_v24  ;;  %v2663_v35 = vsel %vm937_vm2, %v2652_v33, 0 }
0x1234   : > { %4111 = vmatpush3.bf16.xpose.msra.mxu0 %v2660_v31  ;;  %4114 = vmatprep.mubr.msk.bf16.mxu0 %vm937_vm2, %v2646_v27 }
0x1235   : > { %4173 = vmatprep.subr.msk.bf16.mxu0 %vm937_vm2, %v2652_v33 }
0x1236   : > { %4089 = vmatpush3.bf16.msra.mxu1 %v2424_v34  ;;  %v2648_v36 = vpop.permute.xlu1 %2647 }
0x123c   : > { %4113 = vmatpush3.bf16.xpose.msra.mxu0 %v2663_v35 }
0x1243   : > { %4115 = vmatmul.mubr.msk.bf16.vlgmr.msra.gmra.mrb[32].mxu0 %vm937_vm2, %v2648_v36 }
0x1304   : > { %v4084_v37 = vpop.f32.mrb[48].mxu1 }
0x1305   : > { %v2368_v38 = vpop.f32.mrb[49].mxu1  ;;  %v2388_v51 = vsel %vm1005_vm5, %v4084_v37, -inf }
0x1306   : > { %v4085_v49 = vpop.f32.mrb[50].mxu1  ;;  %v4100_v48 = vpop.f32.mrb[28].mxu0  ;;  %v2382_v52 = vsel %vm998_vm4, %v2368_v38, -inf }
0x1307   : > { %2383 = vmax.xlane.f32.xlu0 %v2382_v52  ;;  %v2371_v53 = vpop.f32.mrb[51].mxu1  ;;  %v2530_v40 = vpop.f32.mrb[29].mxu0  ;;  %v2550_v54 = vsel %vm1005_vm5, %v4100_v48, -inf }
0x1308   : > { %v4101_v41 = vpop.f32.mrb[30].mxu0  ;;  %v2385_v42 = vsel %vm998_vm4, %v2371_v53, -inf  ;;  %v2544_v28 = vsel %vm998_vm4, %v2530_v40, -inf }
0x1309   : > { %2386 = vmax.xlane.f32.xlu1 %v2385_v42  ;;  %v5210_v46 = vpop.f32.mrb[31].mxu0 }
0x130a   : > { %v2547_v39 = vsel %vm998_vm4, %v5210_v46, -inf }
0x130b   : > { %2389 = vmax.xlane.f32.xlu0 %v2388_v51 }
0x130d   : > { %2551 = vmax.xlane.f32.xlu1 %v2550_v54 }
0x130f   : > { %2545 = vmax.xlane.f32.xlu0 %v2544_v28 }
0x1313   : > { %2548 = vmax.xlane.f32.xlu0 %v2547_v39 }
0x1316   : > { %v4116_v55 = vpop.f32.mrb[32].mxu0 }
0x1317   : > { %v2699_v50 = vpop.f32.mrb[33].mxu0  ;;  %v2719_v62 = vsel %vm1005_vm5, %v4116_v55, -inf }
0x1318   : > { %v4117_v30 = vpop.f32.mrb[34].mxu0  ;;  %v2713_v56 = vsel %vm998_vm4, %v2699_v50, -inf }
0x1319   : > { %2714 = vmax.xlane.f32.xlu0 %v2713_v56  ;;  %v2702_v58 = vpop.f32.mrb[35].mxu0 }
0x131a   : > { %v2716_v59 = vsel %vm998_vm4, %v2702_v58, -inf }
0x131b   : > { %2717 = vmax.xlane.f32.xlu1 %v2716_v59 }
0x131d   : > { %2720 = vmax.xlane.f32.xlu0 %v2719_v62 }
0x1394   : > { %v2384_v0 = vpop.xlane.xlu0 %2383 }
0x1395   : > { %v2391_v1 = vsub.f32 %v2368_v38, %v2384_v0 }
0x1396   : > { %v2387_v2 = vpop.xlane.xlu1 %2386 }
0x1397   : > { %v2394_v45 = vmul.f32 1.442695, %v2391_v1  ;;  %v2392_v9 = vsub.f32 %v2371_v53, %v2387_v2 }
0x1398   : > { %v2390_v57 = vpop.xlane.xlu0 %2389 }
0x1399   : > { %v2393_v3 = vsub.f32 %v4084_v37, %v2390_v57  ;;  %v2396_v14 = vmul.f32 1.442695, %v2392_v9 }
0x139a   : > { %v2552_v43 = vpop.xlane.xlu1 %2551 }
0x139b   : > { %v2398_v4 = vmul.f32 1.442695, %v2393_v3  ;;  %v2555_v47 = vsub.f32 %v4100_v48, %v2552_v43 }
0x139c   : > { %v2546_v6 = vpop.xlane.xlu0 %2545 }
0x139d   : > { %4413 = vpow2.f32 %v2398_v4  ;;  %v2560_v10 = vmul.f32 1.442695, %v2555_v47  ;;  %v2553_v11 = vsub.f32 %v2530_v40, %v2546_v6 }
0x139e   : > { %4415 = vpow2.f32 %v2394_v45 }
0x139f   : > { %4417 = vpow2.f32 %v2560_v10  ;;  %v2556_v12 = vmul.f32 1.442695, %v2553_v11 }
0x13a0   : > { %v2549_v24 = vpop.xlane.xlu0 %2548 }
0x13a1   : > { %4419 = vpow2.f32 %v2556_v12  ;;  %v2554_v31 = vsub.f32 %v5210_v46, %v2549_v24 }
0x13a2   : > { %4421 = vpow2.f32 %v2396_v14 }
0x13a3   : > { %v2558_v35 = vmul.f32 1.442695, %v2554_v31 }
0x13a5   : > { %4423 = vpow2.f32 %v2558_v35 }
0x13a6   : > { %v2715_v25 = vpop.xlane.xlu0 %2714 }
0x13a7   : > { %v5220_v44 = vpop.eup %4413  ;;  %v2722_v38 = vsub.f32 %v2699_v50, %v2715_v25 }
0x13a8   : > { %v5222_v15 = vpop.eup %4415  ;;  %v2406_v16 = vsel %vm1005_vm5, %v5220_v44, 0.0  ;;  %v2718_v27 = vpop.xlane.xlu1 %2717 }
0x13a9   : > { %v5226_v17 = vpop.eup %4417  ;;  %2407 = vadd.xlane.f32.xlu1 %v2406_v16  ;;  %v2400_v20 = vsel %vm998_vm4, %v5222_v15, 0.0  ;;  %v2723_v34 = vsub.f32 %v2702_v58, %v2718_v27  ;;  %v2725_v48 = vmul.f32 1.442695, %v2722_v38 }
0x13aa   : > { %v2568_v18 = vsel %vm1005_vm5, %v5226_v17, 0.0  ;;  %v2721_v33 = vpop.xlane.xlu0 %2720 }
0x13ab   : > { %v5230_v19 = vpop.eup %4419  ;;  %2569 = vadd.xlane.f32.xlu0 %v2568_v18  ;;  %v2724_v36 = vsub.f32 %v4116_v55, %v2721_v33  ;;  %v2727_v37 = vmul.f32 1.442695, %v2723_v34 }
0x13ac   : > { %v2562_v21 = vsel %vm998_vm4, %v5230_v19, 0.0  ;;  %v4422_v22 = vpop.eup %4421 }
0x13ad   : > { %2401 = vadd.xlane.f32.xlu1 %v2400_v20  ;;  %v2403_v23 = vsel %vm998_vm4, %v4422_v22, 0.0  ;;  %v2729_v49 = vmul.f32 1.442695, %v2724_v36  ;;  %4425 = vpow2.f32 %v2727_v37 }
0x13af   : > { %2563 = vadd.xlane.f32.xlu0 %v2562_v21  ;;  %4427 = vpow2.f32 %v2729_v49  ;;  %v4424_v52 = vpop.eup %4423 }
0x13b0   : > { %4429 = vpow2.f32 %v2725_v48  ;;  %v2565_v40 = vsel %vm998_vm4, %v4424_v52, 0.0 }
0x13b3   : > { %2404 = vadd.xlane.f32.xlu0 %v2403_v23 }
0x13b7   : > { %v5244_v53 = vpop.eup %4425 }
0x13b8   : > { %v2734_v42 = vsel %vm998_vm4, %v5244_v53, 0.0 }
0x13b9   : > { %v5247_v41 = vpop.eup %4427 }
0x13ba   : > { %v2737_v46 = vsel %vm1005_vm5, %v5247_v41, 0.0  ;;  %v5253_v51 = vpop.eup %4429 }
0x13bb   : > { %v2731_v54 = vsel %vm998_vm4, %v5253_v51, 0.0 }
0x13be   : > { %2583 = vrot.lane.b32.xlu1 %v5193_v26, %s4548_s19 }
0x13c2   : > { %2748 = vrot.lane.b32.xlu1 %v5156_v8, %s4550_s30 }
0x13c9   : > { %2581 = vrot.lane.b32.xlu0 %v5156_v8, %s4548_s19  ;;  %s5557_s19 = smov 80  }
0x13e6   : > { %2566 = vadd.xlane.f32.xlu1 %v2565_v40 }
0x13e8   : > { %2735 = vadd.xlane.f32.xlu0 %v2734_v42 }
0x13ea   : > { %2738 = vadd.xlane.f32.xlu1 %v2737_v46 }
0x13ee   : > { %2732 = vadd.xlane.f32.xlu1 %v2731_v54 }
0x13fe   : > { %2816 = vrot.lane.b32.xlu0 %v5154_v7, %s5556_s29 }
0x13ff   : > { %2750 = vrot.lane.b32.xlu1 %v5193_v26, %s4550_s30  ;;  %s5558_s30 = sld [smem:[#allocation14_spill]] }
0x1402   : > { %2812 = vrot.lane.b32.xlu0 %v5154_v7, %s5557_s19 }
0x1403   : > { %2818 = vrot.lane.b32.xlu1 %v5164_v13, %s5556_s29 }
0x1407   : > { %2814 = vrot.lane.b32.xlu1 %v5164_v13, %s5557_s19 }
0x1436   : > { %v2408_v28 = vpop.xlane.xlu1 %2407 }
0x1437   : > { %4431 = vrcp.f32 %v2408_v28 }
0x1438   : > { %v2570_v39 = vpop.xlane.xlu0 %2569 }
0x143a   : > { %v2402_v55 = vpop.xlane.xlu1 %2401 }
0x143b   : > { %4433 = vrcp.f32 %v2402_v55 }
0x143c   : > { %v2564_v50 = vpop.xlane.xlu0 %2563 }
0x143e   : > { %v2584_v57 = vpop.permute.xlu1 %2583 }
0x143f   : > { %v2593_v3 = vsel %vm1041_vm3, %v2584_v57, 0 }
0x1440   : > { %v2405_v30 = vpop.xlane.xlu0 %2404 }
0x1441   : > { %4435 = vrcp.f32 %v2405_v30  ;;  %v4432_v58 = vpop.eup %4431 }
0x1442   : > { %v2414_v7 = vmul.f32 %v4432_v58, %v5220_v44  ;;  %v2749_v45 = vpop.permute.xlu1 %2748  ;;  %4437 = vrcp.f32 %v2570_v39 }
0x1443   : > { %4439 = vrcp.f32 %v2564_v50 }
0x1444   : > { %v2582_v56 = vpop.permute.xlu0 %2581  ;;  %v2416_v13 = vpack.c.bf16 %v2414_v7, %v2414_v7 }
0x1445   : > { %4102 = vmatprep.subr.bf16.mxu1 %v2582_v56  ;;  %v4434_v59 = vpop.eup %4433 }
0x1446   : > { %v2412_v0 = vmul.f32 %v4434_v59, %v5222_v15 }
0x144b   : > { %v4436_v62 = vpop.eup %4435 }
0x144c   : > { %v2413_v1 = vmul.f32 %v4436_v62, %v4422_v22  ;;  %v4438_v6 = vpop.eup %4437 }
0x144d   : > { %v4440_v10 = vpop.eup %4439  ;;  %v2576_v12 = vmul.f32 %v4438_v6, %v5226_v17 }
0x144e   : > { %v2415_v2 = vpack.c.bf16 %v2413_v1, %v2412_v0  ;;  %v2574_v14 = vmul.f32 %v4440_v10, %v5230_v19 }
0x144f   : > { %v2578_v16 = vpack.c.bf16 %v2576_v12, %v2576_v12 }
0x1450   : > { %4090 = vmatprep.mubr.msk.bf16.mxu1 %vm998_vm4, %v2415_v2 }
0x1451   : > { %4091 = vmatmul.mubr.msk.bf16.vlgmr.msra.gmra.mrb[52].mxu1 %vm998_vm4, %v2416_v13 }
0x1452   : > { %4103 = vmatpush3.bf16.msra.mxu1 %v2582_v56 }
0x1453   : > { %4171 = vmatprep.subr.msk.bf16.mxu1 %vm1041_vm3, %v2584_v57 }
0x1456   : > { %4105 = vmatpush3.bf16.msra.mxu1 %v2593_v3 }
0x1457   : > { %4118 = vmatprep.subr.bf16.mxu1 %v2749_v45 }
0x1473   : > { %v2567_v43 = vpop.xlane.xlu1 %2566 }
0x1474   : > { %4441 = vrcp.f32 %v2567_v43 }
0x1475   : > { %v2736_v4 = vpop.xlane.xlu0 %2735 }
0x1477   : > { %v2739_v47 = vpop.xlane.xlu1 %2738 }
0x1478   : > { %4443 = vrcp.f32 %v2739_v47 }
0x1479   : > { %4445 = vrcp.f32 %v2736_v4  ;;  %v2817_v24 = vpop.permute.xlu0 %2816 }
0x147a   : > { %v2827_v34 = vsel %vm937_vm2, %v2817_v24, 0 }
0x147b   : > { %v2733_v9 = vpop.xlane.xlu1 %2732 }
0x147c   : > { %4447 = vrcp.f32 %v2733_v9 }
0x147d   : > { %v2813_v33 = vpop.permute.xlu0 %2812 }
0x147e   : > { %v4442_v11 = vpop.eup %4441 }
0x147f   : > { %v2575_v44 = vmul.f32 %v4442_v11, %v4424_v52  ;;  %v2751_v21 = vpop.permute.xlu1 %2750 }
0x1480   : > { %v2760_v25 = vsel %vm1041_vm3, %v2751_v21, 0 }
0x1481   : > { %v2577_v15 = vpack.c.bf16 %v2575_v44, %v2574_v14 }
0x1482   : > { %v4444_v18 = vpop.eup %4443 }
0x1483   : > { %4106 = vmatprep.mubr.msk.bf16.mxu1 %vm998_vm4, %v2577_v15  ;;  %v4446_v20 = vpop.eup %4445  ;;  %v2745_v23 = vmul.f32 %v4444_v18, %v5247_v41  ;;  %v2819_v35 = vpop.permute.xlu1 %2818 }
0x1484   : > { %4107 = vmatmul.mubr.msk.bf16.vlgmr.msra.gmra.mrb[56].mxu1 %vm998_vm4, %v2578_v16  ;;  %v2744_v19 = vmul.f32 %v4446_v20, %v5244_v53  ;;  %v2830_v36 = vsel %vm937_vm2, %v2819_v35, 0 }
0x1485   : > { %4119 = vmatpush3.bf16.msra.mxu1 %v2749_v45  ;;  %v2747_v31 = vpack.c.bf16 %v2745_v23, %v2745_v23 }
0x1486   : > { %v4448_v22 = vpop.eup %4447  ;;  %4174 = vmatprep.subr.msk.bf16.mxu1 %vm1041_vm3, %v2751_v21 }
0x1487   : > { %v2743_v17 = vmul.f32 %v4448_v22, %v5253_v51  ;;  %v2815_v37 = vpop.permute.xlu1 %2814 }
0x1489   : > { %4121 = vmatpush3.bf16.msra.mxu1 %v2760_v25  ;;  %v2746_v27 = vpack.c.bf16 %v2744_v19, %v2743_v17 }
0x148a   : > { %4175 = vmatprep.subr.msk.bf16.mxu1 %vm937_vm2, %v2817_v24 }
0x148b   : > { %4122 = vmatprep.mubr.msk.bf16.mxu1 %vm998_vm4, %v2746_v27 }
0x148c   : > { %4123 = vmatmul.mubr.msk.bf16.vlgmr.msra.gmra.mrb[60].mxu1 %vm998_vm4, %v2747_v31 }
0x148d   : > { %4130 = vmatprep.mubr.msk.bf16.mxu1 %vm937_vm2, %v2813_v33  ;;  %v4303_v33 = vld [vmem:[%s5513_s7 + $0x20] sm:$0xff]  }
0x1492   : > { %4127 = vmatpush3.bf16.xpose.msra.mxu1 %v2827_v34  ;;  %v4304_v34 = vld [vmem:[%s5513_s7 + $0x28] sm:$0xff]  }
0x1493   : > { %4176 = vmatprep.subr.msk.bf16.mxu1 %vm937_vm2, %v2819_v35  ;;  %v4305_v35 = vld [vmem:[%s5513_s7 + $0x30] sm:$0xff]  }
0x149a   : > { %4129 = vmatpush3.bf16.xpose.msra.mxu1 %v2830_v36  ;;  %v4306_v36 = vld [vmem:[%s5513_s7 + $0x38] sm:$0xff]  }
0x14a1   : > { %4131 = vmatmul.mubr.msk.bf16.vlgmr.msra.gmra.mrb[64].mxu1 %vm937_vm2, %v2815_v37 }
0x14a2   : > { %3273 = vmatprep.mubr.bf16.mxu1 %v4545_v61 }
0x1524   : > { %v5291_v38 = vpop.f32.mrb[52].mxu1 }
0x1525   : > { %v5293_v49 = vpop.f32.mrb[53].mxu1 }
0x1526   : > { %v4093_v48 = vpop.f32.mrb[54].mxu1 }
0x1527   : > { %v5295_v52 = vpop.f32.mrb[55].mxu1 }
0x1528   : > { %v2474_v53 = vpack.c.bf16 %v5295_v52, %v5293_v49 }
0x1557   : > { %v4108_v40 = vpop.f32.mrb[56].mxu1 }
0x1558   : > { %v2629_v41 = vpop.f32.mrb[57].mxu1  ;;  %v2644_v44 = vpack.c.bf16 %v4108_v40, %v4108_v40 }
0x1559   : > { %v4109_v42 = vpop.f32.mrb[58].mxu1 }
0x155a   : > { %v2632_v46 = vpop.f32.mrb[59].mxu1 }
0x155b   : > { %v2643_v51 = vpack.c.bf16 %v2632_v46, %v2629_v41 }
0x155f   : > { %v4124_v54 = vpop.f32.mrb[60].mxu1 }
0x1560   : > { %v2796_v28 = vpop.f32.mrb[61].mxu1  ;;  %v2811_v15 = vpack.c.bf16 %v4124_v54, %v4124_v54 }
0x1561   : > { %v4125_v39 = vpop.f32.mrb[62].mxu1 }
0x1562   : > { %v2799_v55 = vpop.f32.mrb[63].mxu1 }
0x1563   : > { %v2810_v50 = vpack.c.bf16 %v2799_v55, %v2796_v28 }
0x1574   : > { %v4132_v30 = vpop.f32.mrb[64].mxu1 }
0x1575   : > { %v2866_v56 = vpop.f32.mrb[65].mxu1  ;;  %v2886_v0 = vsel %vm1005_vm5, %v4132_v30, -inf }
0x1576   : > { %v4133_v58 = vpop.f32.mrb[66].mxu1  ;;  %v2880_v59 = vsel %vm998_vm4, %v2866_v56, -inf }
0x1577   : > { %2881 = vmax.xlane.f32.xlu0 %v2880_v59  ;;  %v2869_v62 = vpop.f32.mrb[67].mxu1 }
0x1578   : > { %v2883_v7 = vsel %vm998_vm4, %v2869_v62, -inf }
0x1579   : > { %2884 = vmax.xlane.f32.xlu1 %v2883_v7 }
0x157b   : > { %2887 = vmax.xlane.f32.xlu0 %v2886_v0 }
0x1604   : > { %v2882_v1 = vpop.xlane.xlu0 %2881 }
0x1605   : > { %v2889_v2 = vsub.f32 %v2866_v56, %v2882_v1 }
0x1606   : > { %v2885_v13 = vpop.xlane.xlu1 %2884 }
0x1607   : > { %v2892_v57 = vmul.f32 1.442695, %v2889_v2  ;;  %v2890_v3 = vsub.f32 %v2869_v62, %v2885_v13 }
0x1608   : > { %v2888_v45 = vpop.xlane.xlu0 %2887 }
0x1609   : > { %4449 = vpow2.f32 %v2892_v57  ;;  %v2894_v43 = vmul.f32 1.442695, %v2890_v3  ;;  %v2891_v4 = vsub.f32 %v4132_v30, %v2888_v45 }
0x160b   : > { %4451 = vpow2.f32 %v2894_v43  ;;  %v2896_v47 = vmul.f32 1.442695, %v2891_v4 }
0x160d   : > { %4453 = vpow2.f32 %v2896_v47 }
0x1613   : > { %v4450_v6 = vpop.eup %4449 }
0x1614   : > { %v2898_v9 = vsel %vm998_vm4, %v4450_v6, 0.0 }
0x1615   : > { %v4452_v10 = vpop.eup %4451  ;;  %2899 = vadd.xlane.f32.xlu0 %v2898_v9 }
0x1616   : > { %v2901_v14 = vsel %vm998_vm4, %v4452_v10, 0.0 }
0x1617   : > { %v4454_v11 = vpop.eup %4453 }
0x1618   : > { %v2904_v12 = vsel %vm1005_vm5, %v4454_v11, 0.0 }
0x1619   : > { %2905 = vadd.xlane.f32.xlu1 %v2904_v12  ;;  %2902 = vadd.xlane.f32.xlu0 %v2901_v14 }
0x162a   : > { %2917 = vrot.lane.b32.xlu1 %v5193_v26, %s5557_s19 }
0x162e   : > { %2981 = vrot.lane.b32.xlu1 %v2643_v51, %s5556_s29 }
0x162f   : > { %2915 = vrot.lane.b32.xlu0 %v5156_v8, %s5557_s19 }
0x1632   : > { %2983 = vrot.lane.b32.xlu1 %v2644_v44, %s5556_s29  ;;  %s4485_s29 = sshll.u32 %s4553_s28, 4  ;;  %s4486_s29 = int_to_ptr.vmem [resolvable:$false] %s4485_s29 }
0x1633   : > { %2987 = vrot.lane.b32.xlu0 %v2810_v50, %s5555_s18  ;;  %v2475_v50 = vpack.c.bf16 %v5291_v38, %v5291_v38  ;;  %v3763_v38 = vld [vmem:[%s5514_s8 + $0x1] ss:$0 sm:$0xff]  ;;  %s4487_s19 = scalar_lea.vmem %s4486_s29, 32  ;;  %p4488_p0 = scmp.lt.s32.totalorder %s5466_s27, %s4486_s29 }
0x1636   : > { %2989 = vrot.lane.b32.xlu1 %v2811_v15, %s5555_s18  ;;  %s4481_s18 = scalar_lea.vmem %s5466_s27, 16 }
0x1637   : > { %p4482_p11 = scmp.ne.s32.totalorder %s5466_s27, %s4481_s18  ;;  %p4489_p1 = scmp.lt.s32.totalorder %s4487_s19, %s4481_s18 }
0x1639   : > { %p4483_p12 = pnand %p4482_p11, %p4682_p5  ;;  %p4490_p2 = por %p4489_p1, %p4488_p0 }
0x163b   : > { %p4484_p13 = pneg %p4483_p12 }
0x163d   : > { %p4491_p3 = pnand %p4490_p2, %p4484_p13 }
0x16a2   : > { %v2900_v16 = vpop.xlane.xlu0 %2899 }
0x16a3   : > { %4455 = vrcp.f32 %v2900_v16  ;;  %v4309_v16 = vld [vmem:[%s5517_s11 + $0x44] ss:$8 sps:$4 sm:$0xff]  }
0x16a4   : > { %3241 = vmatprep.subr.bf16.mxu1 %v4309_v16 }
0x16a6   : > { %v2903_v18 = vpop.xlane.xlu0 %2902  ;;  %v2906_v20 = vpop.xlane.xlu1 %2905 }
0x16a7   : > { %4457 = vrcp.f32 %v2903_v18  ;;  %v4307_v18 = vld [vmem:[%s5517_s11 + $0x40] ss:$8 sps:$4 sm:$0xff]  }
0x16a8   : > { %4459 = vrcp.f32 %v2906_v20  ;;  %3242 = vmatpush1.bf16.msra.mxu1 %v4307_v18  ;;  %v4312_v20 = vld [vmem:[%s5517_s11 + $0x54] ss:$8 sps:$4 sm:$0xff]  }
0x16a9   : > { %3243 = vmatprep.subr.bf16.mxu1 %v4312_v20 }
0x16aa   : > { %v2916_v26 = vpop.permute.xlu0 %2915  ;;  %v2918_v21 = vpop.permute.xlu1 %2917 }
0x16ab   : > { %4134 = vmatprep.subr.bf16.mxu0 %v2916_v26  ;;  %v2927_v22 = vsel %vm1041_vm3, %v2918_v21, 0 }
0x16ac   : > { %4135 = vmatpush3.bf16.msra.mxu0 %v2916_v26  ;;  %v4310_v26 = vld [vmem:[%s5517_s11 + $0x50] ss:$8 sps:$4 sm:$0xff]  }
0x16ad   : > { %4177 = vmatprep.subr.msk.bf16.mxu0 %vm1041_vm3, %v2918_v21  ;;  %v4456_v8 = vpop.eup %4455  ;;  %3244 = vmatpush1.bf16.msra.mxu1 %v4310_v26  ;;  %v4315_v21 = vld [vmem:[%s5517_s11 + $0x64] ss:$8 sps:$4 sm:$0xff]  }
0x16ae   : > { %v2910_v17 = vmul.f32 %v4456_v8, %v4450_v6  ;;  %v2982_v51 = vpop.permute.xlu1 %2981  ;;  %v2988_v39 = vpop.permute.xlu0 %2987  ;;  %v4313_v8 = vld [vmem:[%s5517_s11 + $0x60] ss:$8 sps:$4 sm:$0xff]   ;;  %3245 = vmatprep.subr.bf16.mxu1 %v4315_v21 }
0x16af   : > { %v2999_v55 = vsel %vm937_vm2, %v2474_v53, %v2982_v51 }
0x16b0   : > { %4137 = vmatpush3.bf16.msra.mxu0 %v2927_v22  ;;  %v3004_v59 = vsel %vm1622_vm6, %v2999_v55, %v2988_v39  ;;  %v4316_v22 = vld [vmem:[%s5517_s11 + $0x70] ss:$8 sps:$4 sm:$0xff]  }
0x16b1   : > { %v4458_v23 = vpop.eup %4457  ;;  %4142 = vmatprep.subr.bf16.mxu0 %v4303_v33  ;;  %3246 = vmatpush1.bf16.msra.mxu1 %v4313_v8 }
0x16b2   : > { %v4460_v24 = vpop.eup %4459  ;;  %v2911_v19 = vmul.f32 %v4458_v23, %v4452_v10  ;;  %v2984_v54 = vpop.permute.xlu1 %2983  ;;  %v4318_v23 = vld [vmem:[%s5517_s11 + $0x74] ss:$8 sps:$4 sm:$0xff]  }
0x16b3   : > { %v2912_v25 = vmul.f32 %v4460_v24, %v4454_v11  ;;  %v3002_v56 = vsel %vm937_vm2, %v2475_v50, %v2984_v54  ;;  %3247 = vmatprep.subr.bf16.mxu1 %v4318_v23  ;;  %v3767_v54 = vld [vmem:[%s5516_s10 + $0x1] ss:$0 sm:$0xff] }
0x16b4   : > { %v2913_v27 = vpack.c.bf16 %v2911_v19, %v2910_v17 }
0x16b5   : > { %v2914_v31 = vpack.c.bf16 %v2912_v25, %v2912_v25  ;;  %3248 = vmatpush1.bf16.msra.mxu1 %v4316_v22 }
0x16b6   : > { %4138 = vmatprep.mubr.msk.bf16.mxu0 %vm998_vm4, %v2913_v27  ;;  %v2990_v28 = vpop.permute.xlu1 %2989 }
0x16b7   : > { %4139 = vmatmul.mubr.msk.bf16.vlgmr.msra.gmra.mrb[36].mxu0 %vm998_vm4, %v2914_v31  ;;  %v3006_v62 = vsel %vm1622_vm6, %v3002_v56, %v2990_v28  ;;  %v4320_v56 = vld [vmem:[%s5519_s13 + $0x80] sm:$0xff]  }
0x16b8   : > { %4143 = vmatpush3.bf16.msra.mxu0 %v4303_v33 }
0x16b9   : > { %4144 = vmatprep.subr.bf16.mxu0 %v4304_v34 }
0x16bc   : > { %4145 = vmatpush3.bf16.msra.mxu0 %v4304_v34 }
0x16bd   : > { %4146 = vmatprep.subr.bf16.mxu0 %v4305_v35 }
0x16c0   : > { %4147 = vmatpush3.bf16.msra.mxu0 %v4305_v35 }
0x16c1   : > { %4148 = vmatprep.subr.bf16.mxu0 %v4306_v36 }
0x16c4   : > { %4149 = vmatpush3.bf16.msra.mxu0 %v4306_v36 }
0x178a   : > { %v4140_v37 = vpop.f32.mrb[36].mxu0 }
0x178b   : > { %v2978_v48 = vpack.c.bf16 %v4140_v37, %v4140_v37  ;;  %v2963_v40 = vpop.f32.mrb[37].mxu0 }
0x178c   : > { %v4141_v41 = vpop.f32.mrb[38].mxu0 }
0x178d   : > { %2995 = vrot.lane.b32.xlu1 %v2978_v48, %s4547_s20  ;;  %v2966_v42 = vpop.f32.mrb[39].mxu0  ;;  %v3766_v41 = vld [vmem:[%s5515_s9 + $0x1] ss:$0 sm:$0xff] }
0x178e   : > { %v2977_v46 = vpack.c.bf16 %v2966_v42, %v2963_v40 }
0x1790   : > { %2993 = vrot.lane.b32.xlu0 %v2977_v46, %s4547_s20  ;;  %s5560_s20 = sld [smem:[#allocation15_spill]] }
0x1796   : > { %s5464_s0 = scalar_lea.hbm %s5560_s20, %s3839_s16 }
0x17ff   : > { %v2996_v30 = vpop.permute.xlu1 %2995 }
0x1800   : > { %v3010_v0 = vsel %vm1627_vm7, %v3006_v62, %v2996_v30  ;;  %v4319_v30 = vld [vmem:[%s5519_s13 + $0xc0] sm:$0xff]   ;;  %v4324_v62 = vld [vmem:[%s5519_s13 + $0x90] sm:$0xff]  }
0x1801   : > { %3974 = vmatprep.subr.bf16.mxu0 %v4319_v30 }
0x1802   : > { %v2994_v58 = vpop.permute.xlu0 %2993 }
0x1803   : > { %v3008_v7 = vsel %vm1627_vm7, %v3004_v59, %v2994_v58  ;;  %v4321_v58 = vld [vmem:[%s5519_s13 + $0xc8] sm:$0xff]  }
0x1804   : > { %4150 = vmatprep.mubr.msk.bf16.mxu0 %vm748_vm0, %v3008_v7  ;;  %v4322_v59 = vld [vmem:[%s5519_s13 + $0x88] sm:$0xff]   ;;  %v4325_v7 = vld [vmem:[%s5519_s13 + $0xd8] sm:$0xff]  }
0x1805   : > { %4151 = vmatmul.mubr.msk.bf16.vlgmr.msra.gmra.mrb[40].mxu0 %vm748_vm0, %v3010_v0  ;;  %v4326_v0 = vld [vmem:[%s5519_s13 + $0x98] sm:$0xff]  }
0x1806   : > { %3975 = vmatpush3.bf16.msra.mxu0 %v4320_v56 }
0x1807   : > { %3976 = vmatprep.subr.bf16.mxu0 %v4321_v58 }
0x180a   : > { %3977 = vmatpush3.bf16.msra.mxu0 %v4322_v59 }
0x18d8   : > { %v4152_v49 = vpop.f32.mrb[40].mxu0 }
0x18d9   : > { %v3098_v52 = vadd.f32 %v4152_v49, %v5106_v5  ;;  %v3082_v53 = vpop.f32.mrb[41].mxu0  ;;  %v4327_v49 = vld [vmem:[%s5519_s13 + $0xe0] sm:$0xff]  }
0x18da   : > { %v3096_v1 = vadd.f32 %v3082_v53, %v5096_v60  ;;  %v4153_v2 = vpop.f32.mrb[42].mxu0  ;;  %v4330_v53 = vld [vmem:[%s5519_s13 + $0xa8] sm:$0xff]  }
0x18db   : > { %v3109_v13 = vadd.f32 %v3763_v38, %v3098_v52  ;;  %v3085_v57 = vpop.f32.mrb[43].mxu0  ;;  %v4329_v52 = vld [vmem:[%s5519_s13 + $0xe8] sm:$0xff]   ;;  %v4332_v2 = vld [vmem:[%s5519_s13 + $0xb0] sm:$0xff]  }
0x18dc   : > { %v5349_v3 = vadd.f32 %v3763_v38, %v3096_v1  ;;  %v3097_v45 = vadd.f32 %v3085_v57, %v5099_v63  ;;  %v4331_v1 = vld [vmem:[%s5519_s13 + $0xf0] sm:$0xff]   ;;  %v4334_v57 = vld [vmem:[%s5519_s13 + $0xb8] sm:$0xff]  }
0x18dd   : > { %v3120_v15 = vsel %vm755_vm1, %v3109_v13, 0.0 }
0x18de   : > { %v3108_v43 = vadd.f32 %v3763_v38, %v3097_v45  ;;  %v3114_v4 = vsel %vm748_vm0, %v5349_v3, 0.0  ;;  %v4328_v38 = vld [vmem:[%s5519_s13 + $0xa0] sm:$0xff]  }
0x18df   : > { %3115 = vadd.xlane.f32.xlu0 %v3114_v4 }
0x18e0   : > { %v3117_v47 = vsel %vm748_vm0, %v3108_v43, 0.0 }
0x18e1   : > { %3118 = vadd.xlane.f32.xlu1 %v3117_v47 }
0x196c   : > { %v3116_v6 = vpop.xlane.xlu0 %3115 }
0x196d   : > { %v3123_v5 = vmul.f32 0.015625, %v3116_v6 }
0x196e   : > { %v3119_v9 = vpop.xlane.xlu1 %3118 }
0x196f   : > { %v3126_v60 = vsub.f32 %v5349_v3, %v3123_v5  ;;  %v3124_v10 = vmul.f32 0.015625, %v3119_v9 }
0x1971   : > { %v3127_v11 = vsub.f32 %v3108_v43, %v3124_v10  ;;  %v3129_v12 = vmul.f32 %v3126_v60, %v3126_v60  ;;  %v3776_v10 = vld [vmem:[%s5518_s12 + $0x2] sm:$0x3] }
0x1973   : > { %v3132_v14 = vsel %vm748_vm0, %v3129_v12, 0.0  ;;  %v3130_v44 = vmul.f32 %v3127_v11, %v3127_v11  ;;  %v3192_v12 = vrot.slane %v3776_v10, %v4811_v32 }
0x1974   : > { %3133 = vadd.xlane.f32.xlu0 %v3132_v14 }
0x1975   : > { %v3135_v63 = vsel %vm748_vm0, %v3130_v44, 0.0 }
0x1978   : > { %3136 = vadd.xlane.f32.xlu0 %v3135_v63 }
0x197c   : > { %3121 = vadd.xlane.f32.xlu0 %v3120_v15 }
0x1a01   : > { %v3134_v24 = vpop.xlane.xlu0 %3133 }
0x1a02   : > { %v3141_v17 = vmul.f32 0.015625, %v3134_v24 }
0x1a04   : > { %v3144_v19 = vadd.f32 1e-06, %v3141_v17 }
0x1a05   : > { %v3137_v25 = vpop.xlane.xlu0 %3136 }
0x1a06   : > { %4461 = vrsqrt.f32 %v3144_v19  ;;  %v3142_v27 = vmul.f32 0.015625, %v3137_v25 }
0x1a08   : > { %v3145_v31 = vadd.f32 1e-06, %v3142_v27 }
0x1a09   : > { %v3122_v33 = vpop.xlane.xlu0 %3121 }
0x1a0a   : > { %4463 = vrsqrt.f32 %v3145_v31  ;;  %v3125_v34 = vmul.f32 0.015625, %v3122_v33 }
0x1a0c   : > { %v3128_v35 = vsub.f32 %v3109_v13, %v3125_v34  ;;  %v4333_v13 = vld [vmem:[%s5519_s13 + $0xf8] sm:$0xff]  }
0x1a0e   : > { %v3131_v36 = vmul.f32 %v3128_v35, %v3128_v35 }
0x1a10   : > { %v4462_v37 = vpop.eup %4461  ;;  %v3138_v48 = vsel %vm755_vm1, %v3131_v36, 0.0 }
0x1a11   : > { %v3150_v40 = vmul.f32 %v4462_v37, %v3126_v60  ;;  %3139 = vadd.xlane.f32.xlu1 %v3138_v48 }
0x1a13   : > { %v3159_v46 = vmul.f32 %v3766_v41, %v3150_v40 }
0x1a14   : > { %v4464_v42 = vpop.eup %4463 }
0x1a15   : > { %v3151_v51 = vmul.f32 %v4464_v42, %v3127_v11  ;;  %v3168_v39 = vadd.f32 %v3767_v54, %v3159_v46  ;;  %v3188_v11 = vrot.slane %v3776_v10, %v4806_v29 }
0x1a17   : > { %v3160_v28 = vmul.f32 %v3766_v41, %v3151_v51 }
0x1a19   : > { %v3169_v55 = vadd.f32 %v3767_v54, %v3160_v28 }
0x1a1b   : > { %v3171_v50 = vpack.c.bf16 %v3169_v55, %v3168_v39 }
0x1a1d   : > { %3785 = vmatmul.mubr.msk.bf16.vlgmr.msra.gmra.mrb[68].mxu1 %vm748_vm0, %v3171_v50 }
0x1a1e   : > { %3283 = vmatprep.mubr.bf16.mxu1 %v4545_v61  ;;  %v4323_v61 = vld [vmem:[%s5519_s13 + $0xd0] sm:$0xff]  }
0x1a1f   : > { %3978 = vmatprep.subr.bf16.mxu0 %v4323_v61 }
0x1a20   : > { %3979 = vmatpush3.bf16.msra.mxu0 %v4324_v62 }
0x1a21   : > { %3980 = vmatprep.subr.bf16.mxu0 %v4325_v7 }
0x1a24   : > { %3981 = vmatpush3.bf16.msra.mxu0 %v4326_v0 }
0x1a25   : > { %3982 = vmatprep.subr.bf16.mxu0 %v4327_v49 }
0x1a28   : > { %3983 = vmatpush3.bf16.msra.mxu0 %v4328_v38 }
0x1a29   : > { %3984 = vmatprep.subr.bf16.mxu0 %v4329_v52 }
0x1a2c   : > { %3985 = vmatpush3.bf16.msra.mxu0 %v4330_v53 }
0x1a2d   : > { %3986 = vmatprep.subr.bf16.mxu0 %v4331_v1 }
0x1a30   : > { %3987 = vmatpush3.bf16.msra.mxu0 %v4332_v2 }
0x1a31   : > { %3988 = vmatprep.subr.bf16.mxu0 %v4333_v13 }
0x1a34   : > { %3989 = vmatpush3.bf16.msra.mxu0 %v4334_v57 }
0x1a9e   : > { %v3140_v45 = vpop.xlane.xlu1 %3139 }
0x1a9f   : > { %v3143_v43 = vmul.f32 0.015625, %v3140_v45 }
0x1aa1   : > { %v3146_v4 = vadd.f32 1e-06, %v3143_v43  ;;  %v3836_v43 = vld [vmem:[%s5520_s14 + $0x1] ss:$0 sm:$0xff] }
0x1aa3   : > { %4465 = vrsqrt.f32 %v3146_v4 }
0x1aad   : > { %v4466_v47 = vpop.eup %4465 }
0x1aae   : > { %v3152_v6 = vmul.f32 %v4466_v47, %v3128_v35 }
0x1ab0   : > { %v3161_v5 = vmul.f32 %v3766_v41, %v3152_v6 }
0x1ab2   : > { %v3170_v9 = vadd.f32 %v3767_v54, %v3161_v5 }
0x1ab4   : > { %v3172_v60 = vpack.c.bf16 %v3170_v9, %v3170_v9 }
0x1ab6   : > { %3786 = vmatmul.mubr.msk.bf16.gmra.mrb[72].mxu1 %vm748_vm0, %v3172_v60 }
0x1af0   : > { %v3275_v14 = vpop.f32.mrb[68].mxu1 }
0x1af1   : > { %v3276_v44 = vadd.f32 %v3275_v14, %v3188_v11  ;;  %v3277_v63 = vpop.f32.mrb[69].mxu1 }
0x1af2   : > { %v3278_v15 = vadd.f32 %v3277_v63, %v3192_v12  ;;  %v3279_v16 = vpop.f32.mrb[70].mxu1 }
0x1af3   : > { %v3298_v18 = vmul.f32 0.70710677, %v3276_v44  ;;  %v3280_v20 = vadd.f32 %v3279_v16, %v3188_v11  ;;  %v3281_v26 = vpop.f32.mrb[71].mxu1  ;;  %v3292_v27 = vmul.f32 0.5, %v3276_v44 }
0x1af4   : > { %v3299_v21 = vmul.f32 0.70710677, %v3278_v15  ;;  %v3282_v8 = vadd.f32 %v3281_v26, %v3192_v12  ;;  %v3293_v34 = vmul.f32 0.5, %v3278_v15 }
0x1af5   : > { %4467 = verf.f32 %v3298_v18  ;;  %v3300_v22 = vmul.f32 0.70710677, %v3280_v20  ;;  %v3294_v31 = vmul.f32 0.5, %v3280_v20  ;;  %v3837_v20 = vld [vmem:[%s5521_s15] ss:$0 sm:$0xff] }
0x1af6   : > { %4469 = verf.f32 %v3299_v21  ;;  %v3301_v23 = vmul.f32 0.70710677, %v3282_v8  ;;  %v3295_v35 = vmul.f32 0.5, %v3282_v8  ;;  %v3838_v21 = vld [vmem:[%s5558_s30] ss:$0 sm:$0xff] }
0x1af7   : > { %4471 = verf.f32 %v3300_v22 }
0x1af8   : > { %4473 = verf.f32 %v3301_v23 }
0x1aff   : > { %v4468_v24 = vpop.eup %4467 }
0x1b00   : > { %v4470_v29 = vpop.eup %4469  ;;  %v3310_v17 = vadd.f32 1.0, %v4468_v24 }
0x1b01   : > { %v4472_v32 = vpop.eup %4471  ;;  %v3311_v19 = vadd.f32 1.0, %v4470_v29 }
0x1b02   : > { %v4474_v25 = vpop.eup %4473  ;;  %v3312_v33 = vadd.f32 1.0, %v4472_v32  ;;  %v3316_v37 = vmul.f32 %v3310_v17, %v3292_v27 }
0x1b03   : > { %v3313_v36 = vadd.f32 1.0, %v4474_v25  ;;  %v3317_v40 = vmul.f32 %v3311_v19, %v3293_v34 }
0x1b04   : > { %v3318_v48 = vmul.f32 %v3312_v33, %v3294_v31 }
0x1b05   : > { %v3319_v41 = vmul.f32 %v3313_v36, %v3295_v35 }
0x1b06   : > { %v3322_v42 = vpack.c.bf16 %v3318_v48, %v3316_v37 }
0x1b07   : > { %v3323_v46 = vpack.c.bf16 %v3319_v41, %v3317_v40 }
0x1b09   : > { %3487 = vmatprep.mubr.bf16.mxu0 %v3323_v46 }
0x1b0a   : > { %3488 = vmatmul.mubr.bf16.vlgmr.msra.gmra.mrb[44].mxu0 %v3322_v42 }
0x1b89   : > { %v3285_v51 = vpop.f32.mrb[72].mxu1 }
0x1b8a   : > { %v3286_v54 = vadd.f32 %v3285_v51, %v3188_v11  ;;  %v3287_v28 = vpop.f32.mrb[73].mxu1 }
0x1b8b   : > { %v3288_v39 = vadd.f32 %v3287_v28, %v3192_v12  ;;  %v3289_v55 = vpop.f32.mrb[74].mxu1 }
0x1b8c   : > { %v3302_v50 = vmul.f32 0.70710677, %v3286_v54  ;;  %v3290_v30 = vpop.f32.mrb[75].mxu1  ;;  %v3296_v61 = vmul.f32 0.5, %v3286_v54 }
0x1b8d   : > { %v3303_v56 = vmul.f32 0.70710677, %v3288_v39  ;;  %v3297_v7 = vmul.f32 0.5, %v3288_v39 }
0x1b8e   : > { %4475 = verf.f32 %v3302_v50 }
0x1b8f   : > { %4477 = verf.f32 %v3303_v56 }
0x1b98   : > { %v4476_v58 = vpop.eup %4475 }
0x1b99   : > { %v4478_v59 = vpop.eup %4477  ;;  %v3314_v62 = vadd.f32 1.0, %v4476_v58 }
0x1b9a   : > { %v3315_v0 = vadd.f32 1.0, %v4478_v59 }
0x1b9b   : > { %v3320_v49 = vmul.f32 %v3314_v62, %v3296_v61 }
0x1b9c   : > { %v3321_v38 = vmul.f32 %v3315_v0, %v3297_v7 }
0x1b9d   : > { %v3324_v53 = vpack.c.bf16 %v3320_v49, %v3320_v49 }
0x1b9e   : > { %v3325_v52 = vpack.c.bf16 %v3321_v38, %v3321_v38 }
0x1ba0   : > { %3494 = vmatprep.mubr.bf16.mxu0 %v3325_v52 }
0x1ba1   : > { %3495 = vmatmul.mubr.bf16.gmra.mrb[48].mxu0 %v3324_v53 }
0x1bdd   : > { %v3990_v1 = vpop.f32.mrb[44].mxu0 }
0x1bde   : > { %v3991_v2 = vpop.f32.mrb[45].mxu0 }
0x1bdf   : > { %v3992_v13 = vadd.f32 %v3991_v2, %v3990_v1  ;;  %v3993_v57 = vpop.f32.mrb[46].mxu0 }
0x1be0   : > { %v3994_v45 = vpop.f32.mrb[47].mxu0 }
0x1be1   : > { %v3501_v4 = vadd.f32 %v3992_v13, %v5349_v3 }
0x1be3   : > { %v3510_v47 = vadd.f32 %v3836_v43, %v3501_v4 }
0x1be5   : > { %v3514_v6 = vsel %vm3513_vm8, %v3510_v47, 0.0 }
0x1be6   : > { %3515 = vadd.xlane.f32.xlu0 %v3514_v6 }
0x1c73   : > { %v3516_v5 = vpop.xlane.xlu0 %3515 }
0x1c74   : > { %v3517_v9 = vmul.f32 0.015625, %v3516_v5  ;;  %v3996_v60 = vpop.f32.mrb[48].mxu0 }
0x1c75   : > { %v3997_v10 = vpop.f32.mrb[49].mxu0 }
0x1c76   : > { %v3518_v11 = vsub.f32 %v3510_v47, %v3517_v9  ;;  %v3999_v12 = vpop.f32.mrb[50].mxu0 }
0x1c77   : > { %v4000_v14 = vpop.f32.mrb[51].mxu0 }
0x1c78   : > { %v3519_v44 = vmul.f32 %v3518_v11, %v3518_v11 }
0x1c7a   : > { %v3520_v63 = vsel %vm3513_vm8, %v3519_v44, 0.0 }
0x1c7b   : > { %3521 = vadd.xlane.f32.xlu1 %v3520_v63 }
0x1d08   : > { %v3522_v15 = vpop.xlane.xlu1 %3521 }
0x1d09   : > { %v3523_v16 = vmul.f32 0.015625, %v3522_v15 }
0x1d0b   : > { %v3524_v3 = vadd.f32 1e-06, %v3523_v16 }
0x1d0d   : > { %4479 = vrsqrt.f32 %v3524_v3 }
0x1d17   : > { %v4480_v18 = vpop.eup %4479 }
0x1d18   : > { %v3526_v26 = vmul.f32 %v4480_v18, %v3518_v11 }
0x1d1a   : > { %v3533_v8 = vmul.f32 %v3837_v20, %v3526_v26 }
0x1d1c   : > { %v3540_v22 = vadd.f32 %v3838_v21, %v3533_v8 }
0x1d1e   : > { %v3541_v23 = vsel %vm3513_vm8, %v3540_v22, 0.0 }
0x1d1f   : > { %v3542_v24 = vrot.slane %v3541_v23, 4 }
0x1d21   : > { %v3543_v29 = vadd.f32 %v3542_v24, %v3541_v23 }
0x1d23   : > { %v3544_v17 = vrot.slane %v3543_v29, 2 }
0x1d25   : > { %v3545_v32 = vadd.f32 %v3544_v17, %v3543_v29 }
0x1d27   : > { %v3546_v19 = vrot.slane %v3545_v32, 1 }
0x1d29   : > { %v3547_v25 = vadd.f32 %v3546_v19, %v3545_v32 }
0x1d2b   : > { %v3549_v27 = vmul.f32 0.5, %v3547_v25 }
0x1d2d   : > { %3551 = vst.msk [vmem:[%s540_s24] sm:$0x1] %vm3550_vm9, %v3549_v27 }
0x1d2e   : > { %4494 = shalt.err (!%p4491_p3)
}
0x1d2f   : > { %s4495_s30 = scalar_lea.hbm %s5464_s0, 16  ;;  %s4499_s24 = scalar_lea.hbm %s5560_s20, 32 }
0x1d30   : > { %p4496_p4 = scmp.ne.s32.totalorder %s5464_s0, %s4495_s30  ;;  %p4500_p9 = scmp.lt.u32.totalorder %s5464_s0, %s5560_s20 }
0x1d31   : > { %p4501_p10 = scmp.lt.u32.totalorder %s4499_s24, %s4495_s30  ;;  %p4503_p12 = scmp.lt.u32.totalorder %s4495_s30, %s5464_s0 }
0x1d32   : > { %p4497_p7 = pnand %p4496_p4, %p4682_p5 }
0x1d33   : > { %p4502_p11 = por %p4501_p10, %p4500_p9 }
0x1d34   : > { %p4498_p8 = pneg %p4497_p7 }
0x1d35   : > { %p4504_p13 = por %p4503_p12, %p4502_p11 }
0x1d37   : > { %p4505_p0 = pnand %p4504_p13, %p4498_p8 }
0x1d39   : > { %4508 = shalt.err (!%p4505_p0)
}
0x1d3a   : > { %4179 = dma.vmem_to_hbm [thread:$0]  (%p4682_p5), %s5466_s27, 16, %s5464_s0, %s3553_s21  }
0x1d3b PF: > { %s5561_s18 = sld [smem:[#allocation7_spill]]  ;;  %s5562_s28 = sld [smem:[#allocation5_spill]] }
0x1d41   : > { %p4185_p1 = scmp.ge.s32.totalorder %s5561_s18, 2  ;;  %s3577_s19 = sand.u32 1, %s5562_s28  }
0x1d42   : > { %s3578_s26 = scalar_lea.sflag [#allocation3], %s3577_s19 }
0x1d43   : > { %p4182_p2 = pnand %p4185_p1, %p4686_p6 }
0x1d45   : > { %4526 = dma.done.wait (!%p4182_p2), %s3578_s26, 16  }
0x1d46   : > { %4528 = vsyncadd (!%p4182_p2), %s3578_s26, 4294967280  ;;  %s5564_s27 = sld [smem:[#allocation8_spill]]  ;;  %s5565_s30 = sld [smem:[#allocation6_spill]] }
0x1d47   : > { %s5566_s26 = sld [smem:[#allocation9_spill]]  ;;  %s5567_s24 = smov %s4535_s25 }
0x1d4c   : > { %p27_p3 = scmp.ge.s32.totalorder %s5564_s27, 4   ;;  %s5568_s25 = smov %s5565_s30 }
0x1d4e   :  { %29 = sbr.rel (!%p27_p3) target bundleno = 8 (0x8), region = 135 }
0x1d55   :  { %3582 = vsyncpa [#allocation3], 1 }
0x1d56   :  { %3584 = vsyncpa [#allocation3 + $0x1], 1 }

</bundles_post_ra>
